<compile_context>
chip_gen: v6e
topology: v6e:2x2x1
jax: 0.10.0
libtpu: 0.0.40
codegen_flags: <defaults>
</compile_context>

<pallas_src>
import functools

import jax
import jax.numpy as jnp
from jax.experimental import pallas as pl
from jax.experimental.pallas import tpu as pltpu

_LANE = 128
_HIGHEST = jax.lax.Precision.HIGHEST

# Keep a skinny K-panel whole-array resident in VMEM when it is at most this
# big (pipeline double-buffers it => ~2x this in VMEM).
_RESIDENT_LIMIT_BYTES = 4 * 1024 * 1024

# Explicit scoped-VMEM budget: plenty for bn=1024 tiles, comfortably under
# v7x's 64 MiB physical per TensorCore and v5e/v6e's 128 MiB.
_VMEM_LIMIT_BYTES = 48 * 1024 * 1024

# Row-tile axis is independent (megacore-parallel); K axis is the accumulated
# contraction and must stay sequential.
_MM_PARAMS = pltpu.CompilerParams(
    dimension_semantics=("parallel", "arbitrary"),
    vmem_limit_bytes=_VMEM_LIMIT_BYTES)


def _round_up(v, m):
    return (v + m - 1) // m * m


def _pad2(a, rows, cols, dtype):
    a = a.astype(dtype)
    return jnp.pad(a, ((0, rows - a.shape[0]), (0, cols - a.shape[1])))


def _tile_size(n, block_n):
    """Row/K tile: multiple of 128, <= block_n, and (when the problem is big
    enough) capped so the parallel row axis has >= 2 tiles (v7x: 2 TCs)."""
    block_n = max(_LANE, _round_up(block_n, _LANE))
    n_max = _round_up(n, _LANE)
    bn = min(block_n, n_max)
    if n_max > _LANE:
        bn = min(bn, _round_up((n_max + 1) // 2, _LANE))
    return bn


def _use_xw1(nfeat, nhid):
    # Pick the contraction order that keeps the f32 accumulator (and the
    # streamed K-panel) at width min(fpad, hpad).
    return _round_up(nhid, _LANE) <= _round_up(nfeat, _LANE)


def _panel_spec(rows_pad, cols_pad, bn, resident):
    if resident:
        # Whole array, constant block index: DMA'd once, stays VMEM-resident.
        return pl.BlockSpec((rows_pad, cols_pad), lambda i, k: (0, 0))
    return pl.BlockSpec((bn, cols_pad), lambda i, k: (k, 0))


def _panel(ref, k, bn, resident):
    if resident:
        return ref[pl.ds(pl.multiple_of(k * bn, bn), bn), :]
    return ref[...]


def _prec(ref):
    # Full-precision MXU passes only matter for the f32 debug path; bf16 is
    # already exact on the MXU.
    return _HIGHEST if ref.dtype == jnp.float32 else None


# ---------------------------------------------------------------------------
# Kernel 1a: h1 = relu(adj @ (x@W1) + b1)      (x@W1 precomputed, hpad<=fpad)
# ---------------------------------------------------------------------------
def _gc1_pre_kernel(adj_ref, xw1_ref, b1_ref, h1_ref, acc_ref, *, bn, resident):
    k = pl.program_id(1)

    @pl.when(k == 0)
    def _init():
        acc_ref[...] = jnp.zeros_like(acc_ref)

    acc_ref[...] += jnp.dot(adj_ref[...], _panel(xw1_ref, k, bn, resident),
                            preferred_element_type=jnp.float32,
                            precision=_prec(adj_ref))

    @pl.when(k == pl.num_programs(1) - 1)
    def _finalize():
        h1_ref[...] = jnp.maximum(acc_ref[...] + b1_ref[...],
                                  0.0).astype(h1_ref.dtype)


# ---------------------------------------------------------------------------
# Kernel 1b: h1 = relu((adj @ x) @ W1 + b1)    (used when fpad < hpad)
# ---------------------------------------------------------------------------
def _gc1_post_kernel(adj_ref, x_ref, w1_ref, b1_ref, h1_ref, acc_ref, *,
                     bn, resident):
    k = pl.program_id(1)

    @pl.when(k == 0)
    def _init():
        acc_ref[...] = jnp.zeros_like(acc_ref)

    acc_ref[...] += jnp.dot(adj_ref[...], _panel(x_ref, k, bn, resident),
                            preferred_element_type=jnp.float32,
                            precision=_prec(adj_ref))

    @pl.when(k == pl.num_programs(1) - 1)
    def _finalize():
        h = jnp.dot(acc_ref[...].astype(w1_ref.dtype), w1_ref[...],
                    preferred_element_type=jnp.float32,
                    precision=_prec(w1_ref))
        h1_ref[...] = jnp.maximum(h + b1_ref[...], 0.0).astype(h1_ref.dtype)


# ---------------------------------------------------------------------------
# Kernel 2: s = (H^T @ h1) @ W2    (pooling + second-layer projection fused)
# H arrives UN-transposed; the (bn, bn) tile is contracted on its node axis
# (axis 0) via dot_general -> in-register/XLU transpose, no HBM H^T pre-pass.
# ---------------------------------------------------------------------------
def _pool_proj_kernel(h_ref, h1_ref, w2_ref, s_ref, acc_ref, *, bn, resident):
    k = pl.program_id(1)

    @pl.when(k == 0)
    def _init():
        acc_ref[...] = jnp.zeros_like(acc_ref)

    acc_ref[...] += jax.lax.dot_general(
        h_ref[...], _panel(h1_ref, k, bn, resident),
        dimension_numbers=(((0,), (0,)), ((), ())),
        preferred_element_type=jnp.float32, precision=_prec(h_ref))

    @pl.when(k == pl.num_programs(1) - 1)
    def _finalize():
        s = jnp.dot(acc_ref[...].astype(w2_ref.dtype), w2_ref[...],
                    preferred_element_type=jnp.float32,
                    precision=_prec(w2_ref))
        s_ref[...] = s.astype(s_ref.dtype)


# ---------------------------------------------------------------------------
# Kernel 3: out = log_softmax(adj @ s + b2, axis=1), masking padded class lanes
# ---------------------------------------------------------------------------
def _gc3_logsoftmax_kernel(adj_ref, s_ref, b2_ref, out_ref, acc_ref, *,
                           bn, nclass, resident):
    k = pl.program_id(1)

    @pl.when(k == 0)
    def _init():
        acc_ref[...] = jnp.zeros_like(acc_ref)

    acc_ref[...] += jnp.dot(adj_ref[...], _panel(s_ref, k, bn, resident),
                            preferred_element_type=jnp.float32,
                            precision=_prec(adj_ref))

    @pl.when(k == pl.num_programs(1) - 1)
    def _finalize():
        z = acc_ref[...] + b2_ref[...]
        col = jax.lax.broadcasted_iota(jnp.int32, z.shape, 1)
        valid = col < nclass
        m = jnp.max(jnp.where(valid, z, -jnp.inf), axis=1, keepdims=True)
        p = jnp.where(valid, jnp.exp(z - m), 0.0)
        lse = jnp.log(jnp.sum(p, axis=1, keepdims=True))
        out_ref[...] = ((z - m) - lse).astype(out_ref.dtype)


# ---------------------------------------------------------------------------
# Wrappers
# ---------------------------------------------------------------------------
def prepare_hain_graph(adj, incidence_matrix, *, compute_dtype=jnp.bfloat16,
                       block_n=1024):
    """Pad + cast the per-graph constants ONCE; reuse across forward passes."""
    n_nodes, n_edges = incidence_matrix.shape
    assert adj.shape == (n_nodes, n_nodes)
    # gc3 applies the (N, N) adj to the (E, nhid) pooled features: only valid
    # when E == N (square incidence), exactly as the PyTorch reference needs.
    assert n_edges == n_nodes, "incidence_matrix must be square (E == N)"
    cdt = jnp.dtype(compute_dtype)
    bn = _tile_size(n_nodes, block_n)
    npad = _round_up(n_nodes, bn)
    epad = _round_up(n_edges, bn)
    return (_pad2(adj, npad, npad, cdt),
            _pad2(incidence_matrix, npad, epad, cdt))


@functools.partial(jax.jit, static_argnames=("compute_dtype", "block_n"))
def hain_forward_prepared(params, x, adj_p, h_p, *,
                          compute_dtype=jnp.bfloat16, block_n=1024):
    n_nodes, nfeat = x.shape
    nhid = params["w1"].shape[1]
    nclass = params["w2"].shape[1]

    cdt = jnp.dtype(compute_dtype)
    isz = cdt.itemsize

    bn = _tile_size(n_nodes, block_n)          # must match prepare_hain_graph
    npad = _round_up(n_nodes, bn)
    epad = h_p.shape[1]
    assert adj_p.shape == (npad, npad), "adj_p / block_n mismatch"
    assert h_p.shape[0] == npad and epad % bn == 0, "h_p / block_n mismatch"

    fpad = _round_up(nfeat, _LANE)
    hpad = _round_up(nhid, _LANE)
    cpad = _round_up(nclass, _LANE)

    adj_p = adj_p.astype(cdt)                  # no-op when prepared with cdt
    h_p = h_p.astype(cdt)
    w1_p = _pad2(params["w1"], fpad, hpad, cdt)
    w2_p = _pad2(params["w2"], hpad, cpad, cdt)
    b1_p = _pad2(params["b1"].reshape(1, -1), 1, hpad, jnp.float32)
    b2_p = _pad2(params["b2"].reshape(1, -1), 1, cpad, jnp.float32)

    n_row = npad // bn
    e_row = epad // bn

    # ---- Kernel 1: h1 = relu(adj @ (x @ W1) + b1) --------------------------
    if _use_xw1(nfeat, nhid):
        # Tiny (N x nfeat x nhid) pre-projection (XLA): keeps K1's f32
        # accumulator and the streamed K-panel at width hpad <= fpad.
        xw1 = jnp.dot(x.astype(cdt), params["w1"].astype(cdt),
                      preferred_element_type=jnp.float32,
                      precision=_HIGHEST).astype(cdt)
        xw1_p = _pad2(xw1, npad, hpad, cdt)
        res1 = npad * hpad * isz <= _RESIDENT_LIMIT_BYTES
        h1 = pl.pallas_call(
            functools.partial(_gc1_pre_kernel, bn=bn, resident=res1),
            out_shape=jax.ShapeDtypeStruct((npad, hpad), cdt),
            grid=(n_row, n_row),
            in_specs=[
                pl.BlockSpec((bn, bn), lambda i, k: (i, k)),      # adj tile
                _panel_spec(npad, hpad, bn, res1),                # x@W1 panel
                pl.BlockSpec((1, hpad), lambda i, k: (0, 0)),     # b1
            ],
            out_specs=pl.BlockSpec((bn, hpad), lambda i, k: (i, 0)),
            scratch_shapes=[pltpu.VMEM((bn, hpad), jnp.float32)],
            compiler_params=_MM_PARAMS,
            cost_estimate=pl.CostEstimate(
                flops=2 * npad * npad * hpad,
                transcendentals=0,
                bytes_accessed=(npad * npad * isz
                                + npad * hpad * isz * (1 if res1 else n_row)
                                + hpad * 4 + npad * hpad * isz)),
        )(adj_p, xw1_p, b1_p)
    else:
        x_p = _pad2(x, npad, fpad, cdt)
        res1 = npad * fpad * isz <= _RESIDENT_LIMIT_BYTES
        h1 = pl.pallas_call(
            functools.partial(_gc1_post_kernel, bn=bn, resident=res1),
            out_shape=jax.ShapeDtypeStruct((npad, hpad), cdt),
            grid=(n_row, n_row),
            in_specs=[
                pl.BlockSpec((bn, bn), lambda i, k: (i, k)),      # adj tile
                _panel_spec(npad, fpad, bn, res1),                # x panel
                pl.BlockSpec((fpad, hpad), lambda i, k: (0, 0)),  # W1 resident
                pl.BlockSpec((1, hpad), lambda i, k: (0, 0)),     # b1
            ],
            out_specs=pl.BlockSpec((bn, hpad), lambda i, k: (i, 0)),
            scratch_shapes=[pltpu.VMEM((bn, fpad), jnp.float32)],
            compiler_params=_MM_PARAMS,
            cost_estimate=pl.CostEstimate(
                flops=2 * npad * npad * fpad + 2 * npad * fpad * hpad,
                transcendentals=0,
                bytes_accessed=(npad * npad * isz
                                + npad * fpad * isz * (1 if res1 else n_row)
                                + fpad * hpad * isz + hpad * 4
                                + npad * hpad * isz)),
        )(adj_p, x_p, w1_p, b1_p)

    # ---- Kernel 2: s = (H^T @ h1) @ W2 --------------------------------------
    res2 = npad * hpad * isz <= _RESIDENT_LIMIT_BYTES
    s = pl.pallas_call(
        functools.partial(_pool_proj_kernel, bn=bn, resident=res2),
        out_shape=jax.ShapeDtypeStruct((epad, cpad), cdt),
        grid=(e_row, n_row),
        in_specs=[
            pl.BlockSpec((bn, bn), lambda i, k: (k, i)),          # H (no ^T)
            _panel_spec(npad, hpad, bn, res2),                    # h1 panel
            pl.BlockSpec((hpad, cpad), lambda i, k: (0, 0)),      # W2 resident
        ],
        out_specs=pl.BlockSpec((bn, cpad), lambda i, k: (i, 0)),
        scratch_shapes=[pltpu.VMEM((bn, hpad), jnp.float32)],
        compiler_params=_MM_PARAMS,
        cost_estimate=pl.CostEstimate(
            flops=2 * epad * npad * hpad + 2 * epad * hpad * cpad,
            transcendentals=0,
            bytes_accessed=(npad * epad * isz
                            + npad * hpad * isz * (1 if res2 else e_row)
                            + hpad * cpad * isz + epad * cpad * isz)),
    )(h_p, h1, w2_p)

    # ---- Kernel 3: out = log_softmax(adj @ s + b2, axis=1) ------------------
    res3 = epad * cpad * isz <= _RESIDENT_LIMIT_BYTES
    out_p = pl.pallas_call(
        functools.partial(_gc3_logsoftmax_kernel, bn=bn, nclass=nclass,
                          resident=res3),
        out_shape=jax.ShapeDtypeStruct((npad, cpad), jnp.float32),
        grid=(n_row, e_row),
        in_specs=[
            pl.BlockSpec((bn, bn), lambda i, k: (i, k)),          # adj tile
            _panel_spec(epad, cpad, bn, res3),                    # s panel
            pl.BlockSpec((1, cpad), lambda i, k: (0, 0)),         # b2
        ],
        out_specs=pl.BlockSpec((bn, cpad), lambda i, k: (i, 0)),
        scratch_shapes=[pltpu.VMEM((bn, cpad), jnp.float32)],
        compiler_params=_MM_PARAMS,
        cost_estimate=pl.CostEstimate(
            flops=2 * npad * epad * cpad + 10 * npad * cpad,
            transcendentals=npad * cpad + npad,
            bytes_accessed=(npad * epad * isz
                            + epad * cpad * isz * (1 if res3 else n_row)
                            + cpad * 4 + npad * cpad * 4)),
    )(adj_p, s, b2_p)

    return out_p[:n_nodes, :nclass]


def hain_forward(params, x, adj, incidence_matrix, incidence_tensor=None, *,
                 compute_dtype=jnp.bfloat16, block_n=1024):
    """Full HAIN.forward.  For repeated calls on the same graph, call
    prepare_hain_graph() once and hain_forward_prepared() (hoists the adj/H
    pad+cast out of steady state)."""
    del incidence_tensor  # TODO(synk): unused — layer source not provided.
    adj_p, h_p = prepare_hain_graph(adj, incidence_matrix,
                                    compute_dtype=compute_dtype,
                                    block_n=block_n)
    return hain_forward_prepared(params, x, adj_p, h_p,
                                 compute_dtype=compute_dtype, block_n=block_n)


# ---------------------------------------------------------------------------
# Pure-JAX references
# ---------------------------------------------------------------------------
def hain_reference(params, x, adj, incidence_matrix, incidence_tensor=None):
    del incidence_tensor
    hp = _HIGHEST
    h1 = jnp.maximum(
        jnp.dot(adj, jnp.dot(x, params["w1"], precision=hp), precision=hp)
        + params["b1"], 0.0)
    he = jnp.dot(incidence_matrix.T, h1, precision=hp)
    z = jnp.dot(adj, jnp.dot(he, params["w2"], precision=hp), precision=hp) \
        + params["b2"]
    return jax.nn.log_softmax(z, axis=1)


def hain_reference_bf16(params, x, adj, incidence_matrix):
    # Same contraction order / bf16 rounding points as the default kernel path.
    bf, f32 = jnp.bfloat16, jnp.float32
    if _use_xw1(x.shape[1], params["w1"].shape[1]):
        xw1 = jnp.dot(x.astype(bf), params["w1"].astype(bf),
                      preferred_element_type=f32, precision=_HIGHEST).astype(bf)
        t = jnp.dot(adj.astype(bf), xw1, preferred_element_type=f32)
    else:
        t = jnp.dot(
            jnp.dot(adj.astype(bf), x.astype(bf),
                    preferred_element_type=f32).astype(bf),
            params["w1"].astype(bf), preferred_element_type=f32)
    h1 = jnp.maximum(t + params["b1"], 0.0).astype(bf)
    he = jnp.dot(incidence_matrix.T.astype(bf), h1, preferred_element_type=f32)
    s = jnp.dot(he.astype(bf), params["w2"].astype(bf),
                preferred_element_type=f32).astype(bf)
    z = jnp.dot(adj.astype(bf), s, preferred_element_type=f32) + params["b2"]
    return jax.nn.log_softmax(z, axis=1)


# ---------------------------------------------------------------------------
if __name__ == "__main__":
    def make_inputs(key, n, nfeat, nhid1, nclass):
        k = jax.random.split(key, 6)
        x = jax.random.normal(k[0], (n, nfeat), dtype=jnp.float32)
        adj_raw = jax.random.uniform(k[1], (n, n), dtype=jnp.float32)
        adj = 0.5 * (adj_raw + adj_raw.T)                          # symmetric
        inc_mat = (jax.random.uniform(k[2], (n, n)) > 0.5).astype(jnp.float32)
        inc_tensor = jax.random.normal(k[3], (n, n), dtype=jnp.float32)
        params = {
            "w1": 0.1 * jax.random.normal(k[4], (nfeat, nhid1), jnp.float32),
            "b1": 0.01 * jnp.ones((nhid1,), dtype=jnp.float32),
            "w2": 0.1 * jax.random.normal(k[5], (nhid1, nclass), jnp.float32),
            "b2": 0.01 * jnp.ones((nclass,), dtype=jnp.float32),
        }
        return params, x, adj, inc_mat, inc_tensor

    key0, key1 = jax.random.split(jax.random.PRNGKey(0))

    # --- Config 1 (branch A: x@W1 pre-projection): N=16, nfeat=8, nhid=32 ----
    params, x, adj, H, inc_t = make_inputs(key0, 16, 8, 32, 4)
    ref = hain_reference(params, x, adj, H, inc_t)

    # Steady-state API (graph constants hoisted), f32 compute: tight check of
    # the tiling / padding / masking / fusion logic.
    adj_p32, h_p32 = prepare_hain_graph(adj, H, compute_dtype=jnp.float32)
    out_f32 = jax.block_until_ready(
        hain_forward_prepared(params, x, adj_p32, h_p32,
                              compute_dtype=jnp.float32))
    assert out_f32.shape == (16, 4) and out_f32.dtype == jnp.float32
    assert jnp.allclose(out_f32, ref, atol=1e-3, rtol=1e-3), "f32 mismatch (A)"

    # Default bf16 (MXU-native) path through the convenience wrapper.
    out_bf16 = jax.block_until_ready(hain_forward(params, x, adj, H, inc_t))
    ref_bf = hain_reference_bf16(params, x, adj, H)
    assert out_bf16.shape == (16, 4)
    assert jnp.allclose(out_bf16, ref_bf, atol=2e-2, rtol=2e-2), "bf16 mismatch"
    assert jnp.allclose(out_bf16, ref, atol=5e-1, rtol=1e-1), "bf16 sanity"

    # --- Config 2 (branch B: adj@x first): N=32, nfeat=8, nhid=200 -----------
    params2, x2, adj2, H2, inc_t2 = make_inputs(key1, 32, 8, 200, 5)
    ref2 = hain_reference(params2, x2, adj2, H2, inc_t2)
    out2 = jax.block_until_ready(
        hain_forward(params2, x2, adj2, H2, inc_t2, compute_dtype=jnp.float32))
    assert out2.shape == (32, 5)
    assert jnp.allclose(out2, ref2, atol=1e-3, rtol=1e-3), "f32 mismatch (B)"

    print("KERNEL_OK")
</pallas_src>

<mosaic_0001>
module attributes {stable_mosaic.version = 11 : i64} {
  func.func @_gc1_pre_kernel(%arg0: i32, %arg1: i32, %arg2: memref<128x128xf32, #tpu.memory_space<vmem>>, %arg3: memref<128x128xf32, #tpu.memory_space<vmem>>, %arg4: memref<1x128xf32, #tpu.memory_space<vmem>>, %arg5: memref<128x128xf32, #tpu.memory_space<vmem>>, %arg6: memref<128x128xf32, #tpu.memory_space<vmem>>) attributes {dimension_semantics = [#tpu.dimension_semantics<parallel>, #tpu.dimension_semantics<arbitrary>], iteration_bounds = array<i64: 1, 1>, scalar_prefetch = 0 : i64, scratch_operands = 1 : i64, tpu.core_type = #tpu.core_type<tc>, window_params = [{transform_indices = @transform_0, window_bounds = array<i64: 128, 128>}, {pipeline_mode = #tpu.pipeline_mode<synchronous>, transform_indices = @transform_1, window_bounds = array<i64: 128, 128>}, {pipeline_mode = #tpu.pipeline_mode<synchronous>, transform_indices = @transform_2, window_bounds = array<i64: 1, 128>}, {transform_indices = @transform_3, window_bounds = array<i64: 128, 128>}]} {
    %c0_i32 = arith.constant 0 : i32
    %0 = arith.cmpi eq, %arg1, %c0_i32 : i32
    %1 = arith.extui %0 : i1 to i32
    %c0_i32_0 = arith.constant 0 : i32
    %2 = arith.cmpi ne, %1, %c0_i32_0 : i32
    scf.if %2 {
      %cst_9 = arith.constant 0.000000e+00 : f32
      %15 = vector.broadcast %cst_9 : f32 to vector<128x128xf32>
      %c0_10 = arith.constant 0 : index
      %c0_11 = arith.constant 0 : index
      %16 = vector.load %arg6[%c0_10, %c0_11] : memref<128x128xf32, #tpu.memory_space<vmem>>, vector<128x128xf32>
      tpu.vector_store %arg6[%c0_10, %c0_11], %15 {strides = array<i32>} : memref<128x128xf32, #tpu.memory_space<vmem>>, vector<128x128xf32>,
    } else {
    }
    %c0 = arith.constant 0 : index
    %c0_1 = arith.constant 0 : index
    %3 = vector.load %arg6[%c0, %c0_1] : memref<128x128xf32, #tpu.memory_space<vmem>>, vector<128x128xf32>
    %c0_2 = arith.constant 0 : index
    %c0_3 = arith.constant 0 : index
    %4 = vector.load %arg2[%c0_2, %c0_3] : memref<128x128xf32, #tpu.memory_space<vmem>>, vector<128x128xf32>
    %c128_i32 = arith.constant 128 : i32
    %5 = arith.muli %arg1, %c128_i32 : i32
    %6 = tpu.assume_multiple %5, 128 : i32
    %7 = arith.index_cast %6 : i32 to index
    %c0_4 = arith.constant 0 : index
    %8 = vector.load %arg3[%7, %c0_4] : memref<128x128xf32, #tpu.memory_space<vmem>>, vector<128x128xf32>
    %cst = arith.constant dense<0.000000e+00> : vector<128x128xf32>
    %9 = tpu.matmul %4, %8, %cst {dimension_numbers = #tpu.dot_dimension_numbers<[1], [0], [0], [1], [0, 0, 1, 1], [], []>, precision = #tpu.contract_precision<fp32>} : vector<128x128xf32>, vector<128x128xf32>, vector<128x128xf32> -> vector<128x128xf32>
    %10 = arith.addf %3, %9 : vector<128x128xf32>
    %c0_5 = arith.constant 0 : index
    %c0_6 = arith.constant 0 : index
    %11 = vector.load %arg6[%c0_5, %c0_6] : memref<128x128xf32, #tpu.memory_space<vmem>>, vector<128x128xf32>
    tpu.vector_store %arg6[%c0_5, %c0_6], %10 {strides = array<i32>} : memref<128x128xf32, #tpu.memory_space<vmem>>, vector<128x128xf32>,
    %c0_i32_7 = arith.constant 0 : i32
    %12 = arith.cmpi eq, %arg1, %c0_i32_7 : i32
    %13 = arith.extui %12 : i1 to i32
    %c0_i32_8 = arith.constant 0 : i32
    %14 = arith.cmpi ne, %13, %c0_i32_8 : i32
    scf.if %14 {
      %c0_9 = arith.constant 0 : index
      %c0_10 = arith.constant 0 : index
      %15 = vector.load %arg6[%c0_9, %c0_10] : memref<128x128xf32, #tpu.memory_space<vmem>>, vector<128x128xf32>
      %c0_11 = arith.constant 0 : index
      %c0_12 = arith.constant 0 : index
      %16 = vector.load %arg4[%c0_11, %c0_12] : memref<1x128xf32, #tpu.memory_space<vmem>>, vector<1x128xf32>
      %17 = vector.broadcast %16 : vector<1x128xf32> to vector<128x128xf32>
      %18 = arith.addf %15, %17 : vector<128x128xf32>
      %cst_13 = arith.constant 0.000000e+00 : f32
      %19 = vector.broadcast %cst_13 : f32 to vector<128x128xf32>
      %20 = arith.maximumf %18, %19 : vector<128x128xf32>
      %c0_14 = arith.constant 0 : index
      %c0_15 = arith.constant 0 : index
      %21 = vector.load %arg5[%c0_14, %c0_15] : memref<128x128xf32, #tpu.memory_space<vmem>>, vector<128x128xf32>
      tpu.vector_store %arg5[%c0_14, %c0_15], %20 {strides = array<i32>} : memref<128x128xf32, #tpu.memory_space<vmem>>, vector<128x128xf32>,
    } else {
    }
    return
  }
  func.func @transform_0(%arg0: i32, %arg1: i32) -> (i32, i32) {
    %c0_i32 = arith.constant 0 : i32
    return %arg0, %arg1 : i32, i32
  }
  func.func @transform_1(%arg0: i32, %arg1: i32) -> (i32, i32) {
    %c0_i32 = arith.constant 0 : i32
    %c0_i32_0 = arith.constant 0 : i32
    %c0_i32_1 = arith.constant 0 : i32
    return %c0_i32, %c0_i32_0 : i32, i32
  }
  func.func @transform_2(%arg0: i32, %arg1: i32) -> (i32, i32) {
    %c0_i32 = arith.constant 0 : i32
    %c0_i32_0 = arith.constant 0 : i32
    %c0_i32_1 = arith.constant 0 : i32
    return %c0_i32, %c0_i32_0 : i32, i32
  }
  func.func @transform_3(%arg0: i32, %arg1: i32) -> (i32, i32) {
    %c0_i32 = arith.constant 0 : i32
    %c0_i32_0 = arith.constant 0 : i32
    return %arg0, %c0_i32 : i32, i32
  }
}

module attributes {stable_mosaic.version = 11 : i64} {
  func.func @_gc3_logsoftmax_kernel(%arg0: i32, %arg1: i32, %arg2: memref<128x128xf32, #tpu.memory_space<vmem>>, %arg3: memref<128x128xf32, #tpu.memory_space<vmem>>, %arg4: memref<1x128xf32, #tpu.memory_space<vmem>>, %arg5: memref<128x128xf32, #tpu.memory_space<vmem>>, %arg6: memref<128x128xf32, #tpu.memory_space<vmem>>) attributes {dimension_semantics = [#tpu.dimension_semantics<parallel>, #tpu.dimension_semantics<arbitrary>], iteration_bounds = array<i64: 1, 1>, scalar_prefetch = 0 : i64, scratch_operands = 1 : i64, tpu.core_type = #tpu.core_type<tc>, window_params = [{transform_indices = @transform_0, window_bounds = array<i64: 128, 128>}, {pipeline_mode = #tpu.pipeline_mode<synchronous>, transform_indices = @transform_1, window_bounds = array<i64: 128, 128>}, {pipeline_mode = #tpu.pipeline_mode<synchronous>, transform_indices = @transform_2, window_bounds = array<i64: 1, 128>}, {transform_indices = @transform_3, window_bounds = array<i64: 128, 128>}]} {
    %c0_i32 = arith.constant 0 : i32
    %0 = arith.cmpi eq, %arg1, %c0_i32 : i32
    %1 = arith.extui %0 : i1 to i32
    %c0_i32_0 = arith.constant 0 : i32
    %2 = arith.cmpi ne, %1, %c0_i32_0 : i32
    scf.if %2 {
      %cst_9 = arith.constant 0.000000e+00 : f32
      %15 = vector.broadcast %cst_9 : f32 to vector<128x128xf32>
      %c0_10 = arith.constant 0 : index
      %c0_11 = arith.constant 0 : index
      %16 = vector.load %arg6[%c0_10, %c0_11] : memref<128x128xf32, #tpu.memory_space<vmem>>, vector<128x128xf32>
      tpu.vector_store %arg6[%c0_10, %c0_11], %15 {strides = array<i32>} : memref<128x128xf32, #tpu.memory_space<vmem>>, vector<128x128xf32>,
    } else {
    }
    %c0 = arith.constant 0 : index
    %c0_1 = arith.constant 0 : index
    %3 = vector.load %arg6[%c0, %c0_1] : memref<128x128xf32, #tpu.memory_space<vmem>>, vector<128x128xf32>
    %c0_2 = arith.constant 0 : index
    %c0_3 = arith.constant 0 : index
    %4 = vector.load %arg2[%c0_2, %c0_3] : memref<128x128xf32, #tpu.memory_space<vmem>>, vector<128x128xf32>
    %c128_i32 = arith.constant 128 : i32
    %5 = arith.muli %arg1, %c128_i32 : i32
    %6 = tpu.assume_multiple %5, 128 : i32
    %7 = arith.index_cast %6 : i32 to index
    %c0_4 = arith.constant 0 : index
    %8 = vector.load %arg3[%7, %c0_4] : memref<128x128xf32, #tpu.memory_space<vmem>>, vector<128x128xf32>
    %cst = arith.constant dense<0.000000e+00> : vector<128x128xf32>
    %9 = tpu.matmul %4, %8, %cst {dimension_numbers = #tpu.dot_dimension_numbers<[1], [0], [0], [1], [0, 0, 1, 1], [], []>, precision = #tpu.contract_precision<fp32>} : vector<128x128xf32>, vector<128x128xf32>, vector<128x128xf32> -> vector<128x128xf32>
    %10 = arith.addf %3, %9 : vector<128x128xf32>
    %c0_5 = arith.constant 0 : index
    %c0_6 = arith.constant 0 : index
    %11 = vector.load %arg6[%c0_5, %c0_6] : memref<128x128xf32, #tpu.memory_space<vmem>>, vector<128x128xf32>
    tpu.vector_store %arg6[%c0_5, %c0_6], %10 {strides = array<i32>} : memref<128x128xf32, #tpu.memory_space<vmem>>, vector<128x128xf32>,
    %c0_i32_7 = arith.constant 0 : i32
    %12 = arith.cmpi eq, %arg1, %c0_i32_7 : i32
    %13 = arith.extui %12 : i1 to i32
    %c0_i32_8 = arith.constant 0 : i32
    %14 = arith.cmpi ne, %13, %c0_i32_8 : i32
    scf.if %14 {
      %c0_9 = arith.constant 0 : index
      %c0_10 = arith.constant 0 : index
      %15 = vector.load %arg6[%c0_9, %c0_10] : memref<128x128xf32, #tpu.memory_space<vmem>>, vector<128x128xf32>
      %c0_11 = arith.constant 0 : index
      %c0_12 = arith.constant 0 : index
      %16 = vector.load %arg4[%c0_11, %c0_12] : memref<1x128xf32, #tpu.memory_space<vmem>>, vector<1x128xf32>
      %17 = vector.broadcast %16 : vector<1x128xf32> to vector<128x128xf32>
      %18 = arith.addf %15, %17 : vector<128x128xf32>
      %19 = tpu.iota {dimensions = array<i32: 1>} : vector<128x128xi32>
      %c4_i32 = arith.constant 4 : i32
      %20 = vector.broadcast %c4_i32 : i32 to vector<128x128xi32>
      %21 = arith.cmpi slt, %19, %20 : vector<128x128xi32>
      %cst_13 = arith.constant 0xFF800000 : f32
      %22 = vector.broadcast %cst_13 : f32 to vector<128x128xf32>
      %23 = arith.select %21, %18, %22 : vector<128x128xi1>, vector<128x128xf32>
      %cst_14 = arith.constant dense<0xFF800000> : vector<128xf32>
      %24 = vector.multi_reduction <maximumf>, %23, %cst_14 [1] : vector<128x128xf32> to vector<128xf32>
      %25 = vector.shape_cast %24 : vector<128xf32> to vector<128x1xf32>
      %26 = vector.broadcast %25 : vector<128x1xf32> to vector<128x128xf32>
      %27 = arith.subf %18, %26 : vector<128x128xf32>
      %28 = math.exp %27 : vector<128x128xf32>
      %cst_15 = arith.constant 0.000000e+00 : f32
      %29 = vector.broadcast %cst_15 : f32 to vector<128x128xf32>
      %30 = arith.select %21, %28, %29 : vector<128x128xi1>, vector<128x128xf32>
      %cst_16 = arith.constant dense<0.000000e+00> : vector<128xf32>
      %31 = vector.multi_reduction <add>, %30, %cst_16 [1] : vector<128x128xf32> to vector<128xf32>
      %32 = vector.shape_cast %31 : vector<128xf32> to vector<128x1xf32>
      %33 = math.log %32 : vector<128x1xf32>
      %34 = vector.broadcast %25 : vector<128x1xf32> to vector<128x128xf32>
      %35 = arith.subf %18, %34 : vector<128x128xf32>
      %36 = vector.broadcast %33 : vector<128x1xf32> to vector<128x128xf32>
      %37 = arith.subf %35, %36 : vector<128x128xf32>
      %c0_17 = arith.constant 0 : index
      %c0_18 = arith.constant 0 : index
      %38 = vector.load %arg5[%c0_17, %c0_18] : memref<128x128xf32, #tpu.memory_space<vmem>>, vector<128x128xf32>
      tpu.vector_store %arg5[%c0_17, %c0_18], %37 {strides = array<i32>} : memref<128x128xf32, #tpu.memory_space<vmem>>, vector<128x128xf32>,
    } else {
    }
    return
  }
  func.func @transform_0(%arg0: i32, %arg1: i32) -> (i32, i32) {
    %c0_i32 = arith.constant 0 : i32
    return %arg0, %arg1 : i32, i32
  }
  func.func @transform_1(%arg0: i32, %arg1: i32) -> (i32, i32) {
    %c0_i32 = arith.constant 0 : i32
    %c0_i32_0 = arith.constant 0 : i32
    %c0_i32_1 = arith.constant 0 : i32
    return %c0_i32, %c0_i32_0 : i32, i32
  }
  func.func @transform_2(%arg0: i32, %arg1: i32) -> (i32, i32) {
    %c0_i32 = arith.constant 0 : i32
    %c0_i32_0 = arith.constant 0 : i32
    %c0_i32_1 = arith.constant 0 : i32
    return %c0_i32, %c0_i32_0 : i32, i32
  }
  func.func @transform_3(%arg0: i32, %arg1: i32) -> (i32, i32) {
    %c0_i32 = arith.constant 0 : i32
    %c0_i32_0 = arith.constant 0 : i32
    return %arg0, %c0_i32 : i32, i32
  }
}

module attributes {stable_mosaic.version = 11 : i64} {
  func.func @_pool_proj_kernel(%arg0: i32, %arg1: i32, %arg2: memref<128x128xf32, #tpu.memory_space<vmem>>, %arg3: memref<128x128xf32, #tpu.memory_space<vmem>>, %arg4: memref<128x128xf32, #tpu.memory_space<vmem>>, %arg5: memref<128x128xf32, #tpu.memory_space<vmem>>, %arg6: memref<128x128xf32, #tpu.memory_space<vmem>>) attributes {dimension_semantics = [#tpu.dimension_semantics<parallel>, #tpu.dimension_semantics<arbitrary>], iteration_bounds = array<i64: 1, 1>, scalar_prefetch = 0 : i64, scratch_operands = 1 : i64, tpu.core_type = #tpu.core_type<tc>, window_params = [{transform_indices = @transform_0, window_bounds = array<i64: 128, 128>}, {pipeline_mode = #tpu.pipeline_mode<synchronous>, transform_indices = @transform_1, window_bounds = array<i64: 128, 128>}, {pipeline_mode = #tpu.pipeline_mode<synchronous>, transform_indices = @transform_2, window_bounds = array<i64: 128, 128>}, {transform_indices = @transform_3, window_bounds = array<i64: 128, 128>}]} {
    %c0_i32 = arith.constant 0 : i32
    %0 = arith.cmpi eq, %arg1, %c0_i32 : i32
    %1 = arith.extui %0 : i1 to i32
    %c0_i32_0 = arith.constant 0 : i32
    %2 = arith.cmpi ne, %1, %c0_i32_0 : i32
    scf.if %2 {
      %cst_9 = arith.constant 0.000000e+00 : f32
      %15 = vector.broadcast %cst_9 : f32 to vector<128x128xf32>
      %c0_10 = arith.constant 0 : index
      %c0_11 = arith.constant 0 : index
      %16 = vector.load %arg6[%c0_10, %c0_11] : memref<128x128xf32, #tpu.memory_space<vmem>>, vector<128x128xf32>
      tpu.vector_store %arg6[%c0_10, %c0_11], %15 {strides = array<i32>} : memref<128x128xf32, #tpu.memory_space<vmem>>, vector<128x128xf32>,
    } else {
    }
    %c0 = arith.constant 0 : index
    %c0_1 = arith.constant 0 : index
    %3 = vector.load %arg6[%c0, %c0_1] : memref<128x128xf32, #tpu.memory_space<vmem>>, vector<128x128xf32>
    %c0_2 = arith.constant 0 : index
    %c0_3 = arith.constant 0 : index
    %4 = vector.load %arg2[%c0_2, %c0_3] : memref<128x128xf32, #tpu.memory_space<vmem>>, vector<128x128xf32>
    %c128_i32 = arith.constant 128 : i32
    %5 = arith.muli %arg1, %c128_i32 : i32
    %6 = tpu.assume_multiple %5, 128 : i32
    %7 = arith.index_cast %6 : i32 to index
    %c0_4 = arith.constant 0 : index
    %8 = vector.load %arg3[%7, %c0_4] : memref<128x128xf32, #tpu.memory_space<vmem>>, vector<128x128xf32>
    %cst = arith.constant dense<0.000000e+00> : vector<128x128xf32>
    %9 = tpu.matmul %4, %8, %cst {dimension_numbers = #tpu.dot_dimension_numbers<[0], [0], [1], [1], [0, 1, 1, 1], [], []>, precision = #tpu.contract_precision<fp32>} : vector<128x128xf32>, vector<128x128xf32>, vector<128x128xf32> -> vector<128x128xf32>
    %10 = arith.addf %3, %9 : vector<128x128xf32>
    %c0_5 = arith.constant 0 : index
    %c0_6 = arith.constant 0 : index
    %11 = vector.load %arg6[%c0_5, %c0_6] : memref<128x128xf32, #tpu.memory_space<vmem>>, vector<128x128xf32>
    tpu.vector_store %arg6[%c0_5, %c0_6], %10 {strides = array<i32>} : memref<128x128xf32, #tpu.memory_space<vmem>>, vector<128x128xf32>,
    %c0_i32_7 = arith.constant 0 : i32
    %12 = arith.cmpi eq, %arg1, %c0_i32_7 : i32
    %13 = arith.extui %12 : i1 to i32
    %c0_i32_8 = arith.constant 0 : i32
    %14 = arith.cmpi ne, %13, %c0_i32_8 : i32
    scf.if %14 {
      %c0_9 = arith.constant 0 : index
      %c0_10 = arith.constant 0 : index
      %15 = vector.load %arg6[%c0_9, %c0_10] : memref<128x128xf32, #tpu.memory_space<vmem>>, vector<128x128xf32>
      %c0_11 = arith.constant 0 : index
      %c0_12 = arith.constant 0 : index
      %16 = vector.load %arg4[%c0_11, %c0_12] : memref<128x128xf32, #tpu.memory_space<vmem>>, vector<128x128xf32>
      %cst_13 = arith.constant dense<0.000000e+00> : vector<128x128xf32>
      %17 = tpu.matmul %15, %16, %cst_13 {dimension_numbers = #tpu.dot_dimension_numbers<[1], [0], [0], [1], [0, 0, 1, 1], [], []>, precision = #tpu.contract_precision<fp32>} : vector<128x128xf32>, vector<128x128xf32>, vector<128x128xf32> -> vector<128x128xf32>
      %c0_14 = arith.constant 0 : index
      %c0_15 = arith.constant 0 : index
      %18 = vector.load %arg5[%c0_14, %c0_15] : memref<128x128xf32, #tpu.memory_space<vmem>>, vector<128x128xf32>
      tpu.vector_store %arg5[%c0_14, %c0_15], %17 {strides = array<i32>} : memref<128x128xf32, #tpu.memory_space<vmem>>, vector<128x128xf32>,
    } else {
    }
    return
  }
  func.func @transform_0(%arg0: i32, %arg1: i32) -> (i32, i32) {
    %c0_i32 = arith.constant 0 : i32
    return %arg1, %arg0 : i32, i32
  }
  func.func @transform_1(%arg0: i32, %arg1: i32) -> (i32, i32) {
    %c0_i32 = arith.constant 0 : i32
    %c0_i32_0 = arith.constant 0 : i32
    %c0_i32_1 = arith.constant 0 : i32
    return %c0_i32, %c0_i32_0 : i32, i32
  }
  func.func @transform_2(%arg0: i32, %arg1: i32) -> (i32, i32) {
    %c0_i32 = arith.constant 0 : i32
    %c0_i32_0 = arith.constant 0 : i32
    %c0_i32_1 = arith.constant 0 : i32
    return %c0_i32, %c0_i32_0 : i32, i32
  }
  func.func @transform_3(%arg0: i32, %arg1: i32) -> (i32, i32) {
    %c0_i32 = arith.constant 0 : i32
    %c0_i32_0 = arith.constant 0 : i32
    return %arg0, %c0_i32 : i32, i32
  }
}

</mosaic_0001>

<bundles_post_ra>
// kernel: hain_forward_prepared.3
= control target key start
LH: loop header
LB: loop body
LE: loop exit
PB: predicated region body
PF: predicated region fallthrough
CT: control target
= control target key end

     0   :  { %s2898_s1 = inlined_call_operand.vmem [shape: f32[128,128], index: 1, kind: input, shape index: {}]   ;;  %s2899_s0 = inlined_call_operand.vmem [shape: f32[128,128], index: 0, kind: input, shape index: {}]   ;;  %s2900_s2 = inlined_call_operand.vmem [shape: f32[1,128], index: 2, kind: input, shape index: {}]   ;;  %s2901_s3 = inlined_call_operand.vmem [shape: f32[128,128], index: 3, kind: output, shape index: {}]  }
   0x1   :  { %v83_v0 = vld [vmem:[%s2898_s1 + $0x78] sm:$0xff]  ;;  %v82_v1 = vld [vmem:[%s2898_s1 + $0x70] sm:$0xff]  ;;  %v81_v2 = vld [vmem:[%s2898_s1 + $0x68] sm:$0xff] }
   0x2   :  { %v2038_v3 = vand.u32 4294901760, %v83_v0  ;;  %v2040_v4 = vand.u32 4294901760, %v82_v1  ;;  %v2042_v5 = vand.u32 4294901760, %v81_v2  ;;  %v80_v6 = vld [vmem:[%s2898_s1 + $0x60] sm:$0xff]  ;;  %v79_v7 = vld [vmem:[%s2898_s1 + $0x58] sm:$0xff]  ;;  %v78_v8 = vld [vmem:[%s2898_s1 + $0x50] sm:$0xff] }
   0x3   :  { %v2053_v9 = vand.u32 4294901760, %v80_v6  ;;  %v2055_v10 = vand.u32 4294901760, %v79_v7  ;;  %v2057_v11 = vand.u32 4294901760, %v78_v8  ;;  %v77_v12 = vld [vmem:[%s2898_s1 + $0x48] sm:$0xff]  ;;  %v76_v13 = vld [vmem:[%s2898_s1 + $0x40] sm:$0xff]  ;;  %v75_v18 = vld [vmem:[%s2898_s1 + $0x38] sm:$0xff] }
   0x4   :  { %1673 = vmatprep.subr.mxu0 %v2038_v3  ;;  %v2067_v14 = vsub.f32 %v83_v0, %v2038_v3  ;;  %v2070_v15 = vsub.f32 %v82_v1, %v2040_v4  ;;  %v2072_v16 = vand.u32 4294901760, %v77_v12  ;;  %v2075_v17 = vsub.f32 %v81_v2, %v2042_v5  ;;  %v74_v25 = vld [vmem:[%s2898_s1 + $0x30] sm:$0xff]  ;;  %v73_v35 = vld [vmem:[%s2898_s1 + $0x28] sm:$0xff]  ;;  %v72_v40 = vld [vmem:[%s2898_s1 + $0x20] sm:$0xff] }
   0x5   :  { %1674 = vmatpush3.msra.mxu0 %v2038_v3  ;;  %v2082_v19 = vsub.f32 %v80_v6, %v2053_v9  ;;  %v2085_v20 = vsub.f32 %v79_v7, %v2055_v10  ;;  %v2097_v24 = vand.u32 4294901760, %v76_v13  ;;  %v2106_v27 = vand.u32 4294901760, %v75_v18  ;;  %v50_v47 = vld [vmem:[%s2899_s0] sm:$0xff]  ;;  %v51_v49 = vld [vmem:[%s2899_s0 + $0x8] sm:$0xff]  ;;  %v71_v53 = vld [vmem:[%s2898_s1 + $0x18] sm:$0xff] }
   0x6   :  { %1675 = vmatprep.subr.mxu0 %v2040_v4  ;;  %v2089_v21 = vand.u32 4294901760, %v2067_v14  ;;  %v2092_v22 = vand.u32 4294901760, %v2070_v15  ;;  %v2095_v23 = vand.u32 4294901760, %v2075_v17  ;;  %v2112_v29 = vsub.f32 %v78_v8, %v2057_v11  ;;  %v70_v59 = vld [vmem:[%s2898_s1 + $0x10] sm:$0xff]  ;;  %v69_v6 = vld [vmem:[%s2898_s1 + $0x8] sm:$0xff] }
   0x7   :  { %1676 = vmatpush3.msra.mxu0 %v2040_v4  ;;  %v2104_v26 = vand.u32 4294901760, %v2082_v19  ;;  %v2109_v28 = vand.u32 4294901760, %v2085_v20  ;;  %v2122_v33 = vsub.f32 %v77_v12, %v2072_v16  ;;  %v2125_v34 = vand.u32 4294901760, %v74_v25  ;;  %v52_v63 = vld [vmem:[%s2899_s0 + $0x10] sm:$0xff] }
   0x8   :  { %2941 = vst [vmem:[#allocation3_spill] sm:$0xff] %v2095_v23  ;;  %1677 = vmatprep.subr.mxu0 %v2042_v5  ;;  %v329_v30 = vsub.f32 %v2067_v14, %v2089_v21  ;;  %v336_v31 = vsub.f32 %v2070_v15, %v2092_v22  ;;  %v343_v32 = vsub.f32 %v2075_v17, %v2095_v23  ;;  %v2134_v39 = vand.u32 4294901760, %v2112_v29 }
   0x9   :  { %2942 = vst [vmem:[#allocation4_spill] sm:$0xff] %v2104_v26  ;;  %2943 = vst [vmem:[#allocation5_spill] sm:$0xff] %v2109_v28  ;;  %1678 = vmatpush3.msra.mxu0 %v2042_v5  ;;  %v350_v38 = vsub.f32 %v2082_v19, %v2104_v26  ;;  %v2141_v41 = vand.u32 4294901760, %v2122_v33  ;;  %v2144_v42 = vsub.f32 %v76_v13, %v2097_v24  ;;  %v2149_v45 = vand.u32 4294901760, %v73_v35 }
   0xa   :  { %1679 = vmatprep.subr.mxu0 %v2053_v9  ;;  %v330_v36 = vand.u32 4294901760, %v329_v30  ;;  %v337_v37 = vand.u32 4294901760, %v336_v31  ;;  %2944 = vst [vmem:[#allocation6_spill] sm:$0xff] %v2134_v39  ;;  %v344_v43 = vand.u32 4294901760, %v343_v32  ;;  %v357_v44 = vsub.f32 %v2085_v20, %v2109_v28  ;;  %v68_v31 = vld [vmem:[%s2898_s1] sm:$0xff] }
   0xb   :  { %1680 = vmatpush3.msra.mxu0 %v2053_v9  ;;  %2945 = vst [vmem:[#allocation7_spill] sm:$0xff] %v2141_v41  ;;  %v2152_v46 = vsub.f32 %v75_v18, %v2106_v27  ;;  %v2158_v48 = vand.u32 4294901760, %v72_v40  ;;  %v351_v50 = vand.u32 4294901760, %v350_v38  ;;  %v364_v51 = vsub.f32 %v2112_v29, %v2134_v39  ;;  %v53_v18 = vld [vmem:[%s2899_s0 + $0x18] sm:$0xff] }
   0xc   :  { %1681 = vmatprep.subr.mxu0 %v2055_v10  ;;  %1729 = vmatprep.subr.mxu1 %v330_v36  ;;  %v2167_v52 = vand.u32 4294901760, %v2144_v42  ;;  %v2173_v54 = vsub.f32 %v74_v25, %v2125_v34  ;;  %v371_v55 = vsub.f32 %v2122_v33, %v2141_v41  ;;  %v2178_v56 = vand.u32 4294901760, %v50_v47  ;;  %v57_v39 = vld [vmem:[%s2899_s0 + $0x38] sm:$0xff] }
   0xd   :  { %1682 = vmatpush3.msra.mxu0 %v2055_v10  ;;  %1730 = vmatpush3.msra.mxu1 %v330_v36  ;;  %v358_v57 = vand.u32 4294901760, %v357_v44  ;;  %v2182_v58 = vand.u32 4294901760, %v2152_v46  ;;  %v2188_v60 = vsub.f32 %v73_v35, %v2149_v45  ;;  %v2190_v61 = vand.u32 4294901760, %v51_v49 }
   0xe   :  { %1683 = vmatprep.subr.mxu0 %v2057_v11  ;;  %1731 = vmatprep.subr.mxu1 %v337_v37  ;;  %2946 = vst [vmem:[#allocation8_spill] sm:$0xff] %v2167_v52  ;;  %v2193_v62 = vand.u32 4294901760, %v71_v53  ;;  %v365_v0 = vand.u32 4294901760, %v364_v51  ;;  %v378_v1 = vsub.f32 %v2144_v42, %v2167_v52  ;;  %v2202_v2 = vand.u32 4294901760, %v2173_v54 }
   0xf   :  { %1684 = vmatpush3.msra.mxu0 %v2057_v11  ;;  %1732 = vmatpush3.msra.mxu1 %v337_v37  ;;  %2947 = vst [vmem:[#allocation9_spill] sm:$0xff] %v2182_v58  ;;  %v2208_v7 = vsub.f32 %v72_v40, %v2158_v48  ;;  %v372_v8 = vand.u32 4294901760, %v371_v55  ;;  %v2211_v12 = vand.u32 4294901760, %v70_v59  ;;  %v2214_v13 = vsub.f32 %v50_v47, %v2178_v56  ;;  %v54_v47 = vld [vmem:[%s2899_s0 + $0x20] sm:$0xff] }
  0x10   :  { %1685 = vmatprep.subr.mxu0 %v2072_v16  ;;  %1733 = vmatprep.subr.mxu1 %v344_v43  ;;  %2948 = vst [vmem:[#allocation10_spill] sm:$0xff] %v2202_v2  ;;  %v385_v25 = vsub.f32 %v2152_v46, %v2182_v58  ;;  %v2223_v30 = vand.u32 4294901760, %v2188_v60  ;;  %v2229_v32 = vsub.f32 %v51_v49, %v2190_v61  ;;  %v2231_v35 = vand.u32 4294901760, %v52_v63 }
  0x11   :  { %1686 = vmatpush3.msra.mxu0 %v2072_v16  ;;  %1734 = vmatpush3.msra.mxu1 %v344_v43  ;;  %v2234_v36 = vand.u32 4294901760, %v69_v6  ;;  %v2237_v37 = vsub.f32 %v71_v53, %v2193_v62  ;;  %v379_v38 = vand.u32 4294901760, %v378_v1  ;;  %v392_v40 = vsub.f32 %v2173_v54, %v2202_v2 }
  0x12   :  { %1687 = vmatprep.subr.mxu0 %v2097_v24  ;;  %1735 = vmatprep.subr.mxu1 %v351_v50  ;;  %2949 = vst [vmem:[#allocation11_spill] sm:$0xff] %v2223_v30  ;;  %v2243_v43 = vand.u32 4294901760, %v2208_v7  ;;  %v2245_v44 = vand.u32 4294901760, %v53_v18  ;;  %v2251_v49 = vand.u32 4294901760, %v68_v31  ;;  %v2255_v51 = vsub.f32 %v70_v59, %v2211_v12 }
  0x13   :  { %1688 = vmatpush3.msra.mxu0 %v2097_v24  ;;  %1736 = vmatpush3.msra.mxu1 %v351_v50  ;;  %2950 = vst [vmem:[#allocation12_spill] sm:$0xff] %v2234_v36  ;;  %v386_v53 = vand.u32 4294901760, %v385_v25  ;;  %v399_v55 = vsub.f32 %v2188_v60, %v2223_v30  ;;  %v2262_v1 = vsub.f32 %v52_v63, %v2231_v35  ;;  %v2269_v59 = vand.u32 4294901760, %v2237_v37 }
  0x14   :  { %1689 = vmatprep.subr.mxu0 %v2106_v27  ;;  %1737 = vmatprep.subr.mxu1 %v358_v57  ;;  %2951 = vst [vmem:[#allocation13_spill] sm:$0xff] %v2243_v43  ;;  %2952 = vst [vmem:[#allocation14_spill] sm:$0xff] %v2251_v49  ;;  %v2272_v25 = vsub.f32 %v69_v6, %v2234_v36  ;;  %v2274_v50 = vand.u32 4294901760, %v54_v47  ;;  %v393_v63 = vand.u32 4294901760, %v392_v40  ;;  %v2287_v2 = vand.u32 4294901760, %v2255_v51 }
  0x15   :  { %1690 = vmatpush3.msra.mxu0 %v2106_v27  ;;  %1738 = vmatpush3.msra.mxu1 %v358_v57  ;;  %2953 = vst [vmem:[#allocation15_spill] sm:$0xff] %v2262_v1  ;;  %2954 = vst [vmem:[#allocation16_spill] sm:$0xff] %v2269_v59  ;;  %v406_v57 = vsub.f32 %v2208_v7, %v2243_v43  ;;  %v2280_v30 = vsub.f32 %v53_v18, %v2245_v44  ;;  %v400_v40 = vand.u32 4294901760, %v399_v55 }
  0x16   :  { %1691 = vmatprep.subr.mxu0 %v2125_v34  ;;  %1739 = vmatprep.subr.mxu1 %v365_v0  ;;  %2956 = vst [vmem:[#allocation17_spill] sm:$0xff] %v2287_v2  ;;  %v2957_v43 = vand.u32 4294901760, %v2229_v32  ;;  %v413_v41 = vsub.f32 %v2237_v37, %v2269_v59  ;;  %v2306_v55 = vand.u32 4294901760, %v2272_v25  ;;  %v420_v59 = vsub.f32 %v2255_v51, %v2287_v2 }
  0x17   :  { %1692 = vmatpush3.msra.mxu0 %v2125_v34  ;;  %1740 = vmatpush3.msra.mxu1 %v365_v0  ;;  %v55_v0 = vld [vmem:[%s2899_s0 + $0x28] sm:$0xff]  ;;  %v2959_v52 = vand.u32 4294901760, %v2262_v1  ;;  %v2335_v2 = vand.u32 4294901760, %v57_v39 }
  0x18   :  { %1693 = vmatprep.subr.mxu0 %v2149_v45  ;;  %1741 = vmatprep.subr.mxu1 %v372_v8  ;;  %v2289_v58 = vand.u32 4294901760, %v55_v0  ;;  %v178_v18 = vsub.f32 %v2229_v32, %v2957_v43  ;;  %2958 = vst [vmem:[#allocation18_spill] sm:$0xff] %v2306_v55  ;;  %v2309_v43 = vsub.f32 %v54_v47, %v2274_v50 }
  0x19   :  { %1694 = vmatpush3.msra.mxu0 %v2149_v45  ;;  %1742 = vmatpush3.msra.mxu1 %v372_v8  ;;  %v2955_v8 = vand.u32 4294901760, %v2214_v13  ;;  %v188_v26 = vsub.f32 %v2262_v1, %v2959_v52 }
  0x1a   :  { %1695 = vmatprep.subr.mxu0 %v2158_v48  ;;  %1743 = vmatprep.subr.mxu1 %v379_v38  ;;  %v2320_v47 = vsub.f32 %v55_v0, %v2289_v58  ;;  %v427_v0 = vsub.f32 %v2272_v25, %v2306_v55 }
  0x1b   :  { %1696 = vmatpush3.msra.mxu0 %v2158_v48  ;;  %1744 = vmatpush3.msra.mxu1 %v379_v38  ;;  %v168_v6 = vsub.f32 %v2214_v13, %v2955_v8  ;;  %v2297_v38 = vsub.f32 %v68_v31, %v2251_v49  ;;  %v56_v8 = vld [vmem:[%s2899_s0 + $0x30] sm:$0xff]  ;;  %v407_v31 = vand.u32 4294901760, %v406_v57  ;;  %v179_v57 = vand.u32 4294901760, %v178_v18 }
  0x1c   :  { %1697 = vmatprep.subr.mxu0 %v2193_v62  ;;  %1745 = vmatprep.subr.mxu1 %v386_v53  ;;  %v2322_v28 = vand.u32 4294901760, %v56_v8  ;;  %v2961_v18 = vand.u32 4294901760, %v2280_v30  ;;  %v189_v55 = vand.u32 4294901760, %v188_v26 }
  0x1d   :  { %1698 = vmatpush3.msra.mxu0 %v2193_v62  ;;  %1746 = vmatpush3.msra.mxu1 %v386_v53  ;;  %v169_v53 = vand.u32 4294901760, %v168_v6  ;;  %v2329_v23 = vand.u32 4294901760, %v2297_v38 }
  0x1e   :  { %1699 = vmatprep.subr.mxu0 %v2211_v12  ;;  %1747 = vmatprep.subr.mxu1 %v393_v63  ;;  %v198_v52 = vsub.f32 %v2280_v30, %v2961_v18  ;;  %v2347_v6 = vsub.f32 %v56_v8, %v2322_v28  ;;  %v59_v18 = vld [vmem:[%s2899_s0 + $0x48] sm:$0xff]  ;;  %v2359_v8 = vsub.f32 %v57_v39, %v2335_v2 }
  0x1f   :  { %1700 = vmatpush3.msra.mxu0 %v2211_v12  ;;  %1748 = vmatpush3.msra.mxu1 %v393_v63  ;;  %2960 = vst [vmem:[#allocation19_spill] sm:$0xff] %v2329_v23  ;;  %v414_v63 = vand.u32 4294901760, %v413_v41  ;;  %v421_v41 = vand.u32 4294901760, %v420_v59  ;;  %v434_v1 = vsub.f32 %v2297_v38, %v2329_v23  ;;  %v2962_v59 = vand.u32 4294901760, %v2309_v43 }
  0x20   :  { %1701 = vmatprep.subr.mxu0 %v2234_v36  ;;  %1749 = vmatprep.subr.mxu1 %v400_v40  ;;  %v199_v26 = vand.u32 4294901760, %v198_v52  ;;  %v2939_v23 = vand.u32 4294901760, %v2347_v6  ;;  %v2938_v52 = vand.u32 4294901760, %v2359_v8 }
  0x21   :  { %1702 = vmatpush3.msra.mxu0 %v2234_v36  ;;  %1750 = vmatpush3.msra.mxu1 %v400_v40  ;;  %v58_v36 = vld [vmem:[%s2899_s0 + $0x40] sm:$0xff]  ;;  %v208_v40 = vsub.f32 %v2309_v43, %v2962_v59  ;;  %v435_v39 = vand.u32 4294901760, %v434_v1  ;;  %v61_v1 = vld [vmem:[%s2899_s0 + $0x58] sm:$0xff] }
  0x22   :  { %1703 = vmatprep.subr.mxu0 %v2251_v49  ;;  %1751 = vmatprep.subr.mxu1 %v407_v31 }
  0x23   :  { %1704 = vmatpush3.msra.mxu0 %v2251_v49  ;;  %1705 = vmatprep.mubr.f32.mxu0 %v169_v53  ;;  %v428_v53 = vand.u32 4294901760, %v427_v0  ;;  %v2369_v49 = vand.u32 4294901760, %v59_v18 }
  0x24   :  { %1752 = vmatpush3.msra.mxu1 %v407_v31  ;;  %1706 = vmatmul.mubr.f32.vlgmr.msra.gmra.mxu0 %v179_v57  ;;  %v2361_v31 = vand.u32 4294901760, %v58_v36  ;;  %v2963_v57 = vand.u32 4294901760, %v2320_v47 }
  0x25   :  { %1753 = vmatprep.subr.mxu1 %v414_v63  ;;  %1785 = vmatprep.subr.mxu0 %v2067_v14 }
  0x26   :  { %1754 = vmatpush3.msra.mxu1 %v414_v63  ;;  %1786 = vmatpush3.msra.mxu0 %v2067_v14  ;;  %v218_v0 = vsub.f32 %v2320_v47, %v2963_v57  ;;  %v60_v63 = vld [vmem:[%s2899_s0 + $0x50] sm:$0xff]  ;;  %v209_v14 = vand.u32 4294901760, %v208_v40  ;;  %v2377_v59 = vsub.f32 %v58_v36, %v2361_v31  ;;  %v238_v40 = vsub.f32 %v2359_v8, %v2938_v52 }
  0x27   :  { %1755 = vmatprep.subr.mxu1 %v421_v41  ;;  %1787 = vmatprep.subr.mxu0 %v2070_v15  ;;  %v2390_v36 = vand.u32 4294901760, %v60_v63 }
  0x28   :  { %1708 = vmatprep.mubr.f32.mxu0 %v189_v55  ;;  %1756 = vmatpush3.msra.mxu1 %v421_v41  ;;  %v219_v55 = vand.u32 4294901760, %v218_v0  ;;  %v2388_v41 = vsub.f32 %v59_v18, %v2369_v49  ;;  %v62_v18 = vld [vmem:[%s2899_s0 + $0x60] sm:$0xff] }
  0x29   :  { %1788 = vmatpush3.msra.mxu0 %v2070_v15  ;;  %1757 = vmatprep.subr.mxu1 %v428_v53  ;;  %v228_v15 = vsub.f32 %v2347_v6, %v2939_v23  ;;  %v2407_v0 = vsub.f32 %v60_v63, %v2390_v36 }
  0x2a   :  { %1709 = vmatmul.mubr.f32.gmra.mxu0 %v199_v26  ;;  %1789 = vmatprep.subr.mxu0 %v2075_v17  ;;  %v2937_v57 = vand.u32 4294901760, %v2388_v41 }
  0x2b   :  { %1758 = vmatpush3.msra.mxu1 %v428_v53  ;;  %1790 = vmatpush3.msra.mxu0 %v2075_v17  ;;  %v2936_v17 = vand.u32 4294901760, %v2377_v59  ;;  %v2397_v53 = vand.u32 4294901760, %v61_v1  ;;  %v229_v26 = vand.u32 4294901760, %v228_v15  ;;  %v2940_v15 = vand.u32 4294901760, %v2407_v0 }
  0x2c   :  { %1759 = vmatprep.subr.mxu1 %v435_v39  ;;  %1791 = vmatprep.subr.mxu0 %v2082_v19 }
  0x2d   :  { %1711 = vmatprep.mubr.f32.mxu0 %v209_v14  ;;  %1760 = vmatpush3.msra.mxu1 %v435_v39  ;;  %v239_v39 = vand.u32 4294901760, %v238_v40  ;;  %v248_v14 = vsub.f32 %v2377_v59, %v2936_v17  ;;  %v2420_v63 = vsub.f32 %v61_v1, %v2397_v53  ;;  %v64_v1 = vld [vmem:[%s2899_s0 + $0x70] sm:$0xff] }
  0x2e   :  { %1761 = vmatprep.mubr.f32.mxu1 %v2178_v56  ;;  %1792 = vmatpush3.msra.mxu0 %v2082_v19  ;;  %v63_v19 = vld [vmem:[%s2899_s0 + $0x68] sm:$0xff]  ;;  %v2456_v52 = vand.u32 4294901760, %v64_v1 }
  0x2f   :  { %1712 = vmatmul.mubr.f32.gmra.mxu0 %v219_v55  ;;  %1762 = vmatmul.mubr.f32.vlgmr.msra.gmra.mxu1 %v2190_v61  ;;  %v2422_v55 = vand.u32 4294901760, %v62_v18  ;;  %v2431_v40 = vand.u32 4294901760, %v63_v19  ;;  %v277_v17 = vand.u32 4294901760, %v2420_v63 }
  0x30   :  { %1793 = vmatprep.subr.mxu0 %v2085_v20  ;;  %1841 = vmatprep.subr.mxu1 %v2038_v3 }
  0x31   :  { %1794 = vmatpush3.msra.mxu0 %v2085_v20  ;;  %1842 = vmatpush3.msra.mxu1 %v2038_v3  ;;  %v258_v20 = vsub.f32 %v2388_v41, %v2937_v57  ;;  %v2441_v57 = vsub.f32 %v62_v18, %v2422_v55  ;;  %v2454_v18 = vsub.f32 %v63_v19, %v2431_v40 }
  0x32   :  { %1795 = vmatprep.subr.mxu0 %v2112_v29  ;;  %1843 = vmatprep.subr.mxu1 %v2040_v4 }
  0x33   :  { %1714 = vmatprep.mubr.f32.mxu0 %v229_v26  ;;  %1764 = vmatprep.mubr.f32.mxu1 %v2231_v35  ;;  %v249_v26 = vand.u32 4294901760, %v248_v14  ;;  %v268_v14 = vsub.f32 %v2407_v0, %v2940_v15  ;;  %v2472_v15 = vsub.f32 %v64_v1, %v2456_v52 }
  0x34   :  { %1796 = vmatpush3.msra.mxu0 %v2112_v29  ;;  %1844 = vmatpush3.msra.mxu1 %v2040_v4  ;;  %v65_v29 = vld [vmem:[%s2899_s0 + $0x78] sm:$0xff] }
  0x35   :  { %1715 = vmatmul.mubr.f32.gmra.mxu0 %v239_v39  ;;  %1765 = vmatmul.mubr.f32.gmra.mxu1 %v2245_v44  ;;  %v259_v39 = vand.u32 4294901760, %v258_v20  ;;  %v287_v20 = vand.u32 4294901760, %v2441_v57  ;;  %v2465_v23 = vand.u32 4294901760, %v65_v29  ;;  %v269_v19 = vand.u32 4294901760, %v268_v14 }
  0x36   :  { %1797 = vmatprep.subr.mxu0 %v2122_v33  ;;  %1845 = vmatprep.subr.mxu1 %v2042_v5  ;;  %v307_v1 = vand.u32 4294901760, %v2472_v15 }
  0x37   :  { %1798 = vmatpush3.msra.mxu0 %v2122_v33  ;;  %1846 = vmatpush3.msra.mxu1 %v2042_v5  ;;  %v278_v33 = vsub.f32 %v2420_v63, %v277_v17  ;;  %v2482_v14 = vsub.f32 %v65_v29, %v2465_v23 }
  0x38   :  { %1799 = vmatprep.subr.mxu0 %v2144_v42  ;;  %1847 = vmatprep.subr.mxu1 %v2053_v9 }
  0x39   :  { %1717 = vmatprep.mubr.f32.mxu0 %v249_v26  ;;  %1767 = vmatprep.mubr.f32.mxu1 %v2274_v50  ;;  %v297_v26 = vand.u32 4294901760, %v2454_v18 }
  0x3a   :  { %1800 = vmatpush3.msra.mxu0 %v2144_v42  ;;  %1848 = vmatpush3.msra.mxu1 %v2053_v9  ;;  %v279_v42 = vand.u32 4294901760, %v278_v33  ;;  %v317_v33 = vand.u32 4294901760, %v2482_v14 }
  0x3b   :  { %1718 = vmatmul.mubr.f32.gmra.mxu0 %v259_v39  ;;  %1768 = vmatmul.mubr.f32.gmra.mxu1 %v2289_v58  ;;  %v288_v39 = vsub.f32 %v2441_v57, %v287_v20 }
  0x3c   :  { %1801 = vmatprep.subr.mxu0 %v2152_v46  ;;  %1849 = vmatprep.subr.mxu1 %v2055_v10 }
  0x3d   :  { %1802 = vmatpush3.msra.mxu0 %v2152_v46  ;;  %1850 = vmatpush3.msra.mxu1 %v2055_v10  ;;  %v298_v46 = vsub.f32 %v2454_v18, %v297_v26  ;;  %v289_v29 = vand.u32 4294901760, %v288_v39 }
  0x3e   :  { %1803 = vmatprep.subr.mxu0 %v2173_v54  ;;  %1851 = vmatprep.subr.mxu1 %v2057_v11 }
  0x3f   :  { %1720 = vmatprep.mubr.f32.mxu0 %v269_v19  ;;  %1770 = vmatprep.mubr.f32.mxu1 %v2322_v28  ;;  %v299_v19 = vand.u32 4294901760, %v298_v46  ;;  %v2971_v46 = vld [vmem:[#allocation5_spill] sm:$0xff] }
  0x40   :  { %1804 = vmatpush3.msra.mxu0 %v2173_v54  ;;  %1852 = vmatpush3.msra.mxu1 %v2057_v11  ;;  %v308_v54 = vsub.f32 %v2472_v15, %v307_v1 }
  0x41   :  { %1721 = vmatmul.mubr.f32.gmra.mxu0 %v279_v42  ;;  %1771 = vmatmul.mubr.f32.gmra.mxu1 %v2335_v2  ;;  %v318_v42 = vsub.f32 %v2482_v14, %v317_v33 }
  0x42   :  { %1805 = vmatprep.subr.mxu0 %v2188_v60  ;;  %1853 = vmatprep.subr.mxu1 %v2072_v16 }
  0x43   :  { %1806 = vmatpush3.msra.mxu0 %v2188_v60  ;;  %1854 = vmatpush3.msra.mxu1 %v2072_v16  ;;  %v309_v60 = vand.u32 4294901760, %v308_v54  ;;  %v319_v39 = vand.u32 4294901760, %v318_v42  ;;  %v2979_v54 = vld [vmem:[#allocation9_spill] sm:$0xff] }
  0x44   :  { %1807 = vmatprep.subr.mxu0 %v2208_v7  ;;  %1855 = vmatprep.subr.mxu1 %v2097_v24 }
  0x45   :  { %1723 = vmatprep.mubr.f32.mxu0 %v289_v29  ;;  %1773 = vmatprep.mubr.f32.mxu1 %v2361_v31  ;;  %v2972_v29 = vld [vmem:[#allocation6_spill] sm:$0xff] }
  0x46   :  { %1808 = vmatpush3.msra.mxu0 %v2208_v7  ;;  %1856 = vmatpush3.msra.mxu1 %v2097_v24  ;;  %v2964_v7 = vld [vmem:[#allocation15_spill] sm:$0xff] }
  0x47   :  { %1724 = vmatmul.mubr.f32.gmra.mxu0 %v299_v19  ;;  %1774 = vmatmul.mubr.f32.gmra.mxu1 %v2369_v49  ;;  %v2975_v19 = vld [vmem:[#allocation7_spill] sm:$0xff] }
  0x48   :  { %1809 = vmatprep.subr.mxu0 %v2237_v37  ;;  %1857 = vmatprep.subr.mxu1 %v2106_v27 }
  0x49   :  { %1810 = vmatpush3.msra.mxu0 %v2237_v37  ;;  %1858 = vmatpush3.msra.mxu1 %v2106_v27  ;;  %v2965_v37 = vld [vmem:[#allocation12_spill] sm:$0xff] }
  0x4a   :  { %1811 = vmatprep.subr.mxu0 %v2255_v51  ;;  %1859 = vmatprep.subr.mxu1 %v2125_v34 }
  0x4b   :  { %1726 = vmatprep.mubr.f32.mxu0 %v309_v60  ;;  %1776 = vmatprep.mubr.f32.mxu1 %v2390_v36 }
  0x4c   :  { %1812 = vmatpush3.msra.mxu0 %v2255_v51  ;;  %1860 = vmatpush3.msra.mxu1 %v2125_v34  ;;  %v2966_v51 = vld [vmem:[#allocation3_spill] sm:$0xff] }
  0x4d   :  { %1727 = vmatmul.mubr.f32.gmra.mxu0 %v319_v39  ;;  %1777 = vmatmul.mubr.f32.gmra.mxu1 %v2397_v53 }
  0x4e   :  { %1813 = vmatprep.subr.mxu0 %v2272_v25  ;;  %1861 = vmatprep.subr.mxu1 %v2149_v45 }
  0x4f   :  { %1814 = vmatpush3.msra.mxu0 %v2272_v25  ;;  %1862 = vmatpush3.msra.mxu1 %v2149_v45  ;;  %v2968_v25 = vld [vmem:[#allocation4_spill] sm:$0xff] }
  0x50   :  { %1815 = vmatprep.subr.mxu0 %v2297_v38  ;;  %1863 = vmatprep.subr.mxu1 %v2158_v48 }
  0x51   :  { %1779 = vmatprep.mubr.f32.mxu1 %v2422_v55  ;;  %1816 = vmatpush3.msra.mxu0 %v2297_v38  ;;  %v2970_v38 = vand.u32 4294901760, %v2229_v32 }
  0x52   :  { %1817 = vmatprep.mubr.f32.mxu0 %v2214_v13  ;;  %1864 = vmatpush3.msra.mxu1 %v2158_v48 }
  0x53   :  { %1780 = vmatmul.mubr.f32.gmra.mxu1 %v2431_v40  ;;  %1818 = vmatmul.mubr.f32.vlgmr.msra.gmra.mxu0 %v2229_v32  ;;  %v2974_v32 = vand.u32 4294901760, %v2280_v30 }
  0x54   :  { %1865 = vmatprep.subr.mxu1 %v2193_v62  ;;  %1897 = vmatprep.subr.mxu0 %v2089_v21 }
  0x55   :  { %1866 = vmatpush3.msra.mxu1 %v2193_v62  ;;  %1898 = vmatpush3.msra.mxu0 %v2089_v21  ;;  %v2967_v21 = vld [vmem:[#allocation14_spill] sm:$0xff] }
  0x56   :  { %1867 = vmatprep.subr.mxu1 %v2211_v12  ;;  %1899 = vmatprep.subr.mxu0 %v2092_v22 }
  0x57   :  { %1782 = vmatprep.mubr.f32.mxu1 %v2456_v52  ;;  %1820 = vmatprep.mubr.f32.mxu0 %v2964_v7 }
  0x58   :  { %1868 = vmatpush3.msra.mxu1 %v2211_v12  ;;  %1900 = vmatpush3.msra.mxu0 %v2092_v22  ;;  %v2969_v22 = vand.u32 4294901760, %v2214_v13  ;;  %v2973_v13 = vand.u32 4294901760, %v2964_v7 }
  0x59   :  { %1783 = vmatmul.mubr.f32.gmra.mxu1 %v2465_v23  ;;  %1821 = vmatmul.mubr.f32.gmra.mxu0 %v2280_v30  ;;  %v2978_v30 = vand.u32 4294901760, %v2320_v47 }
  0x5a   :  { %1869 = vmatprep.subr.mxu1 %v2965_v37  ;;  %1901 = vmatprep.subr.mxu0 %v2966_v51 }
  0x5b   :  { %1870 = vmatpush3.msra.mxu1 %v2965_v37  ;;  %1902 = vmatpush3.msra.mxu0 %v2966_v51 }
  0x5c   :  { %1871 = vmatprep.subr.mxu1 %v2967_v21  ;;  %1903 = vmatprep.subr.mxu0 %v2968_v25 }
  0x5d   :  { %1823 = vmatprep.mubr.f32.mxu0 %v2309_v43  ;;  %1872 = vmatpush3.msra.mxu1 %v2967_v21 }
  0x5e   :  { %1873 = vmatprep.mubr.f32.mxu1 %v2969_v22  ;;  %1904 = vmatpush3.msra.mxu0 %v2968_v25 }
  0x5f   :  { %1824 = vmatmul.mubr.f32.gmra.mxu0 %v2320_v47  ;;  %1874 = vmatmul.mubr.f32.vlgmr.msra.gmra.mxu1 %v2970_v38  ;;  %v2983_v47 = vld [vmem:[#allocation11_spill] sm:$0xff] }
  0x60   :  { %1905 = vmatprep.subr.mxu0 %v2971_v46  ;;  %1953 = vmatprep.subr.mxu1 %v2038_v3 }
  0x61   :  { %1906 = vmatpush3.msra.mxu0 %v2971_v46  ;;  %1954 = vmatpush3.msra.mxu1 %v2038_v3  ;;  %v2976_v3 = vld [vmem:[#allocation8_spill] sm:$0xff] }
  0x62   :  { %1907 = vmatprep.subr.mxu0 %v2972_v29  ;;  %1955 = vmatprep.subr.mxu1 %v2040_v4 }
  0x63   :  { %1826 = vmatprep.mubr.f32.mxu0 %v2347_v6  ;;  %1876 = vmatprep.mubr.f32.mxu1 %v2973_v13 }
  0x64   :  { %1908 = vmatpush3.msra.mxu0 %v2972_v29  ;;  %1956 = vmatpush3.msra.mxu1 %v2040_v4  ;;  %v2977_v4 = vand.u32 4294901760, %v2309_v43  ;;  %v2982_v43 = vand.u32 4294901760, %v2359_v8 }
  0x65   :  { %1827 = vmatmul.mubr.f32.gmra.mxu0 %v2359_v8  ;;  %1877 = vmatmul.mubr.f32.gmra.mxu1 %v2974_v32  ;;  %v2987_v8 = vld [vmem:[#allocation16_spill] sm:$0xff] }
  0x66   :  { %1909 = vmatprep.subr.mxu0 %v2975_v19  ;;  %1957 = vmatprep.subr.mxu1 %v2042_v5 }
  0x67   :  { %1910 = vmatpush3.msra.mxu0 %v2975_v19  ;;  %1958 = vmatpush3.msra.mxu1 %v2042_v5  ;;  %v2980_v5 = vld [vmem:[#allocation10_spill] sm:$0xff] }
  0x68   :  { %1911 = vmatprep.subr.mxu0 %v2976_v3  ;;  %1959 = vmatprep.subr.mxu1 %v2053_v9 }
  0x69   :  { %1829 = vmatprep.mubr.f32.mxu0 %v2377_v59  ;;  %1879 = vmatprep.mubr.f32.mxu1 %v2977_v4 }
  0x6a   :  { %1912 = vmatpush3.msra.mxu0 %v2976_v3  ;;  %1960 = vmatpush3.msra.mxu1 %v2053_v9  ;;  %v2981_v9 = vand.u32 4294901760, %v2347_v6  ;;  %v2986_v6 = vand.u32 4294901760, %v2388_v41 }
  0x6b   :  { %1830 = vmatmul.mubr.f32.gmra.mxu0 %v2388_v41  ;;  %1880 = vmatmul.mubr.f32.gmra.mxu1 %v2978_v30 }
  0x6c   :  { %1913 = vmatprep.subr.mxu0 %v2979_v54  ;;  %1961 = vmatprep.subr.mxu1 %v2055_v10 }
  0x6d   :  { %1914 = vmatpush3.msra.mxu0 %v2979_v54  ;;  %1962 = vmatpush3.msra.mxu1 %v2055_v10  ;;  %v2984_v10 = vld [vmem:[#allocation13_spill] sm:$0xff] }
  0x6e   :  { %1915 = vmatprep.subr.mxu0 %v2980_v5  ;;  %1963 = vmatprep.subr.mxu1 %v2057_v11 }
  0x6f   :  { %1832 = vmatprep.mubr.f32.mxu0 %v2407_v0  ;;  %1882 = vmatprep.mubr.f32.mxu1 %v2981_v9 }
  0x70   :  { %1916 = vmatpush3.msra.mxu0 %v2980_v5  ;;  %1964 = vmatpush3.msra.mxu1 %v2057_v11  ;;  %v2985_v11 = vand.u32 4294901760, %v2377_v59  ;;  %v2990_v59 = vld [vmem:[#allocation18_spill] sm:$0xff] }
  0x71   :  { %1833 = vmatmul.mubr.f32.gmra.mxu0 %v2420_v63  ;;  %1883 = vmatmul.mubr.f32.gmra.mxu1 %v2982_v43 }
  0x72   :  { %1917 = vmatprep.subr.mxu0 %v2983_v47  ;;  %1965 = vmatprep.subr.mxu1 %v2072_v16 }
  0x73   :  { %1918 = vmatpush3.msra.mxu0 %v2983_v47  ;;  %1966 = vmatpush3.msra.mxu1 %v2072_v16  ;;  %v2988_v16 = vld [vmem:[#allocation17_spill] sm:$0xff] }
  0x74   :  { %1919 = vmatprep.subr.mxu0 %v2984_v10  ;;  %1967 = vmatprep.subr.mxu1 %v2097_v24 }
  0x75   :  { %1835 = vmatprep.mubr.f32.mxu0 %v2441_v57  ;;  %1885 = vmatprep.mubr.f32.mxu1 %v2985_v11 }
  0x76   :  { %1920 = vmatpush3.msra.mxu0 %v2984_v10  ;;  %1968 = vmatpush3.msra.mxu1 %v2097_v24  ;;  %v2989_v24 = vand.u32 4294901760, %v2407_v0 }
  0x77   :  { %1836 = vmatmul.mubr.f32.gmra.mxu0 %v2454_v18  ;;  %1886 = vmatmul.mubr.f32.gmra.mxu1 %v2986_v6 }
  0x78   :  { %1921 = vmatprep.subr.mxu0 %v2987_v8  ;;  %1969 = vmatprep.subr.mxu1 %v2106_v27 }
  0x79   :  { %1922 = vmatpush3.msra.mxu0 %v2987_v8  ;;  %1970 = vmatpush3.msra.mxu1 %v2106_v27  ;;  %v2991_v27 = vld [vmem:[#allocation19_spill] sm:$0xff] }
  0x7a   :  { %1923 = vmatprep.subr.mxu0 %v2988_v16  ;;  %1971 = vmatprep.subr.mxu1 %v2125_v34 }
  0x7b   :  { %1838 = vmatprep.mubr.f32.mxu0 %v2472_v15  ;;  %1888 = vmatprep.mubr.f32.mxu1 %v2989_v24 }
  0x7c   :  { %1924 = vmatpush3.msra.mxu0 %v2988_v16  ;;  %1972 = vmatpush3.msra.mxu1 %v2125_v34 }
  0x7d   :  { %1839 = vmatmul.mubr.f32.gmra.mxu0 %v2482_v14  ;;  %1889 = vmatmul.mubr.f32.gmra.mxu1 %v277_v17 }
  0x7e   :  { %1925 = vmatprep.subr.mxu0 %v2990_v59  ;;  %1973 = vmatprep.subr.mxu1 %v2149_v45 }
  0x7f   :  { %1926 = vmatpush3.msra.mxu0 %v2990_v59  ;;  %1974 = vmatpush3.msra.mxu1 %v2149_v45 }
  0x80   :  { %1927 = vmatprep.subr.mxu0 %v2991_v27  ;;  %1975 = vmatprep.subr.mxu1 %v2158_v48 }
  0x81   :  { %1891 = vmatprep.mubr.f32.mxu1 %v287_v20  ;;  %1928 = vmatpush3.msra.mxu0 %v2991_v27 }
  0x82   :  { %1929 = vmatprep.mubr.f32.mxu0 %v2178_v56  ;;  %1976 = vmatpush3.msra.mxu1 %v2158_v48 }
  0x83   :  { %1892 = vmatmul.mubr.f32.gmra.mxu1 %v297_v26  ;;  %1930 = vmatmul.mubr.f32.vlgmr.msra.gmra.mxu0 %v2190_v61 }
  0x84   :  { %1977 = vmatprep.subr.mxu1 %v2193_v62  ;;  %1894 = vmatprep.mubr.f32.mxu1 %v307_v1 }
  0x85   :  { %1978 = vmatpush3.msra.mxu1 %v2193_v62  ;;  %1932 = vmatprep.mubr.f32.mxu0 %v2231_v35 }
  0x86   :  { %1979 = vmatprep.subr.mxu1 %v2211_v12 }
  0x87   :  { %1980 = vmatpush3.msra.mxu1 %v2211_v12  ;;  %1933 = vmatmul.mubr.f32.gmra.mxu0 %v2245_v44 }
  0x88   :  { %1895 = vmatmul.mubr.f32.gmra.mxu1 %v317_v33  ;;  %1981 = vmatprep.subr.mxu1 %v2965_v37 }
  0x89   :  { %1982 = vmatpush3.msra.mxu1 %v2965_v37  ;;  %1935 = vmatprep.mubr.f32.mxu0 %v2274_v50 }
  0x8a   :  { %1983 = vmatprep.subr.mxu1 %v2967_v21  ;;  %1985 = vmatprep.mubr.f32.mxu1 %v2178_v56 }
  0x8b   :  { %1984 = vmatpush3.msra.mxu1 %v2967_v21  ;;  %1936 = vmatmul.mubr.f32.gmra.mxu0 %v2289_v58 }
  0x8c   :  { %1986 = vmatmul.mubr.f32.vlgmr.msra.gmra.mxu1 %v2190_v61  ;;  %1938 = vmatprep.mubr.f32.mxu0 %v2322_v28 }
  0x8d   :  { %1988 = vmatprep.mubr.f32.mxu1 %v2231_v35 }
  0x8f   :  { %1939 = vmatmul.mubr.f32.gmra.mxu0 %v2335_v2 }
  0x90   :  { %1989 = vmatmul.mubr.f32.gmra.mxu1 %v2245_v44  ;;  %1941 = vmatprep.mubr.f32.mxu0 %v2361_v31 }
  0x91   :  { %1991 = vmatprep.mubr.f32.mxu1 %v2274_v50 }
  0x93   :  { %1942 = vmatmul.mubr.f32.gmra.mxu0 %v2369_v49 }
  0x94   :  { %1992 = vmatmul.mubr.f32.gmra.mxu1 %v2289_v58  ;;  %1944 = vmatprep.mubr.f32.mxu0 %v2390_v36 }
  0x95   :  { %1994 = vmatprep.mubr.f32.mxu1 %v2322_v28 }
  0x97   :  { %1945 = vmatmul.mubr.f32.gmra.mxu0 %v2397_v53 }
  0x98   :  { %1995 = vmatmul.mubr.f32.gmra.mxu1 %v2335_v2  ;;  %1947 = vmatprep.mubr.f32.mxu0 %v2422_v55 }
  0x99   :  { %1997 = vmatprep.mubr.f32.mxu1 %v2361_v31 }
  0x9b   :  { %1948 = vmatmul.mubr.f32.gmra.mxu0 %v2431_v40 }
  0x9c   :  { %1998 = vmatmul.mubr.f32.gmra.mxu1 %v2369_v49  ;;  %1950 = vmatprep.mubr.f32.mxu0 %v2456_v52 }
  0x9d   :  { %2000 = vmatprep.mubr.f32.mxu1 %v2390_v36 }
  0x9f   :  { %1951 = vmatmul.mubr.f32.gmra.mxu0 %v2465_v23 }
  0xa0   :  { %2001 = vmatmul.mubr.f32.gmra.mxu1 %v2397_v53 }
  0xa1   :  { %2003 = vmatprep.mubr.f32.mxu1 %v2422_v55 }
  0xa4   :  { %2004 = vmatmul.mubr.f32.gmra.mxu1 %v2431_v40 }
  0xa5   :  { %2006 = vmatprep.mubr.f32.mxu1 %v2456_v52 }
  0xa8   :  { %2007 = vmatmul.mubr.f32.gmra.mxu1 %v2465_v23 }
  0xe4   :  { %v1707_v28 = vpop.f32.mrf.mxu0 }
  0xe6   :  { %v2685_v34 = vpop.f32.mrf.mxu0 }
  0xea   :  { %v2687_v45 = vpop.f32.mrf.mxu0 }
  0xec   :  { %v2689_v48 = vpop.f32.mrf.mxu0 }
  0xef   :  { %v2691_v56 = vpop.f32.mrf.mxu0  ;;  %v1763_v58 = vpop.f32.mrf.mxu1 }
  0xf0   :  { %v479_v59 = vadd.f32 %v1763_v58, %v1707_v28 }
  0xf1   :  { %v2693_v61 = vpop.f32.mrf.mxu0  ;;  %v472_v62 = vpop.f32.mrf.mxu1 }
  0xf5   :  { %v2695_v2 = vpop.f32.mrf.mxu0  ;;  %v1766_v12 = vpop.f32.mrf.mxu1 }
  0xf7   :  { %v2697_v35 = vpop.f32.mrf.mxu0  ;;  %v2699_v44 = vpop.f32.mrf.mxu1 }
  0xfb   :  { %v2701_v23 = vpop.f32.mrf.mxu0  ;;  %v2703_v49 = vpop.f32.mrf.mxu1 }
  0xfd   :  { %v2705_v50 = vpop.f32.mrf.mxu0  ;;  %v2707_v31 = vpop.f32.mrf.mxu1 }
 0x101   :  { %v2709_v52 = vpop.f32.mrf.mxu0  ;;  %v2711_v41 = vpop.f32.mrf.mxu1 }
 0x103   :  { %v2713_v36 = vpop.f32.mrf.mxu0  ;;  %v2715_v17 = vpop.f32.mrf.mxu1 }
 0x107   :  { %v2717_v53 = vpop.f32.mrf.mxu0  ;;  %v2719_v57 = vpop.f32.mrf.mxu1 }
 0x109   :  { %v2721_v0 = vpop.f32.mrf.mxu0  ;;  %v2723_v63 = vpop.f32.mrf.mxu1 }
 0x10a   :  { %2992 = vst [vmem:[#allocation15_spill] sm:$0xff] %v2721_v0 }
 0x10d   :  { %v2725_v55 = vpop.f32.mrf.mxu0  ;;  %v2727_v15 = vpop.f32.mrf.mxu1 }
 0x10e   :  { %2993 = vst [vmem:[#allocation12_spill] sm:$0xff] %v2725_v55 }
 0x10f   :  { %v2729_v40 = vpop.f32.mrf.mxu0  ;;  %v2731_v18 = vpop.f32.mrf.mxu1 }
 0x110   :  { %2994 = vst [vmem:[#allocation3_spill] sm:$0xff] %v2729_v40  ;;  %v473_v40 = vadd.f32 %v472_v62, %v2685_v34  ;;  %v503_v34 = vadd.f32 %v2703_v49, %v2691_v56 }
 0x113   :  { %v2733_v20 = vpop.f32.mrf.mxu1  ;;  %v1819_v26 = vpop.f32.mrf.mxu0 }
 0x115   :  { %v2735_v14 = vpop.f32.mrf.mxu1  ;;  %v666_v1 = vpop.f32.mrf.mxu0 }
 0x116   :  { %2995 = vst [vmem:[#allocation14_spill] sm:$0xff] %v2735_v14 }
 0x119   :  { %v2737_v33 = vpop.f32.mrf.mxu1  ;;  %v1822_v42 = vpop.f32.mrf.mxu0 }
 0x11a   :  { %2996 = vst [vmem:[#allocation4_spill] sm:$0xff] %v2737_v33 }
 0x11b   :  { %v2739_v60 = vpop.f32.mrf.mxu1  ;;  %v680_v39 = vpop.f32.mrf.mxu0 }
 0x11c   :  { %2997 = vst [vmem:[#allocation5_spill] sm:$0xff] %v2739_v60 }
 0x11f   :  { %v1825_v7 = vpop.f32.mrf.mxu0  ;;  %v1875_v37 = vpop.f32.mrf.mxu1 }
 0x121   :  { %v694_v51 = vpop.f32.mrf.mxu0  ;;  %v860_v21 = vpop.f32.mrf.mxu1 }
 0x125   :  { %v2741_v25 = vpop.f32.mrf.mxu0  ;;  %v1878_v22 = vpop.f32.mrf.mxu1 }
 0x127   :  { %v2743_v38 = vpop.f32.mrf.mxu0  ;;  %v876_v46 = vpop.f32.mrf.mxu1 }
 0x12b   :  { %v2745_v29 = vpop.f32.mrf.mxu0  ;;  %v1881_v13 = vpop.f32.mrf.mxu1 }
 0x12d   :  { %v2747_v32 = vpop.f32.mrf.mxu0  ;;  %v892_v19 = vpop.f32.mrf.mxu1 }
 0x131   :  { %v2749_v3 = vpop.f32.mrf.mxu0  ;;  %v2751_v4 = vpop.f32.mrf.mxu1 }
 0x133   :  { %v2753_v30 = vpop.f32.mrf.mxu0  ;;  %v2755_v54 = vpop.f32.mrf.mxu1 }
 0x137   :  { %v2757_v5 = vpop.f32.mrf.mxu0  ;;  %v2759_v9 = vpop.f32.mrf.mxu1 }
 0x138   :  { %2998 = vst [vmem:[#allocation6_spill] sm:$0xff] %v2757_v5  ;;  %v667_v5 = vadd.f32 %v666_v1, %v473_v40 }
 0x139   :  { %v2761_v43 = vpop.f32.mrf.mxu0  ;;  %v2763_v47 = vpop.f32.mrf.mxu1 }
 0x13a   :  { %2999 = vst [vmem:[#allocation7_spill] sm:$0xff] %v2761_v43  ;;  %v674_v43 = vadd.f32 %v1819_v26, %v479_v59  ;;  %v861_v58 = vadd.f32 %v860_v21, %v667_v5 }
 0x13c   :  { %v869_v14 = vadd.f32 %v1875_v37, %v674_v43  ;;  %v515_v43 = vadd.f32 %v2711_v41, %v2695_v2 }
 0x13d   :  { %v2765_v10 = vpop.f32.mrf.mxu0  ;;  %v2767_v11 = vpop.f32.mrf.mxu1 }
 0x13e   :  { %3000 = vst [vmem:[#allocation8_spill] sm:$0xff] %v2765_v10  ;;  %v491_v10 = vadd.f32 %v1766_v12, %v2687_v45  ;;  %v2790_v45 = vld [vmem:[%s2900_s2] ss:$0 sm:$0xff] }
 0x13f   :  { %v2769_v6 = vpop.f32.mrf.mxu0  ;;  %v2771_v8 = vpop.f32.mrf.mxu1 }
 0x140   :  { %3001 = vst [vmem:[#allocation9_spill] sm:$0xff] %v2769_v6  ;;  %3002 = vst [vmem:[#allocation10_spill] sm:$0xff] %v2771_v8  ;;  %v688_v28 = vadd.f32 %v1822_v42, %v491_v10 }
 0x142   :  { %v885_v40 = vadd.f32 %v1878_v22, %v688_v28 }
 0x143   :  { %v2773_v16 = vpop.f32.mrf.mxu1  ;;  %v1931_v24 = vpop.f32.mrf.mxu0 }
 0x144   :  { %3003 = vst [vmem:[#allocation11_spill] sm:$0xff] %v2773_v16  ;;  %v485_v16 = vadd.f32 %v2699_v44, %v2689_v48  ;;  %v497_v48 = vadd.f32 %v2707_v31, %v2693_v61  ;;  %v702_v44 = vadd.f32 %v1825_v7, %v503_v34  ;;  %v509_v31 = vadd.f32 %v2715_v17, %v2697_v35 }
 0x145   :  { %v2775_v27 = vpop.f32.mrf.mxu1  ;;  %v1099_v60 = vpop.f32.mrf.mxu0 }
 0x146   :  { %3004 = vst [vmem:[#allocation13_spill] sm:$0xff] %v2775_v27  ;;  %v1106_v27 = vadd.f32 %v1931_v24, %v869_v14  ;;  %v681_v12 = vadd.f32 %v680_v39, %v485_v16  ;;  %v1100_v26 = vadd.f32 %v1099_v60, %v861_v58  ;;  %v695_v10 = vadd.f32 %v694_v51, %v497_v48 }
 0x147   :  { %v1934_v33 = vpop.f32.mrf.mxu0  ;;  %v901_v39 = vadd.f32 %v1881_v13, %v702_v44  ;;  %v709_v28 = vadd.f32 %v2743_v38, %v509_v31 }
 0x148   :  { %v2778_v55 = vpop.f32.mrf.mxu1  ;;  %v877_v42 = vadd.f32 %v876_v46, %v681_v12  ;;  %v1118_v21 = vadd.f32 %v1934_v33, %v885_v40  ;;  %v716_v33 = vadd.f32 %v2741_v25, %v515_v43  ;;  %v893_v7 = vadd.f32 %v892_v19, %v695_v10 }
 0x149   :  { %v1111_v6 = vpop.f32.mrf.mxu0  ;;  %v551_v10 = vadd.f32 %v2733_v20, %v2717_v53  ;;  %v3008_v53 = vld [vmem:[#allocation10_spill] sm:$0xff] }
 0x14a   :  { %v2781_v0 = vpop.f32.mrf.mxu1  ;;  %v1112_v60 = vadd.f32 %v1111_v6, %v877_v42  ;;  %v527_v6 = vadd.f32 %v2719_v57, %v2701_v23  ;;  %v917_v35 = vadd.f32 %v2751_v4, %v716_v33  ;;  %v909_v57 = vadd.f32 %v2755_v54, %v709_v28 }
 0x14b   :  { %v1937_v8 = vpop.f32.mrf.mxu0  ;;  %v3012_v28 = vld [vmem:[#allocation11_spill] sm:$0xff] }
 0x14c   :  { %v1987_v62 = vpop.f32.mrf.mxu1  ;;  %v730_v23 = vadd.f32 %v2745_v29, %v527_v6 }
 0x14d   :  { %v1283_v1 = vadd.f32 %v1987_v62, %v1106_v27  ;;  %v1123_v37 = vpop.f32.mrf.mxu0  ;;  %v1130_v27 = vadd.f32 %v1937_v8, %v901_v39  ;;  %v521_v62 = vadd.f32 %v2723_v63, %v2705_v50 }
 0x14e   :  { %v1276_v14 = vpop.f32.mrf.mxu1  ;;  %v1124_v25 = vadd.f32 %v1123_v37, %v893_v7  ;;  %v539_v37 = vadd.f32 %v2727_v15, %v2709_v52  ;;  %v933_v63 = vadd.f32 %v2759_v9, %v730_v23 }
 0x14f   :  { %v1429_v56 = vadd.f32 %v2790_v45, %v1283_v1  ;;  %v1277_v49 = vadd.f32 %v1276_v14, %v1100_v26  ;;  %v1940_v5 = vpop.f32.mrf.mxu0  ;;  %v723_v50 = vadd.f32 %v2747_v32, %v521_v62  ;;  %v3014_v62 = vld [vmem:[#allocation5_spill] sm:$0xff] }
 0x150   :  { %v1990_v22 = vpop.f32.mrf.mxu1  ;;  %v1142_v4 = vadd.f32 %v1940_v5, %v917_v35  ;;  %v744_v52 = vadd.f32 %v2749_v3, %v539_v37 }
 0x151   :  { %v1445_v16 = vmax.f32 %v1429_v56, 0.0  ;;  %v1428_v24 = vadd.f32 %v2790_v45, %v1277_v49  ;;  %v1295_v59 = vadd.f32 %v1990_v22, %v1118_v21  ;;  %v1135_v61 = vpop.f32.mrf.mxu0  ;;  %v533_v21 = vadd.f32 %v2731_v18, %v2713_v36 }
 0x152   :  { %v1288_v46 = vpop.f32.mrf.mxu1  ;;  %v1136_v54 = vadd.f32 %v1135_v61, %v909_v57  ;;  %v925_v15 = vadd.f32 %v2763_v47, %v723_v50  ;;  %v949_v18 = vadd.f32 %v2767_v11, %v744_v52  ;;  %v3007_v61 = vld [vmem:[#allocation6_spill] sm:$0xff]  ;;  %v3015_v57 = vld [vmem:[#allocation8_spill] sm:$0xff] }
 0x153   :  { %1461 = vst [vmem:[%s2901_s3 + $0x8] sm:$0xff] %v1445_v16  ;;  %v1444_v2 = vmax.f32 %v1428_v24, 0.0  ;;  %v1431_v41 = vadd.f32 %v2790_v45, %v1295_v59  ;;  %v1289_v51 = vadd.f32 %v1288_v46, %v1112_v60  ;;  %v1943_v13 = vpop.f32.mrf.mxu0  ;;  %v737_v36 = vadd.f32 %v2753_v30, %v533_v21  ;;  %v3005_v16 = vld [vmem:[#allocation15_spill] sm:$0xff]  ;;  %v3006_v24 = vld [vmem:[#allocation14_spill] sm:$0xff] }
 0x154   :  { %v1993_v17 = vpop.f32.mrf.mxu1  ;;  %v1154_v9 = vadd.f32 %v1943_v13, %v933_v63  ;;  %v545_v59 = vadd.f32 %v3006_v24, %v3005_v16  ;;  %v758_v31 = vadd.f32 %v3007_v61, %v551_v10  ;;  %v3011_v13 = vld [vmem:[#allocation7_spill] sm:$0xff] }
 0x155   :  { %1460 = vst [vmem:[%s2901_s3] sm:$0xff] %v1444_v2  ;;  %v1447_v19 = vmax.f32 %v1431_v41, 0.0  ;;  %v1430_v8 = vadd.f32 %v2790_v45, %v1289_v51  ;;  %v1307_v58 = vadd.f32 %v1993_v17, %v1130_v27  ;;  %v1147_v34 = vpop.f32.mrf.mxu0  ;;  %v941_v20 = vadd.f32 %v3008_v53, %v737_v36  ;;  %v3009_v2 = vld [vmem:[#allocation12_spill] sm:$0xff] }
 0x156   :  { %v1300_v38 = vpop.f32.mrf.mxu1  ;;  %v1148_v47 = vadd.f32 %v1147_v34, %v925_v15  ;;  %v3010_v41 = vld [vmem:[#allocation4_spill] sm:$0xff]  ;;  %v751_v6 = vadd.f32 %v3011_v13, %v545_v59  ;;  %v965_v35 = vadd.f32 %v3012_v28, %v758_v31  ;;  %v3013_v34 = vld [vmem:[#allocation3_spill] sm:$0xff] }
 0x157   :  { %1463 = vst [vmem:[%s2901_s3 + $0x18] sm:$0xff] %v1447_v19  ;;  %v1446_v12 = vmax.f32 %v1430_v8, 0.0  ;;  %v1433_v40 = vadd.f32 %v2790_v45, %v1307_v58  ;;  %v1301_v26 = vadd.f32 %v1300_v38, %v1124_v25  ;;  %v1946_v1 = vpop.f32.mrf.mxu0  ;;  %v563_v51 = vadd.f32 %v3010_v41, %v3009_v2 }
 0x158   :  { %v1996_v29 = vpop.f32.mrf.mxu1  ;;  %v1166_v11 = vadd.f32 %v1946_v1, %v949_v18  ;;  %v557_v23 = vadd.f32 %v3014_v62, %v3013_v34 }
 0x159   :  { %1462 = vst [vmem:[%s2901_s3 + $0x10] sm:$0xff] %v1446_v12  ;;  %v1449_v48 = vmax.f32 %v1433_v40, 0.0  ;;  %v1432_v44 = vadd.f32 %v2790_v45, %v1301_v26  ;;  %v1319_v14 = vadd.f32 %v1996_v29, %v1142_v4  ;;  %v1159_v42 = vpop.f32.mrf.mxu0  ;;  %v772_v38 = vadd.f32 %v3015_v57, %v563_v51  ;;  %v3016_v4 = vld [vmem:[#allocation13_spill] sm:$0xff] }
 0x15a   :  { %v1312_v32 = vpop.f32.mrf.mxu1  ;;  %v1160_v25 = vadd.f32 %v1159_v42, %v941_v20  ;;  %v957_v12 = vadd.f32 %v3016_v4, %v751_v6  ;;  %v3017_v29 = vld [vmem:[#allocation9_spill] sm:$0xff] }
 0x15b   :  { %1465 = vst [vmem:[%s2901_s3 + $0x28] sm:$0xff] %v1449_v48  ;;  %v1448_v56 = vmax.f32 %v1432_v44, 0.0  ;;  %v1435_v49 = vadd.f32 %v2790_v45, %v1319_v14  ;;  %v1313_v5 = vadd.f32 %v1312_v32, %v1136_v54  ;;  %v1949_v43 = vpop.f32.mrf.mxu0  ;;  %v765_v54 = vadd.f32 %v3017_v29, %v557_v23 }
 0x15c   :  { %v1999_v3 = vpop.f32.mrf.mxu1  ;;  %v1178_v1 = vadd.f32 %v1949_v43, %v965_v35  ;;  %v981_v48 = vadd.f32 %v2778_v55, %v772_v38 }
 0x15d   :  { %1464 = vst [vmem:[%s2901_s3 + $0x20] sm:$0xff] %v1448_v56  ;;  %v1451_v39 = vmax.f32 %v1435_v49, 0.0  ;;  %v1434_v22 = vadd.f32 %v2790_v45, %v1313_v5  ;;  %v1331_v60 = vadd.f32 %v1999_v3, %v1154_v9  ;;  %v1171_v30 = vpop.f32.mrf.mxu0  ;;  %v973_v15 = vadd.f32 %v2781_v0, %v765_v54 }
 0x15e   :  { %v1324_v33 = vpop.f32.mrf.mxu1  ;;  %v1172_v14 = vadd.f32 %v1171_v30, %v957_v12 }
 0x15f   :  { %1467 = vst [vmem:[%s2901_s3 + $0x38] sm:$0xff] %v1451_v39  ;;  %v1450_v7 = vmax.f32 %v1434_v22, 0.0  ;;  %v1437_v46 = vadd.f32 %v2790_v45, %v1331_v60  ;;  %v1325_v27 = vadd.f32 %v1324_v33, %v1148_v47  ;;  %v1952_v40 = vpop.f32.mrf.mxu0 }
 0x160   :  { %v2002_v17 = vpop.f32.mrf.mxu1  ;;  %v1190_v56 = vadd.f32 %v1952_v40, %v981_v48 }
 0x161   :  { %1466 = vst [vmem:[%s2901_s3 + $0x30] sm:$0xff] %v1450_v7  ;;  %v1453_v19 = vmax.f32 %v1437_v46, 0.0  ;;  %v1436_v8 = vadd.f32 %v2790_v45, %v1325_v27  ;;  %v1343_v58 = vadd.f32 %v2002_v17, %v1166_v11  ;;  %v1183_v32 = vpop.f32.mrf.mxu0 }
 0x162   :  { %v1336_v26 = vpop.f32.mrf.mxu1  ;;  %v1184_v10 = vadd.f32 %v1183_v32, %v973_v15 }
 0x163   :  { %1469 = vst [vmem:[%s2901_s3 + $0x48] sm:$0xff] %v1453_v19  ;;  %v1452_v37 = vmax.f32 %v1436_v8, 0.0  ;;  %v1439_v50 = vadd.f32 %v2790_v45, %v1343_v58  ;;  %v1337_v63 = vadd.f32 %v1336_v26, %v1160_v25 }
 0x164   :  { %v2005_v44 = vpop.f32.mrf.mxu1 }
 0x165   :  { %1468 = vst [vmem:[%s2901_s3 + $0x40] sm:$0xff] %v1452_v37  ;;  %v1455_v42 = vmax.f32 %v1439_v50, 0.0  ;;  %v1438_v21 = vadd.f32 %v2790_v45, %v1337_v63  ;;  %v1355_v52 = vadd.f32 %v2005_v44, %v1178_v1 }
 0x166   :  { %v1348_v9 = vpop.f32.mrf.mxu1 }
 0x167   :  { %1471 = vst [vmem:[%s2901_s3 + $0x58] sm:$0xff] %v1455_v42  ;;  %v1454_v55 = vmax.f32 %v1438_v21, 0.0  ;;  %v1441_v49 = vadd.f32 %v2790_v45, %v1355_v52  ;;  %v1349_v5 = vadd.f32 %v1348_v9, %v1172_v14 }
 0x168   :  { %v2008_v43 = vpop.f32.mrf.mxu1 }
 0x169   :  { %1470 = vst [vmem:[%s2901_s3 + $0x50] sm:$0xff] %v1454_v55  ;;  %v1457_v36 = vmax.f32 %v1441_v49, 0.0  ;;  %v1440_v0 = vadd.f32 %v2790_v45, %v1349_v5  ;;  %v1367_v18 = vadd.f32 %v2008_v43, %v1190_v56 }
 0x16a   :  { %v1360_v3 = vpop.f32.mrf.mxu1 }
 0x16b   :  { %1473 = vst [vmem:[%s2901_s3 + $0x68] sm:$0xff] %v1457_v36  ;;  %v1456_v47 = vmax.f32 %v1440_v0, 0.0  ;;  %v1443_v39 = vadd.f32 %v2790_v45, %v1367_v18  ;;  %v1361_v22 = vadd.f32 %v1360_v3, %v1184_v10 }
 0x16d   :  { %1472 = vst [vmem:[%s2901_s3 + $0x60] sm:$0xff] %v1456_v47  ;;  %v1459_v60 = vmax.f32 %v1443_v39, 0.0  ;;  %v1442_v16 = vadd.f32 %v2790_v45, %v1361_v22 }
 0x16f   :  { %1475 = vst [vmem:[%s2901_s3 + $0x78] sm:$0xff] %v1459_v60  ;;  %v1458_v24 = vmax.f32 %v1442_v16, 0.0 }
 0x171   :  { %1474 = vst [vmem:[%s2901_s3 + $0x70] sm:$0xff] %v1458_v24 }

// kernel: hain_forward_prepared.5
= control target key start
LH: loop header
LB: loop body
LE: loop exit
PB: predicated region body
PF: predicated region fallthrough
CT: control target
= control target key end

     0   :  { %s3339_s1 = inlined_call_operand.vmem [shape: f32[128,128], index: 1, kind: input, shape index: {}]   ;;  %s3340_s0 = inlined_call_operand.vmem [shape: f32[128,128], index: 0, kind: input, shape index: {}]   ;;  %s3341_s2 = inlined_call_operand.vmem [shape: f32[1,128], index: 2, kind: input, shape index: {}]   ;;  %s3342_s3 = inlined_call_operand.vmem [shape: f32[128,128], index: 3, kind: output, shape index: {}]  }
   0x1   :  { %v83_v0 = vld [vmem:[%s3339_s1 + $0x78] sm:$0xff]  ;;  %v82_v1 = vld [vmem:[%s3339_s1 + $0x70] sm:$0xff]  ;;  %v81_v2 = vld [vmem:[%s3339_s1 + $0x68] sm:$0xff] }
   0x2   :  { %v2281_v3 = vand.u32 4294901760, %v83_v0  ;;  %v2283_v4 = vand.u32 4294901760, %v82_v1  ;;  %v2285_v5 = vand.u32 4294901760, %v81_v2  ;;  %v80_v6 = vld [vmem:[%s3339_s1 + $0x60] sm:$0xff]  ;;  %v79_v7 = vld [vmem:[%s3339_s1 + $0x58] sm:$0xff]  ;;  %v78_v8 = vld [vmem:[%s3339_s1 + $0x50] sm:$0xff] }
   0x3   :  { %v2296_v9 = vand.u32 4294901760, %v80_v6  ;;  %v2298_v10 = vand.u32 4294901760, %v79_v7  ;;  %v2300_v11 = vand.u32 4294901760, %v78_v8  ;;  %v77_v12 = vld [vmem:[%s3339_s1 + $0x48] sm:$0xff]  ;;  %v76_v13 = vld [vmem:[%s3339_s1 + $0x40] sm:$0xff]  ;;  %v75_v18 = vld [vmem:[%s3339_s1 + $0x38] sm:$0xff] }
   0x4   :  { %1852 = vmatprep.subr.mxu0 %v2281_v3  ;;  %v2310_v14 = vsub.f32 %v83_v0, %v2281_v3  ;;  %v2313_v15 = vsub.f32 %v82_v1, %v2283_v4  ;;  %v2315_v16 = vand.u32 4294901760, %v77_v12  ;;  %v2318_v17 = vsub.f32 %v81_v2, %v2285_v5  ;;  %v74_v25 = vld [vmem:[%s3339_s1 + $0x30] sm:$0xff]  ;;  %v73_v35 = vld [vmem:[%s3339_s1 + $0x28] sm:$0xff]  ;;  %v72_v40 = vld [vmem:[%s3339_s1 + $0x20] sm:$0xff] }
   0x5   :  { %1853 = vmatpush3.msra.mxu0 %v2281_v3  ;;  %v2325_v19 = vsub.f32 %v80_v6, %v2296_v9  ;;  %v2328_v20 = vsub.f32 %v79_v7, %v2298_v10  ;;  %v2340_v24 = vand.u32 4294901760, %v76_v13  ;;  %v2349_v27 = vand.u32 4294901760, %v75_v18  ;;  %v50_v47 = vld [vmem:[%s3340_s0] sm:$0xff]  ;;  %v51_v49 = vld [vmem:[%s3340_s0 + $0x8] sm:$0xff]  ;;  %v71_v53 = vld [vmem:[%s3339_s1 + $0x18] sm:$0xff] }
   0x6   :  { %1854 = vmatprep.subr.mxu0 %v2283_v4  ;;  %v2332_v21 = vand.u32 4294901760, %v2310_v14  ;;  %v2335_v22 = vand.u32 4294901760, %v2313_v15  ;;  %v2338_v23 = vand.u32 4294901760, %v2318_v17  ;;  %v2355_v29 = vsub.f32 %v78_v8, %v2300_v11  ;;  %v70_v59 = vld [vmem:[%s3339_s1 + $0x10] sm:$0xff]  ;;  %v69_v6 = vld [vmem:[%s3339_s1 + $0x8] sm:$0xff] }
   0x7   :  { %1855 = vmatpush3.msra.mxu0 %v2283_v4  ;;  %v2347_v26 = vand.u32 4294901760, %v2325_v19  ;;  %v2352_v28 = vand.u32 4294901760, %v2328_v20  ;;  %v2365_v33 = vsub.f32 %v77_v12, %v2315_v16  ;;  %v2368_v34 = vand.u32 4294901760, %v74_v25  ;;  %v52_v63 = vld [vmem:[%s3340_s0 + $0x10] sm:$0xff] }
   0x8   :  { %3382 = vst [vmem:[#allocation3_spill] sm:$0xff] %v2338_v23  ;;  %1856 = vmatprep.subr.mxu0 %v2285_v5  ;;  %v329_v30 = vsub.f32 %v2310_v14, %v2332_v21  ;;  %v336_v31 = vsub.f32 %v2313_v15, %v2335_v22  ;;  %v343_v32 = vsub.f32 %v2318_v17, %v2338_v23  ;;  %v2377_v39 = vand.u32 4294901760, %v2355_v29 }
   0x9   :  { %3383 = vst [vmem:[#allocation4_spill] sm:$0xff] %v2347_v26  ;;  %3384 = vst [vmem:[#allocation5_spill] sm:$0xff] %v2352_v28  ;;  %1857 = vmatpush3.msra.mxu0 %v2285_v5  ;;  %v350_v38 = vsub.f32 %v2325_v19, %v2347_v26  ;;  %v2384_v41 = vand.u32 4294901760, %v2365_v33  ;;  %v2387_v42 = vsub.f32 %v76_v13, %v2340_v24  ;;  %v2392_v45 = vand.u32 4294901760, %v73_v35 }
   0xa   :  { %1858 = vmatprep.subr.mxu0 %v2296_v9  ;;  %v330_v36 = vand.u32 4294901760, %v329_v30  ;;  %v337_v37 = vand.u32 4294901760, %v336_v31  ;;  %3385 = vst [vmem:[#allocation6_spill] sm:$0xff] %v2377_v39  ;;  %v344_v43 = vand.u32 4294901760, %v343_v32  ;;  %v357_v44 = vsub.f32 %v2328_v20, %v2352_v28  ;;  %v68_v31 = vld [vmem:[%s3339_s1] sm:$0xff] }
   0xb   :  { %1859 = vmatpush3.msra.mxu0 %v2296_v9  ;;  %3386 = vst [vmem:[#allocation7_spill] sm:$0xff] %v2384_v41  ;;  %v2395_v46 = vsub.f32 %v75_v18, %v2349_v27  ;;  %v2401_v48 = vand.u32 4294901760, %v72_v40  ;;  %v351_v50 = vand.u32 4294901760, %v350_v38  ;;  %v364_v51 = vsub.f32 %v2355_v29, %v2377_v39  ;;  %v53_v18 = vld [vmem:[%s3340_s0 + $0x18] sm:$0xff] }
   0xc   :  { %1860 = vmatprep.subr.mxu0 %v2298_v10  ;;  %1908 = vmatprep.subr.mxu1 %v330_v36  ;;  %v2410_v52 = vand.u32 4294901760, %v2387_v42  ;;  %v2416_v54 = vsub.f32 %v74_v25, %v2368_v34  ;;  %v371_v55 = vsub.f32 %v2365_v33, %v2384_v41  ;;  %v2421_v56 = vand.u32 4294901760, %v50_v47  ;;  %v57_v39 = vld [vmem:[%s3340_s0 + $0x38] sm:$0xff] }
   0xd   :  { %1861 = vmatpush3.msra.mxu0 %v2298_v10  ;;  %1909 = vmatpush3.msra.mxu1 %v330_v36  ;;  %v358_v57 = vand.u32 4294901760, %v357_v44  ;;  %v2425_v58 = vand.u32 4294901760, %v2395_v46  ;;  %v2431_v60 = vsub.f32 %v73_v35, %v2392_v45  ;;  %v2433_v61 = vand.u32 4294901760, %v51_v49 }
   0xe   :  { %1862 = vmatprep.subr.mxu0 %v2300_v11  ;;  %1910 = vmatprep.subr.mxu1 %v337_v37  ;;  %3387 = vst [vmem:[#allocation8_spill] sm:$0xff] %v2410_v52  ;;  %v2436_v62 = vand.u32 4294901760, %v71_v53  ;;  %v365_v0 = vand.u32 4294901760, %v364_v51  ;;  %v378_v1 = vsub.f32 %v2387_v42, %v2410_v52  ;;  %v2445_v2 = vand.u32 4294901760, %v2416_v54 }
   0xf   :  { %1863 = vmatpush3.msra.mxu0 %v2300_v11  ;;  %1911 = vmatpush3.msra.mxu1 %v337_v37  ;;  %3388 = vst [vmem:[#allocation9_spill] sm:$0xff] %v2425_v58  ;;  %v2451_v7 = vsub.f32 %v72_v40, %v2401_v48  ;;  %v372_v8 = vand.u32 4294901760, %v371_v55  ;;  %v2454_v12 = vand.u32 4294901760, %v70_v59  ;;  %v2457_v13 = vsub.f32 %v50_v47, %v2421_v56  ;;  %v54_v47 = vld [vmem:[%s3340_s0 + $0x20] sm:$0xff] }
  0x10   :  { %1864 = vmatprep.subr.mxu0 %v2315_v16  ;;  %1912 = vmatprep.subr.mxu1 %v344_v43  ;;  %3389 = vst [vmem:[#allocation10_spill] sm:$0xff] %v2445_v2  ;;  %v385_v25 = vsub.f32 %v2395_v46, %v2425_v58  ;;  %v2466_v30 = vand.u32 4294901760, %v2431_v60  ;;  %v2472_v32 = vsub.f32 %v51_v49, %v2433_v61  ;;  %v2474_v35 = vand.u32 4294901760, %v52_v63 }
  0x11   :  { %1865 = vmatpush3.msra.mxu0 %v2315_v16  ;;  %1913 = vmatpush3.msra.mxu1 %v344_v43  ;;  %v2477_v36 = vand.u32 4294901760, %v69_v6  ;;  %v2480_v37 = vsub.f32 %v71_v53, %v2436_v62  ;;  %v379_v38 = vand.u32 4294901760, %v378_v1  ;;  %v392_v40 = vsub.f32 %v2416_v54, %v2445_v2 }
  0x12   :  { %1866 = vmatprep.subr.mxu0 %v2340_v24  ;;  %1914 = vmatprep.subr.mxu1 %v351_v50  ;;  %3390 = vst [vmem:[#allocation11_spill] sm:$0xff] %v2466_v30  ;;  %v2486_v43 = vand.u32 4294901760, %v2451_v7  ;;  %v2488_v44 = vand.u32 4294901760, %v53_v18  ;;  %v2494_v49 = vand.u32 4294901760, %v68_v31  ;;  %v2498_v51 = vsub.f32 %v70_v59, %v2454_v12 }
  0x13   :  { %1867 = vmatpush3.msra.mxu0 %v2340_v24  ;;  %1915 = vmatpush3.msra.mxu1 %v351_v50  ;;  %3391 = vst [vmem:[#allocation12_spill] sm:$0xff] %v2477_v36  ;;  %v386_v53 = vand.u32 4294901760, %v385_v25  ;;  %v399_v55 = vsub.f32 %v2431_v60, %v2466_v30  ;;  %v2505_v1 = vsub.f32 %v52_v63, %v2474_v35  ;;  %v2512_v59 = vand.u32 4294901760, %v2480_v37 }
  0x14   :  { %1868 = vmatprep.subr.mxu0 %v2349_v27  ;;  %1916 = vmatprep.subr.mxu1 %v358_v57  ;;  %3392 = vst [vmem:[#allocation13_spill] sm:$0xff] %v2486_v43  ;;  %3393 = vst [vmem:[#allocation14_spill] sm:$0xff] %v2494_v49  ;;  %v2515_v25 = vsub.f32 %v69_v6, %v2477_v36  ;;  %v2517_v50 = vand.u32 4294901760, %v54_v47  ;;  %v393_v63 = vand.u32 4294901760, %v392_v40  ;;  %v2530_v2 = vand.u32 4294901760, %v2498_v51 }
  0x15   :  { %1869 = vmatpush3.msra.mxu0 %v2349_v27  ;;  %1917 = vmatpush3.msra.mxu1 %v358_v57  ;;  %3394 = vst [vmem:[#allocation15_spill] sm:$0xff] %v2505_v1  ;;  %3395 = vst [vmem:[#allocation16_spill] sm:$0xff] %v2512_v59  ;;  %v406_v57 = vsub.f32 %v2451_v7, %v2486_v43  ;;  %v2523_v30 = vsub.f32 %v53_v18, %v2488_v44  ;;  %v400_v40 = vand.u32 4294901760, %v399_v55 }
  0x16   :  { %1870 = vmatprep.subr.mxu0 %v2368_v34  ;;  %1918 = vmatprep.subr.mxu1 %v365_v0  ;;  %3397 = vst [vmem:[#allocation17_spill] sm:$0xff] %v2530_v2  ;;  %v3398_v43 = vand.u32 4294901760, %v2472_v32  ;;  %v413_v41 = vsub.f32 %v2480_v37, %v2512_v59  ;;  %v2549_v55 = vand.u32 4294901760, %v2515_v25  ;;  %v420_v59 = vsub.f32 %v2498_v51, %v2530_v2 }
  0x17   :  { %1871 = vmatpush3.msra.mxu0 %v2368_v34  ;;  %1919 = vmatpush3.msra.mxu1 %v365_v0  ;;  %v55_v0 = vld [vmem:[%s3340_s0 + $0x28] sm:$0xff]  ;;  %v3400_v52 = vand.u32 4294901760, %v2505_v1  ;;  %v2578_v2 = vand.u32 4294901760, %v57_v39 }
  0x18   :  { %1872 = vmatprep.subr.mxu0 %v2392_v45  ;;  %1920 = vmatprep.subr.mxu1 %v372_v8  ;;  %v2532_v58 = vand.u32 4294901760, %v55_v0  ;;  %v178_v18 = vsub.f32 %v2472_v32, %v3398_v43  ;;  %3399 = vst [vmem:[#allocation18_spill] sm:$0xff] %v2549_v55  ;;  %v2552_v43 = vsub.f32 %v54_v47, %v2517_v50 }
  0x19   :  { %1873 = vmatpush3.msra.mxu0 %v2392_v45  ;;  %1921 = vmatpush3.msra.mxu1 %v372_v8  ;;  %v3396_v8 = vand.u32 4294901760, %v2457_v13  ;;  %v188_v26 = vsub.f32 %v2505_v1, %v3400_v52 }
  0x1a   :  { %1874 = vmatprep.subr.mxu0 %v2401_v48  ;;  %1922 = vmatprep.subr.mxu1 %v379_v38  ;;  %v2563_v47 = vsub.f32 %v55_v0, %v2532_v58  ;;  %v427_v0 = vsub.f32 %v2515_v25, %v2549_v55 }
  0x1b   :  { %1875 = vmatpush3.msra.mxu0 %v2401_v48  ;;  %1923 = vmatpush3.msra.mxu1 %v379_v38  ;;  %v168_v6 = vsub.f32 %v2457_v13, %v3396_v8  ;;  %v2540_v38 = vsub.f32 %v68_v31, %v2494_v49  ;;  %v56_v8 = vld [vmem:[%s3340_s0 + $0x30] sm:$0xff]  ;;  %v407_v31 = vand.u32 4294901760, %v406_v57  ;;  %v179_v57 = vand.u32 4294901760, %v178_v18 }
  0x1c   :  { %1876 = vmatprep.subr.mxu0 %v2436_v62  ;;  %1924 = vmatprep.subr.mxu1 %v386_v53  ;;  %v2565_v28 = vand.u32 4294901760, %v56_v8  ;;  %v3402_v18 = vand.u32 4294901760, %v2523_v30  ;;  %v189_v55 = vand.u32 4294901760, %v188_v26 }
  0x1d   :  { %1877 = vmatpush3.msra.mxu0 %v2436_v62  ;;  %1925 = vmatpush3.msra.mxu1 %v386_v53  ;;  %v169_v53 = vand.u32 4294901760, %v168_v6  ;;  %v2572_v23 = vand.u32 4294901760, %v2540_v38 }
  0x1e   :  { %1878 = vmatprep.subr.mxu0 %v2454_v12  ;;  %1926 = vmatprep.subr.mxu1 %v393_v63  ;;  %v198_v52 = vsub.f32 %v2523_v30, %v3402_v18  ;;  %v2590_v6 = vsub.f32 %v56_v8, %v2565_v28  ;;  %v59_v18 = vld [vmem:[%s3340_s0 + $0x48] sm:$0xff]  ;;  %v2602_v8 = vsub.f32 %v57_v39, %v2578_v2 }
  0x1f   :  { %1879 = vmatpush3.msra.mxu0 %v2454_v12  ;;  %1927 = vmatpush3.msra.mxu1 %v393_v63  ;;  %3401 = vst [vmem:[#allocation19_spill] sm:$0xff] %v2572_v23  ;;  %v414_v63 = vand.u32 4294901760, %v413_v41  ;;  %v421_v41 = vand.u32 4294901760, %v420_v59  ;;  %v434_v1 = vsub.f32 %v2540_v38, %v2572_v23  ;;  %v3403_v59 = vand.u32 4294901760, %v2552_v43 }
  0x20   :  { %1880 = vmatprep.subr.mxu0 %v2477_v36  ;;  %1928 = vmatprep.subr.mxu1 %v400_v40  ;;  %v199_v26 = vand.u32 4294901760, %v198_v52  ;;  %v3380_v23 = vand.u32 4294901760, %v2590_v6  ;;  %v3379_v52 = vand.u32 4294901760, %v2602_v8 }
  0x21   :  { %1881 = vmatpush3.msra.mxu0 %v2477_v36  ;;  %1929 = vmatpush3.msra.mxu1 %v400_v40  ;;  %v58_v36 = vld [vmem:[%s3340_s0 + $0x40] sm:$0xff]  ;;  %v208_v40 = vsub.f32 %v2552_v43, %v3403_v59  ;;  %v435_v39 = vand.u32 4294901760, %v434_v1  ;;  %v61_v1 = vld [vmem:[%s3340_s0 + $0x58] sm:$0xff] }
  0x22   :  { %1882 = vmatprep.subr.mxu0 %v2494_v49  ;;  %1930 = vmatprep.subr.mxu1 %v407_v31 }
  0x23   :  { %1883 = vmatpush3.msra.mxu0 %v2494_v49  ;;  %1884 = vmatprep.mubr.f32.mxu0 %v169_v53  ;;  %v428_v53 = vand.u32 4294901760, %v427_v0  ;;  %v2612_v49 = vand.u32 4294901760, %v59_v18 }
  0x24   :  { %1931 = vmatpush3.msra.mxu1 %v407_v31  ;;  %1885 = vmatmul.mubr.f32.vlgmr.msra.gmra.mxu0 %v179_v57  ;;  %v2604_v31 = vand.u32 4294901760, %v58_v36  ;;  %v3404_v57 = vand.u32 4294901760, %v2563_v47 }
  0x25   :  { %1932 = vmatprep.subr.mxu1 %v414_v63  ;;  %1964 = vmatprep.subr.mxu0 %v2310_v14 }
  0x26   :  { %1933 = vmatpush3.msra.mxu1 %v414_v63  ;;  %1965 = vmatpush3.msra.mxu0 %v2310_v14  ;;  %v218_v0 = vsub.f32 %v2563_v47, %v3404_v57  ;;  %v60_v63 = vld [vmem:[%s3340_s0 + $0x50] sm:$0xff]  ;;  %v209_v14 = vand.u32 4294901760, %v208_v40  ;;  %v2620_v59 = vsub.f32 %v58_v36, %v2604_v31  ;;  %v238_v40 = vsub.f32 %v2602_v8, %v3379_v52 }
  0x27   :  { %1934 = vmatprep.subr.mxu1 %v421_v41  ;;  %1966 = vmatprep.subr.mxu0 %v2313_v15  ;;  %v2633_v36 = vand.u32 4294901760, %v60_v63 }
  0x28   :  { %1887 = vmatprep.mubr.f32.mxu0 %v189_v55  ;;  %1935 = vmatpush3.msra.mxu1 %v421_v41  ;;  %v219_v55 = vand.u32 4294901760, %v218_v0  ;;  %v2631_v41 = vsub.f32 %v59_v18, %v2612_v49  ;;  %v62_v18 = vld [vmem:[%s3340_s0 + $0x60] sm:$0xff] }
  0x29   :  { %1967 = vmatpush3.msra.mxu0 %v2313_v15  ;;  %1936 = vmatprep.subr.mxu1 %v428_v53  ;;  %v228_v15 = vsub.f32 %v2590_v6, %v3380_v23  ;;  %v2650_v0 = vsub.f32 %v60_v63, %v2633_v36 }
  0x2a   :  { %1888 = vmatmul.mubr.f32.gmra.mxu0 %v199_v26  ;;  %1968 = vmatprep.subr.mxu0 %v2318_v17  ;;  %v3378_v57 = vand.u32 4294901760, %v2631_v41 }
  0x2b   :  { %1937 = vmatpush3.msra.mxu1 %v428_v53  ;;  %1969 = vmatpush3.msra.mxu0 %v2318_v17  ;;  %v3377_v17 = vand.u32 4294901760, %v2620_v59  ;;  %v2640_v53 = vand.u32 4294901760, %v61_v1  ;;  %v229_v26 = vand.u32 4294901760, %v228_v15  ;;  %v3381_v15 = vand.u32 4294901760, %v2650_v0 }
  0x2c   :  { %1938 = vmatprep.subr.mxu1 %v435_v39  ;;  %1970 = vmatprep.subr.mxu0 %v2325_v19 }
  0x2d   :  { %1890 = vmatprep.mubr.f32.mxu0 %v209_v14  ;;  %1939 = vmatpush3.msra.mxu1 %v435_v39  ;;  %v239_v39 = vand.u32 4294901760, %v238_v40  ;;  %v248_v14 = vsub.f32 %v2620_v59, %v3377_v17  ;;  %v2663_v63 = vsub.f32 %v61_v1, %v2640_v53  ;;  %v64_v1 = vld [vmem:[%s3340_s0 + $0x70] sm:$0xff] }
  0x2e   :  { %1940 = vmatprep.mubr.f32.mxu1 %v2421_v56  ;;  %1971 = vmatpush3.msra.mxu0 %v2325_v19  ;;  %v63_v19 = vld [vmem:[%s3340_s0 + $0x68] sm:$0xff]  ;;  %v2699_v52 = vand.u32 4294901760, %v64_v1 }
  0x2f   :  { %1891 = vmatmul.mubr.f32.gmra.mxu0 %v219_v55  ;;  %1941 = vmatmul.mubr.f32.vlgmr.msra.gmra.mxu1 %v2433_v61  ;;  %v2665_v55 = vand.u32 4294901760, %v62_v18  ;;  %v2674_v40 = vand.u32 4294901760, %v63_v19  ;;  %v277_v17 = vand.u32 4294901760, %v2663_v63 }
  0x30   :  { %1972 = vmatprep.subr.mxu0 %v2328_v20  ;;  %2020 = vmatprep.subr.mxu1 %v2281_v3 }
  0x31   :  { %1973 = vmatpush3.msra.mxu0 %v2328_v20  ;;  %2021 = vmatpush3.msra.mxu1 %v2281_v3  ;;  %v258_v20 = vsub.f32 %v2631_v41, %v3378_v57  ;;  %v2684_v57 = vsub.f32 %v62_v18, %v2665_v55  ;;  %v2697_v18 = vsub.f32 %v63_v19, %v2674_v40 }
  0x32   :  { %1974 = vmatprep.subr.mxu0 %v2355_v29  ;;  %2022 = vmatprep.subr.mxu1 %v2283_v4 }
  0x33   :  { %1893 = vmatprep.mubr.f32.mxu0 %v229_v26  ;;  %1943 = vmatprep.mubr.f32.mxu1 %v2474_v35  ;;  %v249_v26 = vand.u32 4294901760, %v248_v14  ;;  %v268_v14 = vsub.f32 %v2650_v0, %v3381_v15  ;;  %v2715_v15 = vsub.f32 %v64_v1, %v2699_v52 }
  0x34   :  { %1975 = vmatpush3.msra.mxu0 %v2355_v29  ;;  %2023 = vmatpush3.msra.mxu1 %v2283_v4  ;;  %v65_v29 = vld [vmem:[%s3340_s0 + $0x78] sm:$0xff] }
  0x35   :  { %1894 = vmatmul.mubr.f32.gmra.mxu0 %v239_v39  ;;  %1944 = vmatmul.mubr.f32.gmra.mxu1 %v2488_v44  ;;  %v259_v39 = vand.u32 4294901760, %v258_v20  ;;  %v287_v20 = vand.u32 4294901760, %v2684_v57  ;;  %v2708_v23 = vand.u32 4294901760, %v65_v29  ;;  %v269_v19 = vand.u32 4294901760, %v268_v14 }
  0x36   :  { %1976 = vmatprep.subr.mxu0 %v2365_v33  ;;  %2024 = vmatprep.subr.mxu1 %v2285_v5  ;;  %v307_v1 = vand.u32 4294901760, %v2715_v15 }
  0x37   :  { %1977 = vmatpush3.msra.mxu0 %v2365_v33  ;;  %2025 = vmatpush3.msra.mxu1 %v2285_v5  ;;  %v278_v33 = vsub.f32 %v2663_v63, %v277_v17  ;;  %v2725_v14 = vsub.f32 %v65_v29, %v2708_v23 }
  0x38   :  { %1978 = vmatprep.subr.mxu0 %v2387_v42  ;;  %2026 = vmatprep.subr.mxu1 %v2296_v9 }
  0x39   :  { %1896 = vmatprep.mubr.f32.mxu0 %v249_v26  ;;  %1946 = vmatprep.mubr.f32.mxu1 %v2517_v50  ;;  %v297_v26 = vand.u32 4294901760, %v2697_v18 }
  0x3a   :  { %1979 = vmatpush3.msra.mxu0 %v2387_v42  ;;  %2027 = vmatpush3.msra.mxu1 %v2296_v9  ;;  %v279_v42 = vand.u32 4294901760, %v278_v33  ;;  %v317_v33 = vand.u32 4294901760, %v2725_v14 }
  0x3b   :  { %1897 = vmatmul.mubr.f32.gmra.mxu0 %v259_v39  ;;  %1947 = vmatmul.mubr.f32.gmra.mxu1 %v2532_v58  ;;  %v288_v39 = vsub.f32 %v2684_v57, %v287_v20 }
  0x3c   :  { %1980 = vmatprep.subr.mxu0 %v2395_v46  ;;  %2028 = vmatprep.subr.mxu1 %v2298_v10 }
  0x3d   :  { %1981 = vmatpush3.msra.mxu0 %v2395_v46  ;;  %2029 = vmatpush3.msra.mxu1 %v2298_v10  ;;  %v298_v46 = vsub.f32 %v2697_v18, %v297_v26  ;;  %v289_v29 = vand.u32 4294901760, %v288_v39 }
  0x3e   :  { %1982 = vmatprep.subr.mxu0 %v2416_v54  ;;  %2030 = vmatprep.subr.mxu1 %v2300_v11 }
  0x3f   :  { %1899 = vmatprep.mubr.f32.mxu0 %v269_v19  ;;  %1949 = vmatprep.mubr.f32.mxu1 %v2565_v28  ;;  %v299_v19 = vand.u32 4294901760, %v298_v46  ;;  %v3412_v46 = vld [vmem:[#allocation5_spill] sm:$0xff] }
  0x40   :  { %1983 = vmatpush3.msra.mxu0 %v2416_v54  ;;  %2031 = vmatpush3.msra.mxu1 %v2300_v11  ;;  %v308_v54 = vsub.f32 %v2715_v15, %v307_v1 }
  0x41   :  { %1900 = vmatmul.mubr.f32.gmra.mxu0 %v279_v42  ;;  %1950 = vmatmul.mubr.f32.gmra.mxu1 %v2578_v2  ;;  %v318_v42 = vsub.f32 %v2725_v14, %v317_v33 }
  0x42   :  { %1984 = vmatprep.subr.mxu0 %v2431_v60  ;;  %2032 = vmatprep.subr.mxu1 %v2315_v16 }
  0x43   :  { %1985 = vmatpush3.msra.mxu0 %v2431_v60  ;;  %2033 = vmatpush3.msra.mxu1 %v2315_v16  ;;  %v309_v60 = vand.u32 4294901760, %v308_v54  ;;  %v319_v39 = vand.u32 4294901760, %v318_v42  ;;  %v3420_v54 = vld [vmem:[#allocation9_spill] sm:$0xff] }
  0x44   :  { %1986 = vmatprep.subr.mxu0 %v2451_v7  ;;  %2034 = vmatprep.subr.mxu1 %v2340_v24 }
  0x45   :  { %1902 = vmatprep.mubr.f32.mxu0 %v289_v29  ;;  %1952 = vmatprep.mubr.f32.mxu1 %v2604_v31  ;;  %v3413_v29 = vld [vmem:[#allocation6_spill] sm:$0xff] }
  0x46   :  { %1987 = vmatpush3.msra.mxu0 %v2451_v7  ;;  %2035 = vmatpush3.msra.mxu1 %v2340_v24  ;;  %v3405_v7 = vld [vmem:[#allocation15_spill] sm:$0xff] }
  0x47   :  { %1903 = vmatmul.mubr.f32.gmra.mxu0 %v299_v19  ;;  %1953 = vmatmul.mubr.f32.gmra.mxu1 %v2612_v49  ;;  %v3416_v19 = vld [vmem:[#allocation7_spill] sm:$0xff] }
  0x48   :  { %1988 = vmatprep.subr.mxu0 %v2480_v37  ;;  %2036 = vmatprep.subr.mxu1 %v2349_v27 }
  0x49   :  { %1989 = vmatpush3.msra.mxu0 %v2480_v37  ;;  %2037 = vmatpush3.msra.mxu1 %v2349_v27  ;;  %v3406_v37 = vld [vmem:[#allocation12_spill] sm:$0xff] }
  0x4a   :  { %1990 = vmatprep.subr.mxu0 %v2498_v51  ;;  %2038 = vmatprep.subr.mxu1 %v2368_v34 }
  0x4b   :  { %1905 = vmatprep.mubr.f32.mxu0 %v309_v60  ;;  %1955 = vmatprep.mubr.f32.mxu1 %v2633_v36 }
  0x4c   :  { %1991 = vmatpush3.msra.mxu0 %v2498_v51  ;;  %2039 = vmatpush3.msra.mxu1 %v2368_v34  ;;  %v3407_v51 = vld [vmem:[#allocation3_spill] sm:$0xff] }
  0x4d   :  { %1906 = vmatmul.mubr.f32.gmra.mxu0 %v319_v39  ;;  %1956 = vmatmul.mubr.f32.gmra.mxu1 %v2640_v53 }
  0x4e   :  { %1992 = vmatprep.subr.mxu0 %v2515_v25  ;;  %2040 = vmatprep.subr.mxu1 %v2392_v45 }
  0x4f   :  { %1993 = vmatpush3.msra.mxu0 %v2515_v25  ;;  %2041 = vmatpush3.msra.mxu1 %v2392_v45  ;;  %v3409_v25 = vld [vmem:[#allocation4_spill] sm:$0xff] }
  0x50   :  { %1994 = vmatprep.subr.mxu0 %v2540_v38  ;;  %2042 = vmatprep.subr.mxu1 %v2401_v48 }
  0x51   :  { %1958 = vmatprep.mubr.f32.mxu1 %v2665_v55  ;;  %1995 = vmatpush3.msra.mxu0 %v2540_v38  ;;  %v3411_v38 = vand.u32 4294901760, %v2472_v32 }
  0x52   :  { %1996 = vmatprep.mubr.f32.mxu0 %v2457_v13  ;;  %2043 = vmatpush3.msra.mxu1 %v2401_v48 }
  0x53   :  { %1959 = vmatmul.mubr.f32.gmra.mxu1 %v2674_v40  ;;  %1997 = vmatmul.mubr.f32.vlgmr.msra.gmra.mxu0 %v2472_v32  ;;  %v3415_v32 = vand.u32 4294901760, %v2523_v30 }
  0x54   :  { %2044 = vmatprep.subr.mxu1 %v2436_v62  ;;  %2076 = vmatprep.subr.mxu0 %v2332_v21 }
  0x55   :  { %2045 = vmatpush3.msra.mxu1 %v2436_v62  ;;  %2077 = vmatpush3.msra.mxu0 %v2332_v21  ;;  %v3408_v21 = vld [vmem:[#allocation14_spill] sm:$0xff] }
  0x56   :  { %2046 = vmatprep.subr.mxu1 %v2454_v12  ;;  %2078 = vmatprep.subr.mxu0 %v2335_v22 }
  0x57   :  { %1961 = vmatprep.mubr.f32.mxu1 %v2699_v52  ;;  %1999 = vmatprep.mubr.f32.mxu0 %v3405_v7 }
  0x58   :  { %2047 = vmatpush3.msra.mxu1 %v2454_v12  ;;  %2079 = vmatpush3.msra.mxu0 %v2335_v22  ;;  %v3410_v22 = vand.u32 4294901760, %v2457_v13  ;;  %v3414_v13 = vand.u32 4294901760, %v3405_v7 }
  0x59   :  { %1962 = vmatmul.mubr.f32.gmra.mxu1 %v2708_v23  ;;  %2000 = vmatmul.mubr.f32.gmra.mxu0 %v2523_v30  ;;  %v3419_v30 = vand.u32 4294901760, %v2563_v47 }
  0x5a   :  { %2048 = vmatprep.subr.mxu1 %v3406_v37  ;;  %2080 = vmatprep.subr.mxu0 %v3407_v51 }
  0x5b   :  { %2049 = vmatpush3.msra.mxu1 %v3406_v37  ;;  %2081 = vmatpush3.msra.mxu0 %v3407_v51 }
  0x5c   :  { %2050 = vmatprep.subr.mxu1 %v3408_v21  ;;  %2082 = vmatprep.subr.mxu0 %v3409_v25 }
  0x5d   :  { %2002 = vmatprep.mubr.f32.mxu0 %v2552_v43  ;;  %2051 = vmatpush3.msra.mxu1 %v3408_v21 }
  0x5e   :  { %2052 = vmatprep.mubr.f32.mxu1 %v3410_v22  ;;  %2083 = vmatpush3.msra.mxu0 %v3409_v25 }
  0x5f   :  { %2003 = vmatmul.mubr.f32.gmra.mxu0 %v2563_v47  ;;  %2053 = vmatmul.mubr.f32.vlgmr.msra.gmra.mxu1 %v3411_v38  ;;  %v3424_v47 = vld [vmem:[#allocation11_spill] sm:$0xff] }
  0x60   :  { %2084 = vmatprep.subr.mxu0 %v3412_v46  ;;  %2132 = vmatprep.subr.mxu1 %v2281_v3 }
  0x61   :  { %2085 = vmatpush3.msra.mxu0 %v3412_v46  ;;  %2133 = vmatpush3.msra.mxu1 %v2281_v3  ;;  %v3417_v3 = vld [vmem:[#allocation8_spill] sm:$0xff] }
  0x62   :  { %2086 = vmatprep.subr.mxu0 %v3413_v29  ;;  %2134 = vmatprep.subr.mxu1 %v2283_v4 }
  0x63   :  { %2005 = vmatprep.mubr.f32.mxu0 %v2590_v6  ;;  %2055 = vmatprep.mubr.f32.mxu1 %v3414_v13 }
  0x64   :  { %2087 = vmatpush3.msra.mxu0 %v3413_v29  ;;  %2135 = vmatpush3.msra.mxu1 %v2283_v4  ;;  %v3418_v4 = vand.u32 4294901760, %v2552_v43  ;;  %v3423_v43 = vand.u32 4294901760, %v2602_v8 }
  0x65   :  { %2006 = vmatmul.mubr.f32.gmra.mxu0 %v2602_v8  ;;  %2056 = vmatmul.mubr.f32.gmra.mxu1 %v3415_v32  ;;  %v3428_v8 = vld [vmem:[#allocation16_spill] sm:$0xff] }
  0x66   :  { %2088 = vmatprep.subr.mxu0 %v3416_v19  ;;  %2136 = vmatprep.subr.mxu1 %v2285_v5 }
  0x67   :  { %2089 = vmatpush3.msra.mxu0 %v3416_v19  ;;  %2137 = vmatpush3.msra.mxu1 %v2285_v5  ;;  %v3421_v5 = vld [vmem:[#allocation10_spill] sm:$0xff] }
  0x68   :  { %2090 = vmatprep.subr.mxu0 %v3417_v3  ;;  %2138 = vmatprep.subr.mxu1 %v2296_v9 }
  0x69   :  { %2008 = vmatprep.mubr.f32.mxu0 %v2620_v59  ;;  %2058 = vmatprep.mubr.f32.mxu1 %v3418_v4 }
  0x6a   :  { %2091 = vmatpush3.msra.mxu0 %v3417_v3  ;;  %2139 = vmatpush3.msra.mxu1 %v2296_v9  ;;  %v3422_v9 = vand.u32 4294901760, %v2590_v6  ;;  %v3427_v6 = vand.u32 4294901760, %v2631_v41 }
  0x6b   :  { %2009 = vmatmul.mubr.f32.gmra.mxu0 %v2631_v41  ;;  %2059 = vmatmul.mubr.f32.gmra.mxu1 %v3419_v30 }
  0x6c   :  { %2092 = vmatprep.subr.mxu0 %v3420_v54  ;;  %2140 = vmatprep.subr.mxu1 %v2298_v10 }
  0x6d   :  { %2093 = vmatpush3.msra.mxu0 %v3420_v54  ;;  %2141 = vmatpush3.msra.mxu1 %v2298_v10  ;;  %v3425_v10 = vld [vmem:[#allocation13_spill] sm:$0xff] }
  0x6e   :  { %2094 = vmatprep.subr.mxu0 %v3421_v5  ;;  %2142 = vmatprep.subr.mxu1 %v2300_v11 }
  0x6f   :  { %2011 = vmatprep.mubr.f32.mxu0 %v2650_v0  ;;  %2061 = vmatprep.mubr.f32.mxu1 %v3422_v9 }
  0x70   :  { %2095 = vmatpush3.msra.mxu0 %v3421_v5  ;;  %2143 = vmatpush3.msra.mxu1 %v2300_v11  ;;  %v3426_v11 = vand.u32 4294901760, %v2620_v59  ;;  %v3431_v59 = vld [vmem:[#allocation18_spill] sm:$0xff] }
  0x71   :  { %2012 = vmatmul.mubr.f32.gmra.mxu0 %v2663_v63  ;;  %2062 = vmatmul.mubr.f32.gmra.mxu1 %v3423_v43 }
  0x72   :  { %2096 = vmatprep.subr.mxu0 %v3424_v47  ;;  %2144 = vmatprep.subr.mxu1 %v2315_v16 }
  0x73   :  { %2097 = vmatpush3.msra.mxu0 %v3424_v47  ;;  %2145 = vmatpush3.msra.mxu1 %v2315_v16  ;;  %v3429_v16 = vld [vmem:[#allocation17_spill] sm:$0xff] }
  0x74   :  { %2098 = vmatprep.subr.mxu0 %v3425_v10  ;;  %2146 = vmatprep.subr.mxu1 %v2340_v24 }
  0x75   :  { %2014 = vmatprep.mubr.f32.mxu0 %v2684_v57  ;;  %2064 = vmatprep.mubr.f32.mxu1 %v3426_v11 }
  0x76   :  { %2099 = vmatpush3.msra.mxu0 %v3425_v10  ;;  %2147 = vmatpush3.msra.mxu1 %v2340_v24  ;;  %v3430_v24 = vand.u32 4294901760, %v2650_v0 }
  0x77   :  { %2015 = vmatmul.mubr.f32.gmra.mxu0 %v2697_v18  ;;  %2065 = vmatmul.mubr.f32.gmra.mxu1 %v3427_v6 }
  0x78   :  { %2100 = vmatprep.subr.mxu0 %v3428_v8  ;;  %2148 = vmatprep.subr.mxu1 %v2349_v27 }
  0x79   :  { %2101 = vmatpush3.msra.mxu0 %v3428_v8  ;;  %2149 = vmatpush3.msra.mxu1 %v2349_v27  ;;  %v3432_v27 = vld [vmem:[#allocation19_spill] sm:$0xff] }
  0x7a   :  { %2102 = vmatprep.subr.mxu0 %v3429_v16  ;;  %2150 = vmatprep.subr.mxu1 %v2368_v34 }
  0x7b   :  { %2017 = vmatprep.mubr.f32.mxu0 %v2715_v15  ;;  %2067 = vmatprep.mubr.f32.mxu1 %v3430_v24 }
  0x7c   :  { %2103 = vmatpush3.msra.mxu0 %v3429_v16  ;;  %2151 = vmatpush3.msra.mxu1 %v2368_v34 }
  0x7d   :  { %2018 = vmatmul.mubr.f32.gmra.mxu0 %v2725_v14  ;;  %2068 = vmatmul.mubr.f32.gmra.mxu1 %v277_v17 }
  0x7e   :  { %2104 = vmatprep.subr.mxu0 %v3431_v59  ;;  %2152 = vmatprep.subr.mxu1 %v2392_v45 }
  0x7f   :  { %2105 = vmatpush3.msra.mxu0 %v3431_v59  ;;  %2153 = vmatpush3.msra.mxu1 %v2392_v45 }
  0x80   :  { %2106 = vmatprep.subr.mxu0 %v3432_v27  ;;  %2154 = vmatprep.subr.mxu1 %v2401_v48 }
  0x81   :  { %2070 = vmatprep.mubr.f32.mxu1 %v287_v20  ;;  %2107 = vmatpush3.msra.mxu0 %v3432_v27 }
  0x82   :  { %2108 = vmatprep.mubr.f32.mxu0 %v2421_v56  ;;  %2155 = vmatpush3.msra.mxu1 %v2401_v48 }
  0x83   :  { %2071 = vmatmul.mubr.f32.gmra.mxu1 %v297_v26  ;;  %2109 = vmatmul.mubr.f32.vlgmr.msra.gmra.mxu0 %v2433_v61 }
  0x84   :  { %2156 = vmatprep.subr.mxu1 %v2436_v62  ;;  %2073 = vmatprep.mubr.f32.mxu1 %v307_v1 }
  0x85   :  { %2157 = vmatpush3.msra.mxu1 %v2436_v62  ;;  %2111 = vmatprep.mubr.f32.mxu0 %v2474_v35 }
  0x86   :  { %2158 = vmatprep.subr.mxu1 %v2454_v12 }
  0x87   :  { %2159 = vmatpush3.msra.mxu1 %v2454_v12  ;;  %2112 = vmatmul.mubr.f32.gmra.mxu0 %v2488_v44 }
  0x88   :  { %2074 = vmatmul.mubr.f32.gmra.mxu1 %v317_v33  ;;  %2160 = vmatprep.subr.mxu1 %v3406_v37 }
  0x89   :  { %2161 = vmatpush3.msra.mxu1 %v3406_v37  ;;  %2114 = vmatprep.mubr.f32.mxu0 %v2517_v50 }
  0x8a   :  { %2162 = vmatprep.subr.mxu1 %v3408_v21  ;;  %2164 = vmatprep.mubr.f32.mxu1 %v2421_v56 }
  0x8b   :  { %2163 = vmatpush3.msra.mxu1 %v3408_v21  ;;  %2115 = vmatmul.mubr.f32.gmra.mxu0 %v2532_v58 }
  0x8c   :  { %2165 = vmatmul.mubr.f32.vlgmr.msra.gmra.mxu1 %v2433_v61  ;;  %2117 = vmatprep.mubr.f32.mxu0 %v2565_v28 }
  0x8d   :  { %2167 = vmatprep.mubr.f32.mxu1 %v2474_v35 }
  0x8f   :  { %2118 = vmatmul.mubr.f32.gmra.mxu0 %v2578_v2 }
  0x90   :  { %2168 = vmatmul.mubr.f32.gmra.mxu1 %v2488_v44  ;;  %2120 = vmatprep.mubr.f32.mxu0 %v2604_v31 }
  0x91   :  { %2170 = vmatprep.mubr.f32.mxu1 %v2517_v50 }
  0x93   :  { %2121 = vmatmul.mubr.f32.gmra.mxu0 %v2612_v49 }
  0x94   :  { %2171 = vmatmul.mubr.f32.gmra.mxu1 %v2532_v58  ;;  %2123 = vmatprep.mubr.f32.mxu0 %v2633_v36 }
  0x95   :  { %2173 = vmatprep.mubr.f32.mxu1 %v2565_v28 }
  0x97   :  { %2124 = vmatmul.mubr.f32.gmra.mxu0 %v2640_v53 }
  0x98   :  { %2174 = vmatmul.mubr.f32.gmra.mxu1 %v2578_v2  ;;  %2126 = vmatprep.mubr.f32.mxu0 %v2665_v55 }
  0x99   :  { %2176 = vmatprep.mubr.f32.mxu1 %v2604_v31 }
  0x9b   :  { %2127 = vmatmul.mubr.f32.gmra.mxu0 %v2674_v40 }
  0x9c   :  { %2177 = vmatmul.mubr.f32.gmra.mxu1 %v2612_v49  ;;  %2129 = vmatprep.mubr.f32.mxu0 %v2699_v52 }
  0x9d   :  { %2179 = vmatprep.mubr.f32.mxu1 %v2633_v36 }
  0x9f   :  { %2130 = vmatmul.mubr.f32.gmra.mxu0 %v2708_v23 }
  0xa0   :  { %2180 = vmatmul.mubr.f32.gmra.mxu1 %v2640_v53 }
  0xa1   :  { %2182 = vmatprep.mubr.f32.mxu1 %v2665_v55 }
  0xa4   :  { %2183 = vmatmul.mubr.f32.gmra.mxu1 %v2674_v40 }
  0xa5   :  { %2185 = vmatprep.mubr.f32.mxu1 %v2699_v52 }
  0xa8   :  { %2186 = vmatmul.mubr.f32.gmra.mxu1 %v2708_v23 }
  0xe4   :  { %v1886_v28 = vpop.f32.mrf.mxu0 }
  0xe6   :  { %v2928_v34 = vpop.f32.mrf.mxu0 }
  0xea   :  { %v2930_v45 = vpop.f32.mrf.mxu0 }
  0xec   :  { %v2932_v48 = vpop.f32.mrf.mxu0 }
  0xef   :  { %v2934_v56 = vpop.f32.mrf.mxu0  ;;  %v1942_v58 = vpop.f32.mrf.mxu1 }
  0xf0   :  { %v479_v59 = vadd.f32 %v1942_v58, %v1886_v28 }
  0xf1   :  { %v2936_v61 = vpop.f32.mrf.mxu0  ;;  %v472_v62 = vpop.f32.mrf.mxu1 }
  0xf5   :  { %v2938_v2 = vpop.f32.mrf.mxu0  ;;  %v1945_v12 = vpop.f32.mrf.mxu1 }
  0xf7   :  { %v2940_v35 = vpop.f32.mrf.mxu0  ;;  %v2942_v44 = vpop.f32.mrf.mxu1 }
  0xf8   :  { %v485_v28 = vadd.f32 %v2942_v44, %v2932_v48 }
  0xfb   :  { %v2944_v23 = vpop.f32.mrf.mxu0  ;;  %v2946_v49 = vpop.f32.mrf.mxu1 }
  0xfd   :  { %v2948_v50 = vpop.f32.mrf.mxu0  ;;  %v2950_v31 = vpop.f32.mrf.mxu1 }
  0xfe   :  { %v497_v48 = vadd.f32 %v2950_v31, %v2936_v61 }
 0x101   :  { %v2952_v52 = vpop.f32.mrf.mxu0  ;;  %v2954_v41 = vpop.f32.mrf.mxu1 }
 0x103   :  { %v2956_v36 = vpop.f32.mrf.mxu0  ;;  %v2958_v17 = vpop.f32.mrf.mxu1 }
 0x107   :  { %v2960_v53 = vpop.f32.mrf.mxu0  ;;  %v2962_v57 = vpop.f32.mrf.mxu1 }
 0x109   :  { %v2964_v0 = vpop.f32.mrf.mxu0  ;;  %v2966_v63 = vpop.f32.mrf.mxu1 }
 0x10a   :  { %3433 = vst [vmem:[#allocation15_spill] sm:$0xff] %v2964_v0 }
 0x10d   :  { %v2968_v55 = vpop.f32.mrf.mxu0  ;;  %v2970_v15 = vpop.f32.mrf.mxu1 }
 0x10e   :  { %3434 = vst [vmem:[#allocation12_spill] sm:$0xff] %v2968_v55 }
 0x10f   :  { %v2972_v40 = vpop.f32.mrf.mxu0  ;;  %v2974_v18 = vpop.f32.mrf.mxu1 }
 0x110   :  { %3435 = vst [vmem:[#allocation3_spill] sm:$0xff] %v2972_v40  ;;  %v1444_v40 = vlaneseq }
 0x113   :  { %v2976_v20 = vpop.f32.mrf.mxu1  ;;  %v1998_v26 = vpop.f32.mrf.mxu0 }
 0x115   :  { %v2978_v14 = vpop.f32.mrf.mxu1  ;;  %v666_v1 = vpop.f32.mrf.mxu0 }
 0x116   :  { %3436 = vst [vmem:[#allocation14_spill] sm:$0xff] %v2978_v14 }
 0x119   :  { %v2980_v33 = vpop.f32.mrf.mxu1  ;;  %v2001_v42 = vpop.f32.mrf.mxu0 }
 0x11a   :  { %3437 = vst [vmem:[#allocation4_spill] sm:$0xff] %v2980_v33  ;;  %v674_v33 = vadd.f32 %v1998_v26, %v479_v59  ;;  %v527_v59 = vadd.f32 %v2962_v57, %v2944_v23  ;;  %v521_v23 = vadd.f32 %v2966_v63, %v2948_v50 }
 0x11b   :  { %v2982_v60 = vpop.f32.mrf.mxu1  ;;  %v680_v39 = vpop.f32.mrf.mxu0 }
 0x11c   :  { %3438 = vst [vmem:[#allocation5_spill] sm:$0xff] %v2982_v60 }
 0x11f   :  { %v2004_v7 = vpop.f32.mrf.mxu0  ;;  %v2054_v37 = vpop.f32.mrf.mxu1 }
 0x121   :  { %v694_v51 = vpop.f32.mrf.mxu0  ;;  %v860_v21 = vpop.f32.mrf.mxu1 }
 0x125   :  { %v2984_v25 = vpop.f32.mrf.mxu0  ;;  %v2057_v22 = vpop.f32.mrf.mxu1 }
 0x127   :  { %v2986_v38 = vpop.f32.mrf.mxu0  ;;  %v876_v46 = vpop.f32.mrf.mxu1 }
 0x12b   :  { %v2988_v29 = vpop.f32.mrf.mxu0  ;;  %v2060_v13 = vpop.f32.mrf.mxu1 }
 0x12c   :  { %v730_v57 = vadd.f32 %v2988_v29, %v527_v59  ;;  %v3452_v59 = vld [vmem:[#allocation12_spill] sm:$0xff] }
 0x12d   :  { %v2990_v32 = vpop.f32.mrf.mxu0  ;;  %v2992_v19 = vpop.f32.mrf.mxu1 }
 0x131   :  { %v2994_v3 = vpop.f32.mrf.mxu0  ;;  %v2996_v4 = vpop.f32.mrf.mxu1 }
 0x133   :  { %v2998_v30 = vpop.f32.mrf.mxu0  ;;  %v3000_v54 = vpop.f32.mrf.mxu1 }
 0x137   :  { %v3002_v5 = vpop.f32.mrf.mxu0  ;;  %v3004_v9 = vpop.f32.mrf.mxu1 }
 0x138   :  { %3439 = vst [vmem:[#allocation6_spill] sm:$0xff] %v3002_v5 }
 0x139   :  { %v3006_v43 = vpop.f32.mrf.mxu0  ;;  %v3008_v47 = vpop.f32.mrf.mxu1 }
 0x13a   :  { %3440 = vst [vmem:[#allocation7_spill] sm:$0xff] %v3006_v43  ;;  %v473_v43 = vadd.f32 %v472_v62, %v2928_v34  ;;  %v503_v62 = vadd.f32 %v2946_v49, %v2934_v56 }
 0x13c   :  { %v667_v14 = vadd.f32 %v666_v1, %v473_v43  ;;  %v702_v44 = vadd.f32 %v2004_v7, %v503_v62  ;;  %v509_v7 = vadd.f32 %v2958_v17, %v2940_v35 }
 0x13d   :  { %v3010_v10 = vpop.f32.mrf.mxu0  ;;  %v3012_v11 = vpop.f32.mrf.mxu1 }
 0x13e   :  { %3441 = vst [vmem:[#allocation8_spill] sm:$0xff] %v3010_v10  ;;  %3442 = vst [vmem:[#allocation9_spill] sm:$0xff] %v3012_v11  ;;  %v491_v10 = vadd.f32 %v1945_v12, %v2930_v45  ;;  %v3037_v45 = vld [vmem:[%s3341_s2] ss:$0 sm:$0xff]  ;;  %v681_v12 = vadd.f32 %v680_v39, %v485_v28  ;;  %v515_v39 = vadd.f32 %v2954_v41, %v2938_v2 }
 0x13f   :  { %v3014_v6 = vpop.f32.mrf.mxu0  ;;  %v3016_v8 = vpop.f32.mrf.mxu1 }
 0x140   :  { %3443 = vst [vmem:[#allocation10_spill] sm:$0xff] %v3014_v6  ;;  %3444 = vst [vmem:[#allocation11_spill] sm:$0xff] %v3016_v8  ;;  %v869_v6 = vadd.f32 %v2054_v37, %v674_v33  ;;  %v688_v58 = vadd.f32 %v2001_v42, %v491_v10  ;;  %v877_v42 = vadd.f32 %v876_v46, %v681_v12 }
 0x141   :  { %v716_v46 = vadd.f32 %v2984_v25, %v515_v39  ;;  %v551_v39 = vadd.f32 %v2976_v20, %v2960_v53  ;;  %v3448_v53 = vld [vmem:[#allocation15_spill] sm:$0xff]  ;;  %v3449_v20 = vld [vmem:[#allocation14_spill] sm:$0xff] }
 0x142   :  { %v885_v1 = vadd.f32 %v2057_v22, %v688_v58  ;;  %v901_v22 = vadd.f32 %v2060_v13, %v702_v44 }
 0x143   :  { %v3018_v16 = vpop.f32.mrf.mxu1  ;;  %v2110_v24 = vpop.f32.mrf.mxu0  ;;  %v917_v28 = vadd.f32 %v2996_v4, %v716_v46 }
 0x144   :  { %3445 = vst [vmem:[#allocation13_spill] sm:$0xff] %v3018_v16  ;;  %v3028_v16 = vand.u32 127, %v1444_v40  ;;  %v1106_v11 = vadd.f32 %v2110_v24, %v869_v6 }
 0x145   :  { %v3020_v27 = vpop.f32.mrf.mxu1  ;;  %v1099_v60 = vpop.f32.mrf.mxu0 }
 0x146   :  { %3446 = vst [vmem:[#allocation16_spill] sm:$0xff] %v3020_v27  ;;  %v861_v27 = vadd.f32 %v860_v21, %v667_v14  ;;  %vm1446_vm0 = vcmp.lt.s32.totalorder %v3028_v16, 4 }
 0x147   :  { %v2113_v55 = vpop.f32.mrf.mxu0  ;;  %v3451_v46 = vld [vmem:[#allocation11_spill] sm:$0xff] }
 0x148   :  { %v3023_v5 = vpop.f32.mrf.mxu1  ;;  %v1100_v40 = vadd.f32 %v1099_v60, %v861_v27  ;;  %v1118_v56 = vadd.f32 %v2113_v55, %v885_v1  ;;  %v695_v60 = vadd.f32 %v694_v51, %v497_v48  ;;  %v709_v27 = vadd.f32 %v2986_v38, %v509_v7 }
 0x149   :  { %v1111_v0 = vpop.f32.mrf.mxu0 }
 0x14a   :  { %v3026_v8 = vpop.f32.mrf.mxu1  ;;  %v893_v2 = vadd.f32 %v2992_v19, %v695_v60  ;;  %v909_v38 = vadd.f32 %v3000_v54, %v709_v27  ;;  %v3453_v27 = vld [vmem:[#allocation4_spill] sm:$0xff] }
 0x14b   :  { %v2116_v34 = vpop.f32.mrf.mxu0 }
 0x14c   :  { %v2166_v26 = vpop.f32.mrf.mxu1  ;;  %v1130_v51 = vadd.f32 %v2116_v34, %v901_v22  ;;  %v3447_v22 = vld [vmem:[#allocation9_spill] sm:$0xff] }
 0x14d   :  { %v1283_v33 = vadd.f32 %v2166_v26, %v1106_v11  ;;  %v1123_v37 = vpop.f32.mrf.mxu0  ;;  %v1112_v11 = vadd.f32 %v1111_v0, %v877_v42 }
 0x14e   :  { %v1276_v14 = vpop.f32.mrf.mxu1  ;;  %v1124_v35 = vadd.f32 %v1123_v37, %v893_v2  ;;  %v933_v37 = vadd.f32 %v3004_v9, %v730_v57 }
 0x14f   :  { %v1277_v49 = vadd.f32 %v1276_v14, %v1100_v40  ;;  %v2119_v21 = vpop.f32.mrf.mxu0  ;;  %v3043_v43 = vadd.f32 %v3037_v45, %v1283_v33  ;;  %v539_v40 = vadd.f32 %v2970_v15, %v2952_v52  ;;  %v723_v33 = vadd.f32 %v2990_v32, %v521_v23 }
 0x150   :  { %v2169_v10 = vpop.f32.mrf.mxu1  ;;  %v1142_v26 = vadd.f32 %v2119_v21, %v917_v28  ;;  %v533_v52 = vadd.f32 %v2974_v18, %v2956_v36  ;;  %v563_v28 = vadd.f32 %v3453_v27, %v3452_v59 }
 0x151   :  { %v1295_v6 = vadd.f32 %v2169_v10, %v1118_v56  ;;  %v1448_v61 = vsel %vm1446_vm0, %v3043_v43, -inf  ;;  %v1135_v31 = vpop.f32.mrf.mxu0  ;;  %v3051_v55 = vadd.f32 %v3037_v45, %v1277_v49  ;;  %v744_v15 = vadd.f32 %v2994_v3, %v539_v40 }
 0x152   :  { %v1288_v41 = vpop.f32.mrf.mxu1  ;;  %1465 = vmax.xlane.f32.xlu0 %v1448_v61  ;;  %v1136_v48 = vadd.f32 %v1135_v31, %v909_v38  ;;  %v925_v32 = vadd.f32 %v3008_v47, %v723_v33  ;;  %v737_v60 = vadd.f32 %v2998_v30, %v533_v52  ;;  %v545_v30 = vadd.f32 %v3449_v20, %v3448_v53  ;;  %v3450_v31 = vld [vmem:[#allocation6_spill] sm:$0xff]  ;;  %v3458_v33 = vld [vmem:[#allocation8_spill] sm:$0xff] }
 0x153   :  { %v1289_v0 = vadd.f32 %v1288_v41, %v1112_v11  ;;  %v2122_v13 = vpop.f32.mrf.mxu0  ;;  %v3058_v24 = vadd.f32 %v3037_v45, %v1295_v6  ;;  %v1447_v34 = vsel %vm1446_vm0, %v3051_v55, -inf  ;;  %v949_v36 = vadd.f32 %v3447_v22, %v744_v15  ;;  %v3460_v15 = vld [vmem:[#allocation10_spill] sm:$0xff] }
 0x154   :  { %v2172_v17 = vpop.f32.mrf.mxu1  ;;  %v1154_v42 = vadd.f32 %v2122_v13, %v933_v37  ;;  %v758_v7 = vadd.f32 %v3450_v31, %v551_v39  ;;  %v941_v2 = vadd.f32 %v3451_v46, %v737_v60  ;;  %v772_v37 = vadd.f32 %v3458_v33, %v563_v28 }
 0x155   :  { %v1307_v25 = vadd.f32 %v2172_v17, %v1130_v51  ;;  %v1450_v19 = vsel %vm1446_vm0, %v3058_v24, -inf  ;;  %v1147_v58 = vpop.f32.mrf.mxu0  ;;  %v3071_v62 = vadd.f32 %v3037_v45, %v1289_v0 }
 0x156   :  { %v1300_v4 = vpop.f32.mrf.mxu1  ;;  %1469 = vmax.xlane.f32.xlu1 %v1450_v19  ;;  %1463 = vmax.xlane.f32.xlu0 %v1447_v34  ;;  %v1148_v18 = vadd.f32 %v1147_v58, %v925_v32 }
 0x157   :  { %v1301_v12 = vadd.f32 %v1300_v4, %v1124_v35  ;;  %v2125_v1 = vpop.f32.mrf.mxu0  ;;  %v1449_v29 = vsel %vm1446_vm0, %v3071_v62, -inf  ;;  %v3088_v14 = vadd.f32 %v3037_v45, %v1307_v25  ;;  %v3454_v35 = vld [vmem:[#allocation7_spill] sm:$0xff]  ;;  %v3455_v25 = vld [vmem:[#allocation13_spill] sm:$0xff] }
 0x158   :  { %v2175_v44 = vpop.f32.mrf.mxu1  ;;  %v1166_v51 = vadd.f32 %v2125_v1, %v949_v36  ;;  %v751_v17 = vadd.f32 %v3454_v35, %v545_v30  ;;  %v965_v19 = vadd.f32 %v3455_v25, %v758_v7  ;;  %v3457_v1 = vld [vmem:[#allocation5_spill] sm:$0xff] }
 0x159   :  { %v1319_v50 = vadd.f32 %v2175_v44, %v1142_v26  ;;  %v1159_v63 = vpop.f32.mrf.mxu0  ;;  %v3085_v54 = vadd.f32 %v3037_v45, %v1301_v12  ;;  %v1452_v11 = vsel %vm1446_vm0, %v3088_v14, -inf  ;;  %v3456_v12 = vld [vmem:[#allocation3_spill] sm:$0xff] }
 0x15a   :  { %v1312_v9 = vpop.f32.mrf.mxu1  ;;  %1467 = vmax.xlane.f32.xlu1 %v1449_v29  ;;  %v1160_v58 = vadd.f32 %v1159_v63, %v941_v2  ;;  %v557_v40 = vadd.f32 %v3457_v1, %v3456_v12 }
 0x15b   :  { %v1313_v56 = vadd.f32 %v1312_v9, %v1136_v48  ;;  %v2128_v49 = vpop.f32.mrf.mxu0  ;;  %v1451_v21 = vsel %vm1446_vm0, %v3085_v54, -inf  ;;  %v3108_v61 = vadd.f32 %v3037_v45, %v1319_v50  ;;  %v3459_v48 = vld [vmem:[#allocation16_spill] sm:$0xff]  ;;  %v981_v9 = vadd.f32 %v3023_v5, %v772_v37 }
 0x15c   :  { %v2178_v3 = vpop.f32.mrf.mxu1  ;;  %1471 = vmax.xlane.f32.xlu0 %v1451_v21  ;;  %v957_v44 = vadd.f32 %v3459_v48, %v751_v17  ;;  %v1178_v63 = vadd.f32 %v2128_v49, %v965_v19  ;;  %v765_v32 = vadd.f32 %v3460_v15, %v557_v40 }
 0x15d   :  { %v1331_v47 = vadd.f32 %v2178_v3, %v1154_v42  ;;  %v1171_v10 = vpop.f32.mrf.mxu0  ;;  %v3105_v6 = vadd.f32 %v3037_v45, %v1313_v56  ;;  %v1454_v38 = vsel %vm1446_vm0, %v3108_v61, -inf }
 0x15e   :  { %v1324_v41 = vpop.f32.mrf.mxu1  ;;  %1473 = vmax.xlane.f32.xlu1 %v1452_v11  ;;  %v1172_v42 = vadd.f32 %v1171_v10, %v957_v44  ;;  %v973_v36 = vadd.f32 %v3026_v8, %v765_v32 }
 0x15f   :  { %v1325_v0 = vadd.f32 %v1324_v41, %v1148_v18  ;;  %v1453_v13 = vsel %vm1446_vm0, %v3105_v6, -inf  ;;  %v2131_v23 = vpop.f32.mrf.mxu0  ;;  %v3128_v26 = vadd.f32 %v3037_v45, %v1331_v47 }
 0x160   :  { %v2181_v34 = vpop.f32.mrf.mxu1  ;;  %1475 = vmax.xlane.f32.xlu0 %v1453_v13  ;;  %v1190_v5 = vadd.f32 %v2131_v23, %v981_v9 }
 0x161   :  { %v1343_v57 = vadd.f32 %v2181_v34, %v1166_v51  ;;  %v3125_v4 = vadd.f32 %v3037_v45, %v1325_v0  ;;  %v1183_v21 = vpop.f32.mrf.mxu0  ;;  %v1456_v60 = vsel %vm1446_vm0, %v3128_v26, -inf }
 0x162   :  { %v1336_v50 = vpop.f32.mrf.mxu1  ;;  %1477 = vmax.xlane.f32.xlu1 %v1454_v38  ;;  %v1184_v10 = vadd.f32 %v1183_v21, %v973_v36 }
 0x163   :  { %v1337_v29 = vadd.f32 %v1336_v50, %v1160_v58  ;;  %v1455_v52 = vsel %vm1446_vm0, %v3125_v4, -inf  ;;  %v3146_v22 = vadd.f32 %v3037_v45, %v1343_v57 }
 0x164   :  { %v2184_v56 = vpop.f32.mrf.mxu1  ;;  %1479 = vmax.xlane.f32.xlu0 %v1455_v52 }
 0x165   :  { %v1355_v39 = vadd.f32 %v2184_v56, %v1178_v63  ;;  %v3143_v49 = vadd.f32 %v3037_v45, %v1337_v29  ;;  %v1458_v20 = vsel %vm1446_vm0, %v3146_v22, -inf }
 0x166   :  { %v1348_v18 = vpop.f32.mrf.mxu1  ;;  %1481 = vmax.xlane.f32.xlu1 %v1456_v60 }
 0x167   :  { %v1349_v3 = vadd.f32 %v1348_v18, %v1172_v42  ;;  %v1457_v47 = vsel %vm1446_vm0, %v3143_v49, -inf  ;;  %v3159_v8 = vadd.f32 %v3037_v45, %v1355_v39 }
 0x168   :  { %v2187_v11 = vpop.f32.mrf.mxu1  ;;  %1483 = vmax.xlane.f32.xlu0 %v1457_v47 }
 0x169   :  { %v1367_v53 = vadd.f32 %v2187_v11, %v1190_v5  ;;  %v3156_v30 = vadd.f32 %v3037_v45, %v1349_v3  ;;  %v1460_v2 = vsel %vm1446_vm0, %v3159_v8, -inf }
 0x16a   :  { %v1360_v31 = vpop.f32.mrf.mxu1  ;;  %1485 = vmax.xlane.f32.xlu1 %v1458_v20 }
 0x16b   :  { %v1361_v7 = vadd.f32 %v1360_v31, %v1184_v10  ;;  %v1459_v46 = vsel %vm1446_vm0, %v3156_v30, -inf  ;;  %v3171_v51 = vadd.f32 %v3037_v45, %v1367_v53 }
 0x16c   :  { %1487 = vmax.xlane.f32.xlu0 %v1459_v46 }
 0x16d   :  { %v3168_v41 = vadd.f32 %v3037_v45, %v1361_v7  ;;  %v1462_v13 = vsel %vm1446_vm0, %v3171_v51, -inf }
 0x16e   :  { %1489 = vmax.xlane.f32.xlu1 %v1460_v2 }
 0x16f   :  { %v1461_v0 = vsel %vm1446_vm0, %v3168_v41, -inf }
 0x170   :  { %1491 = vmax.xlane.f32.xlu0 %v1461_v0 }
 0x172   :  { %1493 = vmax.xlane.f32.xlu1 %v1462_v13 }
 0x1db   :  { %v1466_v59 = vpop.xlane.xlu0 %1465 }
 0x1dc   :  { %v3180_v27 = vsub.f32 %v3043_v43, %v1466_v59 }
 0x1de   :  { %v1513_v28 = vmul.f32 1.442695, %v3180_v27 }
 0x1df   :  { %v1470_v35 = vpop.xlane.xlu1 %1469  ;;  %v1464_v45 = vpop.xlane.xlu0 %1463 }
 0x1e0   :  { %2188 = vpow2.f32 %v1513_v28  ;;  %v3184_v17 = vsub.f32 %v3058_v24, %v1470_v35  ;;  %v3187_v25 = vsub.f32 %v3051_v55, %v1464_v45 }
 0x1e2   :  { %v1517_v19 = vmul.f32 1.442695, %v3184_v17  ;;  %v1511_v58 = vmul.f32 1.442695, %v3187_v25 }
 0x1e3   :  { %v1468_v34 = vpop.xlane.xlu1 %1467 }
 0x1e4   :  { %2190 = vpow2.f32 %v1517_v19  ;;  %v3192_v43 = vsub.f32 %v3071_v62, %v1468_v34 }
 0x1e5   :  { %2192 = vpow2.f32 %v1511_v58  ;;  %v1472_v23 = vpop.xlane.xlu0 %1471 }
 0x1e6   :  { %v1515_v57 = vmul.f32 1.442695, %v3192_v43  ;;  %v3196_v38 = vsub.f32 %v3085_v54, %v1472_v23 }
 0x1e7   :  { %v1474_v24 = vpop.xlane.xlu1 %1473 }
 0x1e8   :  { %2194 = vpow2.f32 %v1515_v57  ;;  %v1519_v55 = vmul.f32 1.442695, %v3196_v38  ;;  %v3200_v12 = vsub.f32 %v3088_v14, %v1474_v24 }
 0x1e9   :  { %v1476_v1 = vpop.xlane.xlu0 %1475 }
 0x1ea   :  { %v1521_v40 = vmul.f32 1.442695, %v3200_v12  ;;  %v3204_v62 = vsub.f32 %v3105_v6, %v1476_v1  ;;  %2196 = vpow2.f32 %v1519_v55 }
 0x1eb   :  { %v1478_v33 = vpop.xlane.xlu1 %1477 }
 0x1ec   :  { %2198 = vpow2.f32 %v1521_v40  ;;  %v1523_v37 = vmul.f32 1.442695, %v3204_v62  ;;  %v3208_v54 = vsub.f32 %v3108_v61, %v1478_v33 }
 0x1ed   :  { %v2189_v48 = vpop.eup %2188  ;;  %v1480_v44 = vpop.xlane.xlu0 %1479 }
 0x1ee   :  { %v1525_v50 = vmul.f32 1.442695, %v3208_v54  ;;  %v3212_v14 = vsub.f32 %v3125_v4, %v1480_v44  ;;  %v1544_v63 = vsel %vm1446_vm0, %v2189_v48, 0.0  ;;  %2200 = vpow2.f32 %v1523_v37 }
 0x1ef   :  { %1561 = vadd.xlane.f32.xlu1 %v1544_v63  ;;  %v1482_v6 = vpop.xlane.xlu1 %1481 }
 0x1f0   :  { %2202 = vpow2.f32 %v1525_v50  ;;  %v1527_v29 = vmul.f32 1.442695, %v3212_v14  ;;  %v3218_v52 = vsub.f32 %v3128_v26, %v1482_v6 }
 0x1f1   :  { %v2191_v61 = vpop.eup %2190  ;;  %v1484_v15 = vpop.xlane.xlu0 %1483 }
 0x1f2   :  { %v2193_v32 = vpop.eup %2192  ;;  %v1529_v9 = vmul.f32 1.442695, %v3218_v52  ;;  %v3222_v4 = vsub.f32 %v3143_v49, %v1484_v15  ;;  %v1546_v42 = vsel %vm1446_vm0, %v2191_v61, 0.0  ;;  %2204 = vpow2.f32 %v1527_v29 }
 0x1f3   :  { %1565 = vadd.xlane.f32.xlu1 %v1546_v42  ;;  %v1486_v56 = vpop.xlane.xlu1 %1485  ;;  %v1543_v21 = vsel %vm1446_vm0, %v2193_v32, 0.0 }
 0x1f4   :  { %2206 = vpow2.f32 %v1529_v9  ;;  %v1531_v26 = vmul.f32 1.442695, %v3222_v4  ;;  %v3230_v39 = vsub.f32 %v3146_v22, %v1486_v56  ;;  %1559 = vadd.xlane.f32.xlu0 %v1543_v21 }
 0x1f5   :  { %v2195_v60 = vpop.eup %2194  ;;  %v1488_v36 = vpop.xlane.xlu0 %1487 }
 0x1f6   :  { %v1533_v49 = vmul.f32 1.442695, %v3230_v39  ;;  %v3234_v18 = vsub.f32 %v3156_v30, %v1488_v36  ;;  %v1545_v5 = vsel %vm1446_vm0, %v2195_v60, 0.0  ;;  %2208 = vpow2.f32 %v1531_v26 }
 0x1f7   :  { %v1490_v3 = vpop.xlane.xlu1 %1489  ;;  %v2197_v47 = vpop.eup %2196 }
 0x1f8   :  { %2210 = vpow2.f32 %v1533_v49  ;;  %v1535_v10 = vmul.f32 1.442695, %v3234_v18  ;;  %v3240_v22 = vsub.f32 %v3159_v8, %v1490_v3  ;;  %1563 = vadd.xlane.f32.xlu0 %v1545_v5  ;;  %v1547_v46 = vsel %vm1446_vm0, %v2197_v47, 0.0 }
 0x1f9   :  { %v2199_v11 = vpop.eup %2198  ;;  %v1492_v53 = vpop.xlane.xlu0 %1491 }
 0x1fa   :  { %v1537_v20 = vmul.f32 1.442695, %v3240_v22  ;;  %v3244_v30 = vsub.f32 %v3168_v41, %v1492_v53  ;;  %v1548_v31 = vsel %vm1446_vm0, %v2199_v11, 0.0  ;;  %2212 = vpow2.f32 %v1535_v10 }
 0x1fb   :  { %1569 = vadd.xlane.f32.xlu1 %v1548_v31  ;;  %v1494_v7 = vpop.xlane.xlu1 %1493  ;;  %v2201_v2 = vpop.eup %2200 }
 0x1fc   :  { %2214 = vpow2.f32 %v1537_v20  ;;  %v1539_v8 = vmul.f32 1.442695, %v3244_v30  ;;  %v3252_v0 = vsub.f32 %v3171_v51, %v1494_v7  ;;  %1567 = vadd.xlane.f32.xlu0 %v1547_v46  ;;  %v1549_v28 = vsel %vm1446_vm0, %v2201_v2, 0.0 }
 0x1fd   :  { %v2203_v13 = vpop.eup %2202 }
 0x1fe   :  { %v1541_v41 = vmul.f32 1.442695, %v3252_v0  ;;  %v1550_v59 = vsel %vm1446_vm0, %v2203_v13, 0.0  ;;  %2216 = vpow2.f32 %v1539_v8 }
 0x1ff   :  { %1573 = vadd.xlane.f32.xlu1 %v1550_v59  ;;  %v2205_v35 = vpop.eup %2204 }
 0x200   :  { %2218 = vpow2.f32 %v1541_v41  ;;  %1571 = vadd.xlane.f32.xlu0 %v1549_v28  ;;  %v1551_v19 = vsel %vm1446_vm0, %v2205_v35, 0.0 }
 0x201   :  { %v2207_v45 = vpop.eup %2206 }
 0x202   :  { %v1552_v51 = vsel %vm1446_vm0, %v2207_v45, 0.0 }
 0x203   :  { %1577 = vadd.xlane.f32.xlu1 %v1552_v51  ;;  %v2209_v58 = vpop.eup %2208 }
 0x204   :  { %1575 = vadd.xlane.f32.xlu0 %v1551_v19  ;;  %v1553_v57 = vsel %vm1446_vm0, %v2209_v58, 0.0 }
 0x205   :  { %v2211_v34 = vpop.eup %2210 }
 0x206   :  { %v1554_v23 = vsel %vm1446_vm0, %v2211_v34, 0.0 }
 0x207   :  { %1581 = vadd.xlane.f32.xlu1 %v1554_v23  ;;  %v2213_v24 = vpop.eup %2212 }
 0x208   :  { %1579 = vadd.xlane.f32.xlu0 %v1553_v57  ;;  %v1555_v40 = vsel %vm1446_vm0, %v2213_v24, 0.0 }
 0x209   :  { %v2215_v55 = vpop.eup %2214 }
 0x20a   :  { %v1556_v1 = vsel %vm1446_vm0, %v2215_v55, 0.0 }
 0x20b   :  { %1585 = vadd.xlane.f32.xlu1 %v1556_v1  ;;  %v2217_v33 = vpop.eup %2216 }
 0x20c   :  { %1583 = vadd.xlane.f32.xlu0 %v1555_v40  ;;  %v1557_v44 = vsel %vm1446_vm0, %v2217_v33, 0.0 }
 0x20d   :  { %v2219_v37 = vpop.eup %2218 }
 0x20e   :  { %v1558_v48 = vsel %vm1446_vm0, %v2219_v37, 0.0 }
 0x20f   :  { %1589 = vadd.xlane.f32.xlu1 %v1558_v48 }
 0x210   :  { %1587 = vadd.xlane.f32.xlu0 %v1557_v44 }
 0x278   :  { %v1562_v50 = vpop.xlane.xlu1 %1561 }
 0x279   :  { %2220 = vlog2.f32 %v1562_v50 }
 0x27c   :  { %v1566_v63 = vpop.xlane.xlu1 %1565 }
 0x27d   :  { %2222 = vlog2.f32 %v1566_v63  ;;  %v1560_v6 = vpop.xlane.xlu0 %1559 }
 0x27e   :  { %2224 = vlog2.f32 %v1560_v6 }
 0x281   :  { %v1564_v29 = vpop.xlane.xlu0 %1563 }
 0x282   :  { %2226 = vlog2.f32 %v1564_v29 }
 0x284   :  { %v1570_v61 = vpop.xlane.xlu1 %1569 }
 0x285   :  { %2228 = vlog2.f32 %v1570_v61  ;;  %v1568_v15 = vpop.xlane.xlu0 %1567 }
 0x286   :  { %v2221_v32 = vpop.eup %2220  ;;  %2230 = vlog2.f32 %v1568_v15 }
 0x287   :  { %v1594_v9 = vmul.f32 0.6931472, %v2221_v32 }
 0x288   :  { %v1574_v42 = vpop.xlane.xlu1 %1573 }
 0x289   :  { %v1624_v56 = vsub.f32 %v3180_v27, %v1594_v9  ;;  %2232 = vlog2.f32 %v1574_v42  ;;  %v1572_v16 = vpop.xlane.xlu0 %1571 }
 0x28a   :  { %v2223_v21 = vpop.eup %2222  ;;  %2234 = vlog2.f32 %v1572_v16 }
 0x28b   :  { %v2225_v26 = vpop.eup %2224  ;;  %1640 = vst [vmem:[%s3342_s3 + $0x8] sm:$0xff] %v1624_v56  ;;  %v1598_v60 = vmul.f32 0.6931472, %v2223_v21 }
 0x28c   :  { %v1592_v36 = vmul.f32 0.6931472, %v2225_v26  ;;  %v1578_v49 = vpop.xlane.xlu1 %1577 }
 0x28d   :  { %v1626_v5 = vsub.f32 %v3184_v17, %v1598_v60  ;;  %2236 = vlog2.f32 %v1578_v49  ;;  %v1576_v3 = vpop.xlane.xlu0 %1575 }
 0x28e   :  { %v1623_v47 = vsub.f32 %v3187_v25, %v1592_v36  ;;  %2238 = vlog2.f32 %v1576_v3 }
 0x28f   :  { %v2227_v27 = vpop.eup %2226  ;;  %1642 = vst [vmem:[%s3342_s3 + $0x18] sm:$0xff] %v1626_v5 }
 0x290   :  { %1639 = vst [vmem:[%s3342_s3] sm:$0xff] %v1623_v47  ;;  %v1596_v10 = vmul.f32 0.6931472, %v2227_v27  ;;  %v1582_v11 = vpop.xlane.xlu1 %1581 }
 0x291   :  { %2240 = vlog2.f32 %v1582_v11  ;;  %v1580_v53 = vpop.xlane.xlu0 %1579 }
 0x292   :  { %v2229_v20 = vpop.eup %2228  ;;  %v1625_v17 = vsub.f32 %v3192_v43, %v1596_v10  ;;  %2242 = vlog2.f32 %v1580_v53 }
 0x293   :  { %v2231_v31 = vpop.eup %2230  ;;  %v1602_v25 = vmul.f32 0.6931472, %v2229_v20 }
 0x294   :  { %1641 = vst [vmem:[%s3342_s3 + $0x10] sm:$0xff] %v1625_v17  ;;  %v1600_v7 = vmul.f32 0.6931472, %v2231_v31  ;;  %v1586_v46 = vpop.xlane.xlu1 %1585 }
 0x295   :  { %v1628_v2 = vsub.f32 %v3200_v12, %v1602_v25  ;;  %2244 = vlog2.f32 %v1586_v46  ;;  %v1584_v8 = vpop.xlane.xlu0 %1583 }
 0x296   :  { %v2233_v13 = vpop.eup %2232  ;;  %v1627_v41 = vsub.f32 %v3196_v38, %v1600_v7  ;;  %2246 = vlog2.f32 %v1584_v8 }
 0x297   :  { %v2235_v59 = vpop.eup %2234  ;;  %1644 = vst [vmem:[%s3342_s3 + $0x28] sm:$0xff] %v1628_v2  ;;  %v1606_v43 = vmul.f32 0.6931472, %v2233_v13 }
 0x298   :  { %1643 = vst [vmem:[%s3342_s3 + $0x20] sm:$0xff] %v1627_v41  ;;  %v1604_v28 = vmul.f32 0.6931472, %v2235_v59  ;;  %v1590_v35 = vpop.xlane.xlu1 %1589 }
 0x299   :  { %v1630_v12 = vsub.f32 %v3208_v54, %v1606_v43  ;;  %2248 = vlog2.f32 %v1590_v35  ;;  %v1588_v45 = vpop.xlane.xlu0 %1587 }
 0x29a   :  { %v2237_v51 = vpop.eup %2236  ;;  %v1629_v38 = vsub.f32 %v3204_v62, %v1604_v28  ;;  %2250 = vlog2.f32 %v1588_v45 }
 0x29b   :  { %v2239_v19 = vpop.eup %2238  ;;  %1646 = vst [vmem:[%s3342_s3 + $0x38] sm:$0xff] %v1630_v12  ;;  %v1610_v58 = vmul.f32 0.6931472, %v2237_v51 }
 0x29c   :  { %1645 = vst [vmem:[%s3342_s3 + $0x30] sm:$0xff] %v1629_v38  ;;  %v1608_v34 = vmul.f32 0.6931472, %v2239_v19 }
 0x29d   :  { %v1632_v23 = vsub.f32 %v3218_v52, %v1610_v58 }
 0x29e   :  { %v2241_v54 = vpop.eup %2240  ;;  %v1631_v57 = vsub.f32 %v3212_v14, %v1608_v34 }
 0x29f   :  { %v2243_v24 = vpop.eup %2242  ;;  %1648 = vst [vmem:[%s3342_s3 + $0x48] sm:$0xff] %v1632_v23  ;;  %v1614_v62 = vmul.f32 0.6931472, %v2241_v54 }
 0x2a0   :  { %1647 = vst [vmem:[%s3342_s3 + $0x40] sm:$0xff] %v1631_v57  ;;  %v1612_v55 = vmul.f32 0.6931472, %v2243_v24 }
 0x2a1   :  { %v1634_v1 = vsub.f32 %v3230_v39, %v1614_v62 }
 0x2a2   :  { %v2245_v40 = vpop.eup %2244  ;;  %v1633_v33 = vsub.f32 %v3222_v4, %v1612_v55 }
 0x2a3   :  { %v2247_v52 = vpop.eup %2246  ;;  %1650 = vst [vmem:[%s3342_s3 + $0x58] sm:$0xff] %v1634_v1  ;;  %v1618_v14 = vmul.f32 0.6931472, %v2245_v40 }
 0x2a4   :  { %1649 = vst [vmem:[%s3342_s3 + $0x50] sm:$0xff] %v1633_v33  ;;  %v1616_v37 = vmul.f32 0.6931472, %v2247_v52 }
 0x2a5   :  { %v1636_v48 = vsub.f32 %v3240_v22, %v1618_v14 }
 0x2a6   :  { %v2249_v44 = vpop.eup %2248  ;;  %v1635_v50 = vsub.f32 %v3234_v18, %v1616_v37 }
 0x2a7   :  { %v2251_v39 = vpop.eup %2250  ;;  %1652 = vst [vmem:[%s3342_s3 + $0x68] sm:$0xff] %v1636_v48  ;;  %v1622_v4 = vmul.f32 0.6931472, %v2249_v44 }
 0x2a8   :  { %1651 = vst [vmem:[%s3342_s3 + $0x60] sm:$0xff] %v1635_v50  ;;  %v1620_v63 = vmul.f32 0.6931472, %v2251_v39 }
 0x2a9   :  { %v1638_v6 = vsub.f32 %v3252_v0, %v1622_v4 }
 0x2aa   :  { %v1637_v29 = vsub.f32 %v3244_v30, %v1620_v63 }
 0x2ab   :  { %1654 = vst [vmem:[%s3342_s3 + $0x78] sm:$0xff] %v1638_v6 }
 0x2ac   :  { %1653 = vst [vmem:[%s3342_s3 + $0x70] sm:$0xff] %v1637_v29 }

// kernel: hain_forward_prepared.4
= control target key start
LH: loop header
LB: loop body
LE: loop exit
PB: predicated region body
PF: predicated region fallthrough
CT: control target
= control target key end

     0   :  { %s5448_s0 = inlined_call_operand.vmem [shape: f32[128,128], index: 0, kind: input, shape index: {}]   ;;  %s5449_s1 = inlined_call_operand.vmem [shape: f32[128,128], index: 1, kind: input, shape index: {}]   ;;  %s5450_s2 = inlined_call_operand.vmem [shape: f32[128,128], index: 2, kind: input, shape index: {}]   ;;  %s5451_s3 = inlined_call_operand.vmem [shape: f32[128,128], index: 3, kind: output, shape index: {}]  }
   0x1   :  { %v50_v0 = vld [vmem:[%s5448_s0] sm:$0xff]  ;;  %v51_v1 = vld [vmem:[%s5448_s0 + $0x8] sm:$0xff]  ;;  %v52_v2 = vld [vmem:[%s5448_s0 + $0x10] sm:$0xff] }
   0x2   :  { %84 = vxpose.xlu0.b32.start [1/16] %v50_v0, 128  ;;  %v83_v3 = vld [vmem:[%s5449_s1 + $0x78] sm:$0xff]  ;;  %v82_v4 = vld [vmem:[%s5449_s1 + $0x70] sm:$0xff]  ;;  %v81_v7 = vld [vmem:[%s5449_s1 + $0x68] sm:$0xff] }
   0x3   :  { %v3866_v5 = vand.u32 4294901760, %v83_v3  ;;  %v3868_v6 = vand.u32 4294901760, %v82_v4  ;;  %v80_v8 = vld [vmem:[%s5449_s1 + $0x60] sm:$0xff]  ;;  %v79_v9 = vld [vmem:[%s5449_s1 + $0x58] sm:$0xff]  ;;  %v3879_v10 = vand.u32 4294901760, %v81_v7  ;;  %v78_v13 = vld [vmem:[%s5449_s1 + $0x50] sm:$0xff] }
   0x4   :  { %v3881_v11 = vand.u32 4294901760, %v80_v8  ;;  %v3883_v12 = vand.u32 4294901760, %v79_v9  ;;  %v77_v14 = vld [vmem:[%s5449_s1 + $0x48] sm:$0xff]  ;;  %v76_v15 = vld [vmem:[%s5449_s1 + $0x40] sm:$0xff]  ;;  %v3901_v18 = vand.u32 4294901760, %v78_v13  ;;  %v53_v24 = vld [vmem:[%s5448_s0 + $0x18] sm:$0xff] }
   0x5   :  { %v3895_v16 = vsub.f32 %v83_v3, %v3866_v5  ;;  %v3898_v17 = vsub.f32 %v82_v4, %v3868_v6  ;;  %3159 = vmatprep.subr.mxu0 %v3866_v5  ;;  %v3903_v19 = vand.u32 4294901760, %v77_v14  ;;  %v3906_v20 = vsub.f32 %v81_v7, %v3879_v10  ;;  %v75_v37 = vld [vmem:[%s5449_s1 + $0x38] sm:$0xff]  ;;  %v74_v38 = vld [vmem:[%s5449_s1 + $0x30] sm:$0xff]  ;;  %v54_v39 = vld [vmem:[%s5448_s0 + $0x20] sm:$0xff] }
   0x6   :  { %85 = vxpose.xlu0.b32.cont [2/16] %v51_v1, 128  ;;  %v3909_v21 = vsub.f32 %v80_v8, %v3881_v11  ;;  %v3912_v22 = vsub.f32 %v79_v9, %v3883_v12  ;;  %3160 = vmatpush3.msra.mxu0 %v3866_v5  ;;  %v3915_v23 = vand.u32 4294901760, %v76_v15  ;;  %v3928_v27 = vsub.f32 %v78_v13, %v3901_v18  ;;  %v73_v43 = vld [vmem:[%s5449_s1 + $0x28] sm:$0xff]  ;;  %v72_v45 = vld [vmem:[%s5449_s1 + $0x20] sm:$0xff]  ;;  %v71_v53 = vld [vmem:[%s5449_s1 + $0x18] sm:$0xff] }
   0x7   :  { %v3921_v25 = vand.u32 4294901760, %v3895_v16  ;;  %v3924_v26 = vand.u32 4294901760, %v3898_v17  ;;  %3161 = vmatprep.subr.mxu0 %v3868_v6  ;;  %v3931_v28 = vand.u32 4294901760, %v3906_v20  ;;  %v3938_v30 = vsub.f32 %v77_v14, %v3903_v19  ;;  %v55_v54 = vld [vmem:[%s5448_s0 + $0x28] sm:$0xff]  ;;  %v70_v60 = vld [vmem:[%s5449_s1 + $0x10] sm:$0xff]  ;;  %v68_v14 = vld [vmem:[%s5449_s1] sm:$0xff] }
   0x8   :  { %v3934_v29 = vand.u32 4294901760, %v3909_v21  ;;  %3162 = vmatpush3.msra.mxu0 %v3868_v6  ;;  %v3945_v33 = vand.u32 4294901760, %v3912_v22  ;;  %v3951_v35 = vand.u32 4294901760, %v3928_v27  ;;  %v3955_v36 = vsub.f32 %v76_v15, %v3915_v23  ;;  %v56_v3 = vld [vmem:[%s5448_s0 + $0x30] sm:$0xff] }
   0x9   :  { %v361_v31 = vsub.f32 %v3895_v16, %v3921_v25  ;;  %v368_v32 = vsub.f32 %v3898_v17, %v3924_v26  ;;  %3163 = vmatprep.subr.mxu0 %v3879_v10  ;;  %v375_v34 = vsub.f32 %v3906_v20, %v3931_v28  ;;  %v3973_v44 = vand.u32 4294901760, %v3938_v30 }
   0xa   :  { %86 = vxpose.xlu0.b32.cont [3/16] %v52_v2, 128  ;;  %3164 = vmatpush3.msra.mxu0 %v3879_v10  ;;  %v382_v42 = vsub.f32 %v3909_v21, %v3934_v29  ;;  %v389_v47 = vsub.f32 %v3912_v22, %v3945_v33  ;;  %v3982_v48 = vand.u32 4294901760, %v75_v37  ;;  %v3984_v49 = vand.u32 4294901760, %v74_v38  ;;  %v69_v2 = vld [vmem:[%s5449_s1 + $0x8] sm:$0xff] }
   0xb   :  { %v362_v40 = vand.u32 4294901760, %v361_v31  ;;  %v369_v41 = vand.u32 4294901760, %v368_v32  ;;  %3165 = vmatprep.subr.mxu0 %v3881_v11  ;;  %v376_v46 = vand.u32 4294901760, %v375_v34  ;;  %v396_v50 = vsub.f32 %v3928_v27, %v3951_v35 }
   0xc   :  { %3166 = vmatpush3.msra.mxu0 %v3881_v11  ;;  %v3989_v51 = vand.u32 4294901760, %v3955_v36  ;;  %v3991_v52 = vand.u32 4294901760, %v73_v43  ;;  %v383_v55 = vand.u32 4294901760, %v382_v42  ;;  %v4000_v56 = vsub.f32 %v75_v37, %v3982_v48  ;;  %v57_v37 = vld [vmem:[%s5448_s0 + $0x38] sm:$0xff] }
   0xd   :  { %3215 = vmatprep.subr.mxu1 %v362_v40  ;;  %3167 = vmatprep.subr.mxu0 %v3883_v12  ;;  %v4004_v57 = vsub.f32 %v74_v38, %v3984_v49  ;;  %v4006_v58 = vand.u32 4294901760, %v72_v45  ;;  %v403_v59 = vsub.f32 %v3938_v30, %v3973_v44  ;;  %v390_v61 = vand.u32 4294901760, %v389_v47  ;;  %v58_v47 = vld [vmem:[%s5448_s0 + $0x40] sm:$0xff] }
   0xe   :  { %87 = vxpose.xlu0.b32.cont [4/16] %v53_v24, 128  ;;  %3216 = vmatpush3.msra.mxu1 %v362_v40  ;;  %v4015_v62 = vand.u32 4294901760, %v4000_v56  ;;  %v4019_v63 = vsub.f32 %v73_v43, %v3991_v52  ;;  %v4021_v0 = vand.u32 4294901760, %v71_v53  ;;  %v410_v1 = vsub.f32 %v3955_v36, %v3989_v51 }
   0xf   :  { %3217 = vmatprep.subr.mxu1 %v369_v41  ;;  %3168 = vmatpush3.msra.mxu0 %v3883_v12  ;;  %v397_v4 = vand.u32 4294901760, %v396_v50  ;;  %v4032_v7 = vand.u32 4294901760, %v4004_v57  ;;  %v4036_v8 = vsub.f32 %v72_v45, %v4006_v58  ;;  %v4038_v9 = vand.u32 4294901760, %v70_v60 }
  0x10   :  { %3218 = vmatpush3.msra.mxu1 %v369_v41  ;;  %3169 = vmatprep.subr.mxu0 %v3901_v18  ;;  %v404_v13 = vand.u32 4294901760, %v403_v59  ;;  %v417_v15 = vsub.f32 %v4000_v56, %v4015_v62  ;;  %v4047_v24 = vand.u32 4294901760, %v4019_v63  ;;  %v4051_v31 = vsub.f32 %v71_v53, %v4021_v0 }
  0x11   :  { %3219 = vmatprep.subr.mxu1 %v376_v46  ;;  %3170 = vmatpush3.msra.mxu0 %v3901_v18  ;;  %v4053_v32 = vand.u32 4294901760, %v69_v2  ;;  %v411_v34 = vand.u32 4294901760, %v410_v1  ;;  %v424_v38 = vsub.f32 %v4004_v57, %v4032_v7  ;;  %v4065_v40 = vsub.f32 %v70_v60, %v4038_v9  ;;  %v59_v1 = vld [vmem:[%s5448_s0 + $0x48] sm:$0xff] }
  0x12   :  { %88 = vxpose.xlu0.b32.cont [5/16] %v54_v39, 128  ;;  %3220 = vmatpush3.msra.mxu1 %v376_v46  ;;  %v4061_v39 = vand.u32 4294901760, %v4036_v8  ;;  %v4067_v41 = vand.u32 4294901760, %v68_v14  ;;  %v418_v42 = vand.u32 4294901760, %v417_v15  ;;  %v431_v43 = vsub.f32 %v4019_v63, %v4047_v24  ;;  %v60_v15 = vld [vmem:[%s5448_s0 + $0x50] sm:$0xff] }
  0x13   :  { %3221 = vmatprep.subr.mxu1 %v383_v55  ;;  %3171 = vmatprep.subr.mxu0 %v3903_v19  ;;  %v4073_v45 = vand.u32 4294901760, %v4051_v31  ;;  %v4077_v46 = vsub.f32 %v69_v2, %v4053_v32  ;;  %v425_v50 = vand.u32 4294901760, %v424_v38 }
  0x14   :  { %3222 = vmatpush3.msra.mxu1 %v383_v55  ;;  %3172 = vmatpush3.msra.mxu0 %v3903_v19  ;;  %v438_v53 = vsub.f32 %v4036_v8, %v4061_v39  ;;  %v4089_v55 = vsub.f32 %v68_v14, %v4067_v41  ;;  %v432_v59 = vand.u32 4294901760, %v431_v43 }
  0x15   :  { %3223 = vmatprep.subr.mxu1 %v390_v61  ;;  %3173 = vmatprep.subr.mxu0 %v3915_v23  ;;  %v445_v60 = vsub.f32 %v4051_v31, %v4073_v45 }
  0x16   :  { %89 = vxpose.xlu0.b32.cont [6/16] %v55_v54, 128  ;;  %3224 = vmatpush3.msra.mxu1 %v390_v61  ;;  %v4086_v54 = vand.u32 4294901760, %v4065_v40  ;;  %v4096_v61 = vand.u32 4294901760, %v4077_v46  ;;  %v439_v2 = vand.u32 4294901760, %v438_v53  ;;  %v64_v53 = vld [vmem:[%s5448_s0 + $0x70] sm:$0xff] }
  0x17   :  { %3225 = vmatprep.subr.mxu1 %v397_v4  ;;  %3174 = vmatpush3.msra.mxu0 %v3915_v23 }
  0x18   :  { %3226 = vmatpush3.msra.mxu1 %v397_v4  ;;  %3175 = vmatprep.subr.mxu0 %v3982_v48  ;;  %v4105_v4 = vand.u32 4294901760, %v4089_v55  ;;  %v459_v14 = vsub.f32 %v4077_v46, %v4096_v61 }
  0x19   :  { %3227 = vmatprep.subr.mxu1 %v404_v13  ;;  %3176 = vmatpush3.msra.mxu0 %v3982_v48 }
  0x1a   :  { %90 = vxpose.xlu0.b32.cont [7/16] %v56_v3, 128  ;;  %3228 = vmatpush3.msra.mxu1 %v404_v13  ;;  %v452_v3 = vsub.f32 %v4065_v40, %v4086_v54  ;;  %v446_v13 = vand.u32 4294901760, %v445_v60  ;;  %v460_v38 = vand.u32 4294901760, %v459_v14 }
  0x1b   :  { %3229 = vmatprep.subr.mxu1 %v411_v34  ;;  %3177 = vmatprep.subr.mxu0 %v3984_v49 }
  0x1c   :  { %3230 = vmatpush3.msra.mxu1 %v411_v34  ;;  %3178 = vmatpush3.msra.mxu0 %v3984_v49  ;;  %v453_v34 = vand.u32 4294901760, %v452_v3 }
  0x1d   :  { %3231 = vmatprep.subr.mxu1 %v418_v42  ;;  %3179 = vmatprep.subr.mxu0 %v3991_v52 }
  0x1e   :  { %91 = vxpose.xlu0.b32.cont [8/16] %v57_v37, 128  ;;  %3232 = vmatpush3.msra.mxu1 %v418_v42  ;;  %v466_v37 = vsub.f32 %v4089_v55, %v4105_v4  ;;  %v61_v42 = vld [vmem:[%s5448_s0 + $0x58] sm:$0xff] }
  0x1f   :  { %3233 = vmatprep.subr.mxu1 %v425_v50  ;;  %3180 = vmatpush3.msra.mxu0 %v3991_v52 }
  0x20   :  { %3234 = vmatpush3.msra.mxu1 %v425_v50  ;;  %3181 = vmatprep.subr.mxu0 %v4006_v58  ;;  %v467_v43 = vand.u32 4294901760, %v466_v37  ;;  %v63_v50 = vld [vmem:[%s5448_s0 + $0x68] sm:$0xff] }
  0x21   :  { %3235 = vmatprep.subr.mxu1 %v432_v59  ;;  %3182 = vmatpush3.msra.mxu0 %v4006_v58 }
  0x22   :  { %92 = vxpose.xlu0.b32.cont [9/16] %v58_v47, 128  ;;  %3236 = vmatpush3.msra.mxu1 %v432_v59  ;;  %v62_v47 = vld [vmem:[%s5448_s0 + $0x60] sm:$0xff]  ;;  %v65_v59 = vld [vmem:[%s5448_s0 + $0x78] sm:$0xff] }
  0x23   :  { %3237 = vmatprep.subr.mxu1 %v439_v2  ;;  %3183 = vmatprep.subr.mxu0 %v4021_v0 }
  0x24   :  { %3238 = vmatpush3.msra.mxu1 %v439_v2  ;;  %3184 = vmatpush3.msra.mxu0 %v4021_v0 }
  0x25   :  { %3239 = vmatprep.subr.mxu1 %v446_v13  ;;  %3185 = vmatprep.subr.mxu0 %v4038_v9 }
  0x26   :  { %93 = vxpose.xlu0.b32.cont [10/16] %v59_v1, 128  ;;  %3240 = vmatpush3.msra.mxu1 %v446_v13 }
  0x27   :  { %3241 = vmatprep.subr.mxu1 %v453_v34  ;;  %3186 = vmatpush3.msra.mxu0 %v4038_v9 }
  0x28   :  { %3242 = vmatpush3.msra.mxu1 %v453_v34  ;;  %3187 = vmatprep.subr.mxu0 %v4053_v32 }
  0x29   :  { %3243 = vmatprep.subr.mxu1 %v460_v38  ;;  %3188 = vmatpush3.msra.mxu0 %v4053_v32 }
  0x2a   :  { %94 = vxpose.xlu0.b32.cont [11/16] %v60_v15, 128  ;;  %3244 = vmatpush3.msra.mxu1 %v460_v38 }
  0x2b   :  { %3245 = vmatprep.subr.mxu1 %v467_v43  ;;  %3189 = vmatprep.subr.mxu0 %v4067_v41 }
  0x2c   :  { %3246 = vmatpush3.msra.mxu1 %v467_v43  ;;  %3190 = vmatpush3.msra.mxu0 %v4067_v41 }
  0x2d   :  { %3327 = vmatprep.subr.mxu1 %v3866_v5  ;;  %3271 = vmatprep.subr.mxu0 %v3895_v16 }
  0x2e   :  { %95 = vxpose.xlu0.b32.cont [12/16] %v61_v42, 128 }
  0x32   :  { %96 = vxpose.xlu0.b32.cont [13/16] %v62_v47, 128 }
  0x36   :  { %97 = vxpose.xlu0.b32.cont [14/16] %v63_v50, 128 }
  0x3a   :  { %98 = vxpose.xlu0.b32.cont [15/16] %v64_v53, 128 }
  0x3e   :  { %99 = vxpose.xlu0.b32.end [16/16] %v65_v59, 128 }
  0x7e   :  { %v100_v60 = vpop.trf.xlu0 }
  0x7f   :  { %v4141_v1 = vand.u32 4294901760, %v100_v60 }
  0x81   :  { %v4144_v2 = vsub.f32 %v100_v60, %v4141_v1  ;;  %3247 = vmatprep.mubr.f32.mxu1 %v4141_v1 }
  0x82   :  { %v101_v3 = vpop.trf.xlu0 }
  0x83   :  { %v4147_v13 = vand.u32 4294901760, %v101_v3  ;;  %v5453_v14 = vand.u32 4294901760, %v4144_v2 }
  0x85   :  { %v4151_v15 = vsub.f32 %v101_v3, %v4147_v13  ;;  %3248 = vmatmul.mubr.f32.vlgmr.msra.gmra.mxu1 %v4147_v13  ;;  %v200_v34 = vsub.f32 %v4144_v2, %v5453_v14 }
  0x86   :  { %v102_v37 = vpop.trf.xlu0  ;;  %3328 = vmatpush3.msra.mxu1 %v3866_v5 }
  0x87   :  { %v5452_v38 = vand.u32 4294901760, %v4151_v15  ;;  %v4159_v42 = vand.u32 4294901760, %v102_v37  ;;  %v201_v43 = vand.u32 4294901760, %v200_v34  ;;  %3329 = vmatprep.subr.mxu1 %v3868_v6 }
  0x88   :  { %3330 = vmatpush3.msra.mxu1 %v3868_v6 }
  0x89   :  { %v4164_v47 = vsub.f32 %v102_v37, %v4159_v42  ;;  %3191 = vmatprep.mubr.f32.mxu0 %v201_v43  ;;  %3250 = vmatprep.mubr.f32.mxu1 %v4159_v42  ;;  %v210_v50 = vsub.f32 %v4151_v15, %v5452_v38 }
  0x8a   :  { %v103_v53 = vpop.trf.xlu0  ;;  %3331 = vmatprep.subr.mxu1 %v3879_v10 }
  0x8b   :  { %v5454_v59 = vand.u32 4294901760, %v4164_v47  ;;  %v4172_v60 = vand.u32 4294901760, %v103_v53  ;;  %v211_v3 = vand.u32 4294901760, %v210_v50  ;;  %3332 = vmatpush3.msra.mxu1 %v3879_v10 }
  0x8c   :  { %3333 = vmatprep.subr.mxu1 %v3881_v11 }
  0x8d   :  { %v4177_v34 = vsub.f32 %v103_v53, %v4172_v60  ;;  %3192 = vmatmul.mubr.f32.vlgmr.msra.gmra.mxu0 %v211_v3  ;;  %3251 = vmatmul.mubr.f32.gmra.mxu1 %v4172_v60  ;;  %v220_v37 = vsub.f32 %v4164_v47, %v5454_v59 }
  0x8e   :  { %v104_v43 = vpop.trf.xlu0  ;;  %3334 = vmatpush3.msra.mxu1 %v3881_v11  ;;  %3272 = vmatpush3.msra.mxu0 %v3895_v16 }
  0x8f   :  { %v5455_v50 = vand.u32 4294901760, %v4177_v34  ;;  %v4186_v38 = vand.u32 4294901760, %v104_v43  ;;  %v221_v14 = vand.u32 4294901760, %v220_v37  ;;  %3335 = vmatprep.subr.mxu1 %v3883_v12  ;;  %3273 = vmatprep.subr.mxu0 %v3898_v17 }
  0x90   :  { %3336 = vmatpush3.msra.mxu1 %v3883_v12  ;;  %3274 = vmatpush3.msra.mxu0 %v3898_v17 }
  0x91   :  { %5578 = vst [vmem:[#allocation3_spill] sm:$0xff] %v4186_v38  ;;  %v4193_v53 = vsub.f32 %v104_v43, %v4186_v38  ;;  %3194 = vmatprep.mubr.f32.mxu0 %v221_v14  ;;  %3253 = vmatprep.mubr.f32.mxu1 %v4186_v38  ;;  %v230_v16 = vsub.f32 %v4177_v34, %v5455_v50 }
  0x92   :  { %v105_v3 = vpop.trf.xlu0  ;;  %3337 = vmatprep.subr.mxu1 %v3901_v18  ;;  %3275 = vmatprep.subr.mxu0 %v3906_v20 }
  0x93   :  { %v5458_v37 = vand.u32 4294901760, %v4193_v53  ;;  %v4202_v59 = vand.u32 4294901760, %v105_v3  ;;  %v231_v17 = vand.u32 4294901760, %v230_v16  ;;  %3338 = vmatpush3.msra.mxu1 %v3901_v18  ;;  %3276 = vmatpush3.msra.mxu0 %v3906_v20 }
  0x94   :  { %3339 = vmatprep.subr.mxu1 %v3903_v19  ;;  %3277 = vmatprep.subr.mxu0 %v3909_v21 }
  0x95   :  { %v4209_v14 = vsub.f32 %v105_v3, %v4202_v59  ;;  %3195 = vmatmul.mubr.f32.gmra.mxu0 %v231_v17  ;;  %3254 = vmatmul.mubr.f32.gmra.mxu1 %v4202_v59  ;;  %v240_v43 = vsub.f32 %v4193_v53, %v5458_v37 }
  0x96   :  { %v106_v50 = vpop.trf.xlu0  ;;  %3340 = vmatpush3.msra.mxu1 %v3903_v19  ;;  %3278 = vmatpush3.msra.mxu0 %v3909_v21 }
  0x97   :  { %v5459_v20 = vand.u32 4294901760, %v4209_v14  ;;  %v4218_v16 = vand.u32 4294901760, %v106_v50  ;;  %v241_v38 = vand.u32 4294901760, %v240_v43  ;;  %3341 = vmatprep.subr.mxu1 %v3915_v23  ;;  %3279 = vmatprep.subr.mxu0 %v3912_v22 }
  0x98   :  { %3342 = vmatpush3.msra.mxu1 %v3915_v23  ;;  %3280 = vmatpush3.msra.mxu0 %v3912_v22 }
  0x99   :  { %5579 = vst [vmem:[#allocation4_spill] sm:$0xff] %v4218_v16  ;;  %v4225_v3 = vsub.f32 %v106_v50, %v4218_v16  ;;  %3197 = vmatprep.mubr.f32.mxu0 %v241_v38  ;;  %3256 = vmatprep.mubr.f32.mxu1 %v4218_v16  ;;  %v250_v21 = vsub.f32 %v4209_v14, %v5459_v20 }
  0x9a   :  { %v107_v17 = vpop.trf.xlu0  ;;  %3343 = vmatprep.subr.mxu1 %v3982_v48  ;;  %3281 = vmatprep.subr.mxu0 %v3928_v27 }
  0x9b   :  { %v5462_v43 = vand.u32 4294901760, %v4225_v3  ;;  %v4234_v37 = vand.u32 4294901760, %v107_v17  ;;  %v251_v22 = vand.u32 4294901760, %v250_v21  ;;  %3344 = vmatpush3.msra.mxu1 %v3982_v48  ;;  %3282 = vmatpush3.msra.mxu0 %v3928_v27 }
  0x9c   :  { %3345 = vmatprep.subr.mxu1 %v3984_v49  ;;  %3283 = vmatprep.subr.mxu0 %v3938_v30 }
  0x9d   :  { %v4241_v38 = vsub.f32 %v107_v17, %v4234_v37  ;;  %3198 = vmatmul.mubr.f32.gmra.mxu0 %v251_v22  ;;  %3257 = vmatmul.mubr.f32.gmra.mxu1 %v4234_v37  ;;  %v260_v50 = vsub.f32 %v4225_v3, %v5462_v43 }
  0x9e   :  { %v108_v20 = vpop.trf.xlu0  ;;  %3346 = vmatpush3.msra.mxu1 %v3984_v49  ;;  %3284 = vmatpush3.msra.mxu0 %v3938_v30 }
  0x9f   :  { %v5463_v27 = vand.u32 4294901760, %v4241_v38  ;;  %v4250_v21 = vand.u32 4294901760, %v108_v20  ;;  %v261_v16 = vand.u32 4294901760, %v260_v50  ;;  %3347 = vmatprep.subr.mxu1 %v3991_v52  ;;  %3285 = vmatprep.subr.mxu0 %v3955_v36 }
  0xa0   :  { %3348 = vmatpush3.msra.mxu1 %v3991_v52  ;;  %3286 = vmatpush3.msra.mxu0 %v3955_v36 }
  0xa1   :  { %5580 = vst [vmem:[#allocation5_spill] sm:$0xff] %v4250_v21  ;;  %v4257_v17 = vsub.f32 %v108_v20, %v4250_v21  ;;  %3200 = vmatprep.mubr.f32.mxu0 %v261_v16  ;;  %3259 = vmatprep.mubr.f32.mxu1 %v4250_v21  ;;  %v270_v30 = vsub.f32 %v4241_v38, %v5463_v27 }
  0xa2   :  { %v109_v22 = vpop.trf.xlu0  ;;  %3349 = vmatprep.subr.mxu1 %v4006_v58  ;;  %3287 = vmatprep.subr.mxu0 %v4000_v56 }
  0xa3   :  { %v5466_v50 = vand.u32 4294901760, %v4257_v17  ;;  %v4266_v43 = vand.u32 4294901760, %v109_v22  ;;  %v271_v36 = vand.u32 4294901760, %v270_v30  ;;  %3350 = vmatpush3.msra.mxu1 %v4006_v58  ;;  %3288 = vmatpush3.msra.mxu0 %v4000_v56 }
  0xa4   :  { %3351 = vmatprep.subr.mxu1 %v4021_v0  ;;  %3289 = vmatprep.subr.mxu0 %v4004_v57 }
  0xa5   :  { %5581 = vst [vmem:[#allocation6_spill] sm:$0xff] %v4266_v43  ;;  %v4273_v20 = vsub.f32 %v109_v22, %v4266_v43  ;;  %3201 = vmatmul.mubr.f32.gmra.mxu0 %v271_v36  ;;  %3260 = vmatmul.mubr.f32.gmra.mxu1 %v4266_v43  ;;  %v280_v16 = vsub.f32 %v4257_v17, %v5466_v50  ;;  %v5588_v43 = vand.u32 4294901760, %v4151_v15 }
  0xa6   :  { %v110_v27 = vpop.trf.xlu0  ;;  %3352 = vmatpush3.msra.mxu1 %v4021_v0  ;;  %3290 = vmatpush3.msra.mxu0 %v4004_v57 }
  0xa7   :  { %v5467_v56 = vand.u32 4294901760, %v4273_v20  ;;  %v4282_v30 = vand.u32 4294901760, %v110_v27  ;;  %v281_v21 = vand.u32 4294901760, %v280_v16  ;;  %3353 = vmatprep.subr.mxu1 %v4038_v9  ;;  %3291 = vmatprep.subr.mxu0 %v4019_v63 }
  0xa8   :  { %3354 = vmatpush3.msra.mxu1 %v4038_v9  ;;  %3292 = vmatpush3.msra.mxu0 %v4019_v63 }
  0xa9   :  { %5582 = vst [vmem:[#allocation7_spill] sm:$0xff] %v4282_v30  ;;  %v4289_v22 = vsub.f32 %v110_v27, %v4282_v30  ;;  %3203 = vmatprep.mubr.f32.mxu0 %v281_v21  ;;  %3262 = vmatprep.mubr.f32.mxu1 %v4282_v30  ;;  %v290_v57 = vsub.f32 %v4273_v20, %v5467_v56 }
  0xaa   :  { %v111_v36 = vpop.trf.xlu0  ;;  %3355 = vmatprep.subr.mxu1 %v4053_v32  ;;  %3293 = vmatprep.subr.mxu0 %v4036_v8 }
  0xab   :  { %v5470_v16 = vand.u32 4294901760, %v4289_v22  ;;  %v4298_v50 = vand.u32 4294901760, %v111_v36  ;;  %v291_v63 = vand.u32 4294901760, %v290_v57  ;;  %3356 = vmatpush3.msra.mxu1 %v4053_v32  ;;  %3294 = vmatpush3.msra.mxu0 %v4036_v8 }
  0xac   :  { %3357 = vmatprep.subr.mxu1 %v4067_v41  ;;  %3295 = vmatprep.subr.mxu0 %v4051_v31 }
  0xad   :  { %5583 = vst [vmem:[#allocation8_spill] sm:$0xff] %v4298_v50  ;;  %v4305_v27 = vsub.f32 %v111_v36, %v4298_v50  ;;  %3204 = vmatmul.mubr.f32.gmra.mxu0 %v291_v63  ;;  %3263 = vmatmul.mubr.f32.gmra.mxu1 %v4298_v50  ;;  %v300_v21 = vsub.f32 %v4289_v22, %v5470_v16 }
  0xae   :  { %v112_v56 = vpop.trf.xlu0  ;;  %3358 = vmatpush3.msra.mxu1 %v4067_v41  ;;  %3296 = vmatpush3.msra.mxu0 %v4051_v31 }
  0xaf   :  { %v5473_v8 = vand.u32 4294901760, %v4305_v27  ;;  %v4314_v57 = vand.u32 4294901760, %v112_v56  ;;  %v301_v30 = vand.u32 4294901760, %v300_v21  ;;  %3439 = vmatprep.subr.mxu1 %v3866_v5  ;;  %3297 = vmatprep.subr.mxu0 %v4065_v40 }
  0xb0   :  { %3298 = vmatpush3.msra.mxu0 %v4065_v40 }
  0xb1   :  { %5584 = vst [vmem:[#allocation9_spill] sm:$0xff] %v4314_v57  ;;  %v4320_v36 = vsub.f32 %v112_v56, %v4314_v57  ;;  %3206 = vmatprep.mubr.f32.mxu0 %v301_v30  ;;  %3265 = vmatprep.mubr.f32.mxu1 %v4314_v57  ;;  %v310_v31 = vsub.f32 %v4305_v27, %v5473_v8 }
  0xb2   :  { %v113_v63 = vpop.trf.xlu0  ;;  %3299 = vmatprep.subr.mxu0 %v4077_v46 }
  0xb3   :  { %v5474_v21 = vand.u32 4294901760, %v4320_v36  ;;  %v4328_v16 = vand.u32 4294901760, %v113_v63  ;;  %v311_v50 = vand.u32 4294901760, %v310_v31  ;;  %3300 = vmatpush3.msra.mxu0 %v4077_v46 }
  0xb4   :  { %3301 = vmatprep.subr.mxu0 %v4089_v55 }
  0xb5   :  { %5585 = vst [vmem:[#allocation10_spill] sm:$0xff] %v4328_v16  ;;  %v4333_v40 = vsub.f32 %v113_v63, %v4328_v16  ;;  %3207 = vmatmul.mubr.f32.gmra.mxu0 %v311_v50  ;;  %3266 = vmatmul.mubr.f32.gmra.mxu1 %v4328_v16  ;;  %v320_v56 = vsub.f32 %v4320_v36, %v5474_v21 }
  0xb6   :  { %v114_v30 = vpop.trf.xlu0  ;;  %3302 = vmatpush3.msra.mxu0 %v4089_v55 }
  0xb7   :  { %v5479_v8 = vand.u32 4294901760, %v4333_v40  ;;  %v4341_v31 = vand.u32 4294901760, %v114_v30  ;;  %v321_v46 = vand.u32 4294901760, %v320_v56  ;;  %3383 = vmatprep.subr.mxu0 %v3921_v25 }
  0xb9   :  { %5586 = vst [vmem:[#allocation11_spill] sm:$0xff] %v4341_v31  ;;  %v4345_v63 = vsub.f32 %v114_v30, %v4341_v31  ;;  %3209 = vmatprep.mubr.f32.mxu0 %v321_v46  ;;  %3268 = vmatprep.mubr.f32.mxu1 %v4341_v31  ;;  %v330_v50 = vsub.f32 %v4333_v40, %v5479_v8  ;;  %v5587_v46 = vand.u32 4294901760, %v4144_v2 }
  0xba   :  { %v115_v21 = vpop.trf.xlu0 }
  0xbb   :  { %v339_v55 = vand.u32 4294901760, %v4345_v63  ;;  %v4352_v16 = vand.u32 4294901760, %v115_v21  ;;  %v331_v57 = vand.u32 4294901760, %v330_v50 }
  0xbd   :  { %v4355_v56 = vsub.f32 %v115_v21, %v4352_v16  ;;  %3210 = vmatmul.mubr.f32.gmra.mxu0 %v331_v57  ;;  %3269 = vmatmul.mubr.f32.gmra.mxu1 %v4352_v16  ;;  %v340_v30 = vsub.f32 %v4345_v63, %v339_v55  ;;  %v5589_v21 = vand.u32 4294901760, %v4164_v47 }
  0xbe   :  { %3359 = vmatprep.mubr.f32.mxu1 %v5587_v46 }
  0xbf   :  { %v349_v8 = vand.u32 4294901760, %v4355_v56  ;;  %v341_v31 = vand.u32 4294901760, %v340_v30 }
  0xc1   :  { %3212 = vmatprep.mubr.f32.mxu0 %v341_v31  ;;  %3360 = vmatmul.mubr.f32.vlgmr.msra.gmra.mxu1 %v5588_v43  ;;  %v350_v57 = vsub.f32 %v4355_v56, %v349_v8  ;;  %v5590_v31 = vand.u32 4294901760, %v4177_v34  ;;  %v5591_v43 = vand.u32 4294901760, %v4193_v53 }
  0xc2   :  { %3362 = vmatprep.mubr.f32.mxu1 %v5589_v21  ;;  %3440 = vmatpush3.msra.mxu1 %v3866_v5  ;;  %v5592_v5 = vand.u32 4294901760, %v4209_v14 }
  0xc3   :  { %3441 = vmatprep.subr.mxu1 %v3868_v6  ;;  %v351_v50 = vand.u32 4294901760, %v350_v57 }
  0xc4   :  { %3442 = vmatpush3.msra.mxu1 %v3868_v6  ;;  %v5593_v6 = vand.u32 4294901760, %v4225_v3 }
  0xc5   :  { %3213 = vmatmul.mubr.f32.gmra.mxu0 %v351_v50  ;;  %3363 = vmatmul.mubr.f32.gmra.mxu1 %v5590_v31  ;;  %v1459_v31 = vld [vmem:[%s5450_s2 + $0x30] sm:$0xff] }
  0xc6   :  { %3443 = vmatprep.subr.mxu1 %v3879_v10  ;;  %3303 = vmatprep.mubr.f32.mxu0 %v4144_v2 }
  0xc7   :  { %3365 = vmatprep.mubr.f32.mxu1 %v5591_v43  ;;  %3444 = vmatpush3.msra.mxu1 %v3879_v10  ;;  %v5594_v10 = vand.u32 4294901760, %v4241_v38 }
  0xc8   :  { %3445 = vmatprep.subr.mxu1 %v3881_v11 }
  0xc9   :  { %3446 = vmatpush3.msra.mxu1 %v3881_v11  ;;  %3304 = vmatmul.mubr.f32.vlgmr.msra.gmra.mxu0 %v4151_v15  ;;  %v5595_v11 = vand.u32 4294901760, %v4257_v17 }
  0xca   :  { %3366 = vmatmul.mubr.f32.gmra.mxu1 %v5592_v5  ;;  %3384 = vmatpush3.msra.mxu0 %v3921_v25  ;;  %v5600_v25 = vand.u32 4294901760, %v4333_v40 }
  0xcb   :  { %3447 = vmatprep.subr.mxu1 %v3883_v12  ;;  %3306 = vmatprep.mubr.f32.mxu0 %v4164_v47 }
  0xcc   :  { %3368 = vmatprep.mubr.f32.mxu1 %v5593_v6  ;;  %3385 = vmatprep.subr.mxu0 %v3924_v26 }
  0xcd   :  { %3448 = vmatpush3.msra.mxu1 %v3883_v12  ;;  %3386 = vmatpush3.msra.mxu0 %v3924_v26  ;;  %v5596_v12 = vand.u32 4294901760, %v4273_v20  ;;  %v5601_v26 = vld [vmem:[#allocation3_spill] sm:$0xff] }
  0xce   :  { %3449 = vmatprep.subr.mxu1 %v3901_v18  ;;  %3387 = vmatprep.subr.mxu0 %v3931_v28 }
  0xcf   :  { %3450 = vmatpush3.msra.mxu1 %v3901_v18  ;;  %3307 = vmatmul.mubr.f32.gmra.mxu0 %v4177_v34  ;;  %v5597_v18 = vand.u32 4294901760, %v4289_v22 }
  0xd0   :  { %3369 = vmatmul.mubr.f32.gmra.mxu1 %v5594_v10  ;;  %3388 = vmatpush3.msra.mxu0 %v3931_v28  ;;  %v5602_v28 = vld [vmem:[#allocation4_spill] sm:$0xff] }
  0xd1   :  { %3451 = vmatprep.subr.mxu1 %v3903_v19  ;;  %3309 = vmatprep.mubr.f32.mxu0 %v4193_v53 }
  0xd2   :  { %3371 = vmatprep.mubr.f32.mxu1 %v5595_v11  ;;  %3389 = vmatprep.subr.mxu0 %v3934_v29  ;;  %v4636_v11 = vand.u32 4294901760, %v1459_v31 }
  0xd3   :  { %3452 = vmatpush3.msra.mxu1 %v3903_v19  ;;  %3390 = vmatpush3.msra.mxu0 %v3934_v29  ;;  %v5598_v19 = vand.u32 4294901760, %v4305_v27  ;;  %v5603_v29 = vld [vmem:[#allocation5_spill] sm:$0xff] }
  0xd4   :  { %3453 = vmatprep.subr.mxu1 %v3915_v23  ;;  %3391 = vmatprep.subr.mxu0 %v3945_v33  ;;  %5632 = vst [vmem:[#allocation25_spill] sm:$0xff] %v4636_v11 }
  0xd5   :  { %3454 = vmatpush3.msra.mxu1 %v3915_v23  ;;  %3310 = vmatmul.mubr.f32.gmra.mxu0 %v4209_v14  ;;  %v5599_v23 = vand.u32 4294901760, %v4320_v36 }
  0xd6   :  { %3372 = vmatmul.mubr.f32.gmra.mxu1 %v5596_v12  ;;  %3392 = vmatpush3.msra.mxu0 %v3945_v33  ;;  %v5604_v33 = vld [vmem:[#allocation6_spill] sm:$0xff]  ;;  %v1458_v12 = vld [vmem:[%s5450_s2 + $0x28] sm:$0xff] }
  0xd7   :  { %3455 = vmatprep.subr.mxu1 %v3982_v48  ;;  %3312 = vmatprep.mubr.f32.mxu0 %v4225_v3  ;;  %v1462_v3 = vld [vmem:[%s5450_s2 + $0x48] sm:$0xff] }
  0xd8   :  { %3374 = vmatprep.mubr.f32.mxu1 %v5597_v18  ;;  %3393 = vmatprep.subr.mxu0 %v3951_v35 }
  0xd9   :  { %3456 = vmatpush3.msra.mxu1 %v3982_v48  ;;  %3394 = vmatpush3.msra.mxu0 %v3951_v35  ;;  %v5605_v35 = vld [vmem:[#allocation7_spill] sm:$0xff]  ;;  %v5607_v48 = vld [vmem:[#allocation9_spill] sm:$0xff] }
  0xda   :  { %3457 = vmatprep.subr.mxu1 %v3984_v49  ;;  %3395 = vmatprep.subr.mxu0 %v3973_v44 }
  0xdb   :  { %3458 = vmatpush3.msra.mxu1 %v3984_v49  ;;  %3313 = vmatmul.mubr.f32.gmra.mxu0 %v4241_v38  ;;  %v5608_v49 = vld [vmem:[#allocation10_spill] sm:$0xff] }
  0xdc   :  { %3375 = vmatmul.mubr.f32.gmra.mxu1 %v5598_v19  ;;  %3396 = vmatpush3.msra.mxu0 %v3973_v44  ;;  %v5606_v44 = vld [vmem:[#allocation8_spill] sm:$0xff] }
  0xdd   :  { %3459 = vmatprep.subr.mxu1 %v3991_v52  ;;  %3315 = vmatprep.mubr.f32.mxu0 %v4257_v17 }
  0xde   :  { %3377 = vmatprep.mubr.f32.mxu1 %v5599_v23  ;;  %3397 = vmatprep.subr.mxu0 %v3989_v51 }
  0xdf   :  { %3460 = vmatpush3.msra.mxu1 %v3991_v52  ;;  %3398 = vmatpush3.msra.mxu0 %v3989_v51  ;;  %v5609_v51 = vld [vmem:[#allocation11_spill] sm:$0xff]  ;;  %v1468_v52 = vld [vmem:[%s5450_s2 + $0x78] sm:$0xff] }
  0xe0   :  { %3461 = vmatprep.subr.mxu1 %v4006_v58  ;;  %3399 = vmatprep.subr.mxu0 %v4015_v62 }
  0xe1   :  { %3462 = vmatpush3.msra.mxu1 %v4006_v58  ;;  %3316 = vmatmul.mubr.f32.gmra.mxu0 %v4273_v20  ;;  %v4510_v58 = vand.u32 4294901760, %v1468_v52 }
  0xe2   :  { %3378 = vmatmul.mubr.f32.gmra.mxu1 %v5600_v25  ;;  %3400 = vmatpush3.msra.mxu0 %v4015_v62  ;;  %v1467_v62 = vld [vmem:[%s5450_s2 + $0x70] sm:$0xff]  ;;  %v4647_v25 = vand.u32 4294901760, %v1458_v12 }
  0xe3   :  { %3463 = vmatprep.subr.mxu1 %v4021_v0  ;;  %3318 = vmatprep.mubr.f32.mxu0 %v4289_v22  ;;  %v4587_v22 = vand.u32 4294901760, %v1462_v3 }
  0xe4   :  { %3380 = vmatprep.mubr.f32.mxu1 %v339_v55  ;;  %3401 = vmatprep.subr.mxu0 %v4032_v7  ;;  %5634 = vst [vmem:[#allocation27_spill] sm:$0xff] %v4647_v25 }
  0xe5   :  { %3464 = vmatpush3.msra.mxu1 %v4021_v0  ;;  %3402 = vmatpush3.msra.mxu0 %v4032_v7  ;;  %v4516_v0 = vsub.f32 %v1468_v52, %v4510_v58  ;;  %v4518_v7 = vand.u32 4294901760, %v1467_v62  ;;  %5622 = vst [vmem:[#allocation15_spill] sm:$0xff] %v4587_v22 }
  0xe6   :  { %3465 = vmatprep.subr.mxu1 %v4038_v9  ;;  %3403 = vmatprep.subr.mxu0 %v4047_v24 }
  0xe7   :  { %3466 = vmatpush3.msra.mxu1 %v4038_v9  ;;  %3319 = vmatmul.mubr.f32.gmra.mxu0 %v4305_v27  ;;  %5610 = vst [vmem:[#allocation3_spill] sm:$0xff] %v4516_v0  ;;  %v1466_v9 = vld [vmem:[%s5450_s2 + $0x68] sm:$0xff]  ;;  %v1461_v27 = vld [vmem:[%s5450_s2 + $0x40] sm:$0xff] }
  0xe8   :  { %3381 = vmatmul.mubr.f32.gmra.mxu1 %v349_v8  ;;  %3404 = vmatpush3.msra.mxu0 %v4047_v24  ;;  %v4526_v24 = vand.u32 4294901760, %v4516_v0 }
  0xe9   :  { %3467 = vmatprep.subr.mxu1 %v4053_v32  ;;  %3321 = vmatprep.mubr.f32.mxu0 %v4320_v36 }
  0xea   :  { %3405 = vmatprep.subr.mxu0 %v4061_v39  ;;  %3468 = vmatpush3.msra.mxu1 %v4053_v32  ;;  %5611 = vst [vmem:[#allocation4_spill] sm:$0xff] %v4526_v24  ;;  %v4529_v32 = vsub.f32 %v1467_v62, %v4518_v7 }
  0xeb   :  { %3471 = vmatprep.mubr.f32.mxu1 %v4141_v1  ;;  %3406 = vmatpush3.msra.mxu0 %v4061_v39  ;;  %v4531_v39 = vand.u32 4294901760, %v1466_v9 }
  0xec   :  { %3469 = vmatprep.subr.mxu1 %v4067_v41  ;;  %3407 = vmatprep.subr.mxu0 %v4073_v45  ;;  %5612 = vst [vmem:[#allocation5_spill] sm:$0xff] %v4529_v32 }
  0xed   :  { %3470 = vmatpush3.msra.mxu1 %v4067_v41  ;;  %3322 = vmatmul.mubr.f32.gmra.mxu0 %v4333_v40  ;;  %v1465_v41 = vld [vmem:[%s5450_s2 + $0x60] sm:$0xff]  ;;  %v4601_v40 = vsub.f32 %v1462_v3, %v4587_v22 }
  0xee   :  { %3408 = vmatpush3.msra.mxu0 %v4073_v45  ;;  %3472 = vmatmul.mubr.f32.vlgmr.msra.gmra.mxu1 %v4147_v13  ;;  %v1714_v45 = vsub.f32 %v4516_v0, %v4526_v24 }
  0xef   :  { %3324 = vmatprep.mubr.f32.mxu0 %v4345_v63  ;;  %3409 = vmatprep.subr.mxu0 %v4086_v54  ;;  %5625 = vst [vmem:[#allocation18_spill] sm:$0xff] %v4601_v40  ;;  %v4603_v63 = vand.u32 4294901760, %v1461_v27  ;;  %v4615_v46 = vand.u32 4294901760, %v4601_v40 }
  0xf0   :  { %3474 = vmatprep.mubr.f32.mxu1 %v4159_v42  ;;  %3410 = vmatpush3.msra.mxu0 %v4086_v54  ;;  %v4541_v54 = vand.u32 4294901760, %v4529_v32  ;;  %v1715_v2 = vand.u32 4294901760, %v1714_v45  ;;  %v1455_v45 = vld [vmem:[%s5450_s2 + $0x10] sm:$0xff] }
  0xf1   :  { %3411 = vmatprep.subr.mxu0 %v4096_v61  ;;  %3325 = vmatmul.mubr.f32.gmra.mxu0 %v4355_v56  ;;  %5626 = vst [vmem:[#allocation19_spill] sm:$0xff] %v4603_v63  ;;  %v1460_v56 = vld [vmem:[%s5450_s2 + $0x38] sm:$0xff]  ;;  %5627 = vst [vmem:[#allocation20_spill] sm:$0xff] %v4615_v46  ;;  %v4618_v57 = vsub.f32 %v1461_v27, %v4603_v63  ;;  %v1756_v5 = vsub.f32 %v4601_v40, %v4615_v46 }
  0xf2   :  { %3412 = vmatpush3.msra.mxu0 %v4096_v61  ;;  %3475 = vmatmul.mubr.f32.gmra.mxu1 %v4172_v60  ;;  %5613 = vst [vmem:[#allocation6_spill] sm:$0xff] %v4541_v54  ;;  %v4544_v61 = vsub.f32 %v1466_v9, %v4531_v39  ;;  %v4620_v21 = vand.u32 4294901760, %v1460_v56 }
  0xf3   :  { %3413 = vmatprep.subr.mxu0 %v4105_v4  ;;  %3415 = vmatprep.mubr.f32.mxu0 %v4141_v1  ;;  %v1464_v1 = vld [vmem:[%s5450_s2 + $0x58] sm:$0xff]  ;;  %5628 = vst [vmem:[#allocation21_spill] sm:$0xff] %v4618_v57  ;;  %v4630_v6 = vand.u32 4294901760, %v4618_v57  ;;  %v1757_v18 = vand.u32 4294901760, %v1756_v5 }
  0xf4   :  { %3477 = vmatprep.mubr.f32.mxu1 %v5601_v26  ;;  %3414 = vmatpush3.msra.mxu0 %v4105_v4  ;;  %5614 = vst [vmem:[#allocation7_spill] sm:$0xff] %v4544_v61  ;;  %v4546_v4 = vand.u32 4294901760, %v1465_v41  ;;  %v4556_v15 = vand.u32 4294901760, %v4544_v61  ;;  %v4562_v47 = vand.u32 4294901760, %v1464_v1  ;;  %5629 = vst [vmem:[#allocation22_spill] sm:$0xff] %v4620_v21  ;;  %v4633_v10 = vsub.f32 %v1460_v56, %v4620_v21 }
  0xf5   :  { %3416 = vmatmul.mubr.f32.vlgmr.msra.gmra.mxu0 %v4147_v13  ;;  %3495 = vmatprep.subr.mxu0 %v4510_v58  ;;  %v1721_v13 = vsub.f32 %v4529_v32, %v4541_v54  ;;  %5630 = vst [vmem:[#allocation23_spill] sm:$0xff] %v4630_v6  ;;  %v1763_v19 = vsub.f32 %v4618_v57, %v4630_v6 }
  0xf6   :  { %3478 = vmatmul.mubr.f32.gmra.mxu1 %v4202_v59  ;;  %3418 = vmatprep.mubr.f32.mxu0 %v4159_v42  ;;  %5615 = vst [vmem:[#allocation8_spill] sm:$0xff] %v4556_v15  ;;  %v4559_v42 = vsub.f32 %v1465_v41, %v4546_v4  ;;  %5617 = vst [vmem:[#allocation10_spill] sm:$0xff] %v4562_v47  ;;  %v1728_v34 = vsub.f32 %v4544_v61, %v4556_v15  ;;  %v4645_v23 = vand.u32 4294901760, %v4633_v10 }
  0xf7   :  { %3480 = vmatprep.mubr.f32.mxu1 %v5602_v28  ;;  %3496 = vmatpush3.msra.mxu0 %v4510_v58  ;;  %v4576_v14 = vsub.f32 %v1464_v1, %v4562_v47  ;;  %5631 = vst [vmem:[#allocation24_spill] sm:$0xff] %v4633_v10 }
  0xf8   :  { %3497 = vmatprep.subr.mxu0 %v4518_v7  ;;  %5616 = vst [vmem:[#allocation9_spill] sm:$0xff] %v4559_v42  ;;  %3551 = vmatprep.subr.mxu1 %v1715_v2  ;;  %v4571_v53 = vand.u32 4294901760, %v4559_v42  ;;  %v1729_v38 = vand.u32 4294901760, %v1728_v34  ;;  %5633 = vst [vmem:[#allocation26_spill] sm:$0xff] %v4645_v23  ;;  %v1454_v34 = vld [vmem:[%s5450_s2 + $0x8] sm:$0xff] }
  0xf9   :  { %3419 = vmatmul.mubr.f32.gmra.mxu0 %v4172_v60  ;;  %v1722_v60 = vand.u32 4294901760, %v1721_v13  ;;  %3552 = vmatpush3.msra.mxu1 %v1715_v2  ;;  %5620 = vst [vmem:[#allocation13_spill] sm:$0xff] %v4576_v14 }
  0xfa   :  { %3481 = vmatmul.mubr.f32.gmra.mxu1 %v4234_v37  ;;  %3421 = vmatprep.mubr.f32.mxu0 %v5601_v26  ;;  %5618 = vst [vmem:[#allocation11_spill] sm:$0xff] %v4571_v53  ;;  %v1735_v17 = vsub.f32 %v4559_v42, %v4571_v53  ;;  %v4651_v26 = vsub.f32 %v1459_v31, %v4636_v11 }
  0xfb   :  { %3483 = vmatprep.mubr.f32.mxu1 %v5603_v29  ;;  %3498 = vmatpush3.msra.mxu0 %v4518_v7 }
  0xfc   :  { %3499 = vmatprep.subr.mxu0 %v4531_v39  ;;  %3553 = vmatprep.subr.mxu1 %v1722_v60  ;;  %v1736_v8 = vand.u32 4294901760, %v1735_v17  ;;  %5635 = vst [vmem:[#allocation28_spill] sm:$0xff] %v4651_v26 }
  0xfd   :  { %3422 = vmatmul.mubr.f32.gmra.mxu0 %v4202_v59  ;;  %v1463_v59 = vld [vmem:[%s5450_s2 + $0x50] sm:$0xff]  ;;  %3554 = vmatpush3.msra.mxu1 %v1722_v60 }
  0xfe   :  { %3484 = vmatmul.mubr.f32.gmra.mxu1 %v5604_v33  ;;  %3424 = vmatprep.mubr.f32.mxu0 %v5602_v28  ;;  %v1457_v28 = vld [vmem:[%s5450_s2 + $0x20] sm:$0xff] }
  0xff   :  { %3486 = vmatprep.mubr.f32.mxu1 %v5605_v35  ;;  %3500 = vmatpush3.msra.mxu0 %v4531_v39 }
 0x100   :  { %3501 = vmatprep.subr.mxu0 %v4546_v4  ;;  %3555 = vmatprep.subr.mxu1 %v1729_v38 }
 0x101   :  { %3425 = vmatmul.mubr.f32.gmra.mxu0 %v4234_v37  ;;  %v4573_v37 = vand.u32 4294901760, %v1463_v59  ;;  %3556 = vmatpush3.msra.mxu1 %v1729_v38 }
 0x102   :  { %3487 = vmatmul.mubr.f32.gmra.mxu1 %v5606_v44  ;;  %3427 = vmatprep.mubr.f32.mxu0 %v5603_v29  ;;  %v1764_v29 = vand.u32 4294901760, %v1763_v19 }
 0x103   :  { %3489 = vmatprep.mubr.f32.mxu1 %v5607_v48  ;;  %3502 = vmatpush3.msra.mxu0 %v4546_v4  ;;  %5619 = vst [vmem:[#allocation12_spill] sm:$0xff] %v4573_v37  ;;  %v4585_v20 = vsub.f32 %v1463_v59, %v4573_v37  ;;  %v4695_v59 = vand.u32 4294901760, %v1455_v45 }
 0x104   :  { %3503 = vmatprep.subr.mxu0 %v4562_v47  ;;  %3557 = vmatprep.subr.mxu1 %v1736_v8 }
 0x105   :  { %3428 = vmatmul.mubr.f32.gmra.mxu0 %v5604_v33  ;;  %5621 = vst [vmem:[#allocation14_spill] sm:$0xff] %v4585_v20  ;;  %v4598_v36 = vand.u32 4294901760, %v4585_v20  ;;  %3558 = vmatpush3.msra.mxu1 %v1736_v8  ;;  %v1770_v33 = vsub.f32 %v4633_v10, %v4645_v23  ;;  %5644 = vst [vmem:[#allocation37_spill] sm:$0xff] %v4695_v59  ;;  %v4708_v27 = vsub.f32 %v1455_v45, %v4695_v59 }
 0x106   :  { %3490 = vmatmul.mubr.f32.gmra.mxu1 %v5608_v49  ;;  %3430 = vmatprep.mubr.f32.mxu0 %v5605_v35  ;;  %v4660_v35 = vsub.f32 %v1458_v12, %v4647_v25  ;;  %v4711_v8 = vand.u32 4294901760, %v1454_v34 }
 0x107   :  { %3492 = vmatprep.mubr.f32.mxu1 %v5609_v51  ;;  %3504 = vmatpush3.msra.mxu0 %v4562_v47  ;;  %5624 = vst [vmem:[#allocation17_spill] sm:$0xff] %v4598_v36  ;;  %v1749_v30 = vsub.f32 %v4585_v20, %v4598_v36  ;;  %5646 = vst [vmem:[#allocation39_spill] sm:$0xff] %v4708_v27 }
 0x108   :  { %3505 = vmatprep.subr.mxu0 %v4573_v37  ;;  %5636 = vst [vmem:[#allocation29_spill] sm:$0xff] %v4660_v35  ;;  %v4673_v52 = vand.u32 4294901760, %v4660_v35  ;;  %5647 = vst [vmem:[#allocation40_spill] sm:$0xff] %v4711_v8 }
 0x109   :  { %3431 = vmatmul.mubr.f32.gmra.mxu0 %v5606_v44  ;;  %v1750_v43 = vand.u32 4294901760, %v1749_v30  ;;  %v4662_v44 = vand.u32 4294901760, %v1457_v28 }
 0x10a   :  { %3493 = vmatmul.mubr.f32.gmra.mxu1 %v4352_v16  ;;  %3433 = vmatprep.mubr.f32.mxu0 %v5607_v48  ;;  %v4666_v48 = vand.u32 4294901760, %v4651_v26  ;;  %5639 = vst [vmem:[#allocation32_spill] sm:$0xff] %v4673_v52  ;;  %v1784_v1 = vsub.f32 %v4660_v35, %v4673_v52 }
 0x10b   :  { %3506 = vmatpush3.msra.mxu0 %v4573_v37  ;;  %5637 = vst [vmem:[#allocation30_spill] sm:$0xff] %v4662_v44  ;;  %v4676_v62 = vsub.f32 %v1457_v28, %v4662_v44 }
 0x10c   :  { %3507 = vmatprep.subr.mxu0 %v4587_v22  ;;  %5638 = vst [vmem:[#allocation31_spill] sm:$0xff] %v4666_v48  ;;  %v1777_v41 = vsub.f32 %v4651_v26, %v4666_v48  ;;  %v1785_v3 = vand.u32 4294901760, %v1784_v1 }
 0x10d   :  { %3434 = vmatmul.mubr.f32.gmra.mxu0 %v5608_v49  ;;  %v1456_v49 = vld [vmem:[%s5450_s2 + $0x18] sm:$0xff]  ;;  %5640 = vst [vmem:[#allocation33_spill] sm:$0xff] %v4676_v62  ;;  %v4690_v2 = vand.u32 4294901760, %v4676_v62 }
 0x10e   :  { %3436 = vmatprep.mubr.f32.mxu0 %v5609_v51  ;;  %3508 = vmatpush3.msra.mxu0 %v4587_v22  ;;  %v1771_v51 = vand.u32 4294901760, %v1770_v33  ;;  %v4678_v9 = vand.u32 4294901760, %v1456_v49  ;;  %v1778_v60 = vand.u32 4294901760, %v1777_v41 }
 0x10f   :  { %3509 = vmatprep.subr.mxu0 %v4603_v63  ;;  %5642 = vst [vmem:[#allocation35_spill] sm:$0xff] %v4690_v2  ;;  %v1791_v38 = vsub.f32 %v4676_v62, %v4690_v2 }
 0x110   :  { %3510 = vmatpush3.msra.mxu0 %v4603_v63  ;;  %5641 = vst [vmem:[#allocation34_spill] sm:$0xff] %v4678_v9  ;;  %v4693_v13 = vsub.f32 %v1456_v49, %v4678_v9 }
 0x111   :  { %3437 = vmatmul.mubr.f32.gmra.mxu0 %v4352_v16  ;;  %v4591_v16 = vand.u32 4294901760, %v4576_v14  ;;  %3511 = vmatprep.subr.mxu0 %v4620_v21  ;;  %v1792_v56 = vand.u32 4294901760, %v1791_v38 }
 0x112   :  { %3512 = vmatpush3.msra.mxu0 %v4620_v21  ;;  %5643 = vst [vmem:[#allocation36_spill] sm:$0xff] %v4693_v13  ;;  %v4705_v17 = vand.u32 4294901760, %v4693_v13 }
 0x113   :  { %5623 = vst [vmem:[#allocation16_spill] sm:$0xff] %v4591_v16  ;;  %v1742_v55 = vsub.f32 %v4576_v14, %v4591_v16  ;;  %3513 = vmatprep.subr.mxu0 %v4636_v11 }
 0x114   :  { %3514 = vmatpush3.msra.mxu0 %v4636_v11  ;;  %5645 = vst [vmem:[#allocation38_spill] sm:$0xff] %v4705_v17  ;;  %v1798_v30 = vsub.f32 %v4693_v13, %v4705_v17 }
 0x115   :  { %v1743_v50 = vand.u32 4294901760, %v1742_v55  ;;  %3515 = vmatprep.subr.mxu0 %v4647_v25  ;;  %v1453_v55 = vld [vmem:[%s5450_s2] sm:$0xff] }
 0x116   :  { %3516 = vmatpush3.msra.mxu0 %v4647_v25  ;;  %v4722_v31 = vand.u32 4294901760, %v1453_v55  ;;  %v1799_v5 = vand.u32 4294901760, %v1798_v30 }
 0x117   :  { %3559 = vmatprep.subr.mxu1 %v1743_v50  ;;  %3517 = vmatprep.subr.mxu0 %v4662_v44 }
 0x118   :  { %3560 = vmatpush3.msra.mxu1 %v1743_v50  ;;  %3518 = vmatpush3.msra.mxu0 %v4662_v44  ;;  %v4720_v50 = vand.u32 4294901760, %v4708_v27  ;;  %5649 = vst [vmem:[#allocation42_spill] sm:$0xff] %v4722_v31 }
 0x119   :  { %3561 = vmatprep.subr.mxu1 %v1750_v43  ;;  %3519 = vmatprep.subr.mxu0 %v4678_v9 }
 0x11a   :  { %3562 = vmatpush3.msra.mxu1 %v1750_v43  ;;  %3520 = vmatpush3.msra.mxu0 %v4678_v9  ;;  %5648 = vst [vmem:[#allocation41_spill] sm:$0xff] %v4720_v50  ;;  %v4726_v43 = vsub.f32 %v1454_v34, %v4711_v8  ;;  %v1805_v12 = vsub.f32 %v4708_v27, %v4720_v50 }
 0x11b   :  { %3563 = vmatprep.subr.mxu1 %v1757_v18  ;;  %3521 = vmatprep.subr.mxu0 %v4695_v59 }
 0x11c   :  { %3564 = vmatpush3.msra.mxu1 %v1757_v18  ;;  %3522 = vmatpush3.msra.mxu0 %v4695_v59  ;;  %5650 = vst [vmem:[#allocation43_spill] sm:$0xff] %v4726_v43  ;;  %v4732_v18 = vsub.f32 %v1453_v55, %v4722_v31  ;;  %v4736_v19 = vand.u32 4294901760, %v4726_v43  ;;  %v1806_v28 = vand.u32 4294901760, %v1805_v12 }
 0x11d   :  { %3565 = vmatprep.subr.mxu1 %v1764_v29  ;;  %3523 = vmatprep.subr.mxu0 %v4711_v8 }
 0x11e   :  { %3566 = vmatpush3.msra.mxu1 %v1764_v29  ;;  %5651 = vst [vmem:[#allocation44_spill] sm:$0xff] %v4732_v18  ;;  %3524 = vmatpush3.msra.mxu0 %v4711_v8  ;;  %5652 = vst [vmem:[#allocation45_spill] sm:$0xff] %v4736_v19  ;;  %v4740_v29 = vand.u32 4294901760, %v4732_v18  ;;  %v1812_v33 = vsub.f32 %v4726_v43, %v4736_v19 }
 0x11f   :  { %3567 = vmatprep.subr.mxu1 %v1771_v51  ;;  %3525 = vmatprep.subr.mxu0 %v4722_v31 }
 0x120   :  { %3568 = vmatpush3.msra.mxu1 %v1771_v51  ;;  %5653 = vst [vmem:[#allocation46_spill] sm:$0xff] %v4740_v29  ;;  %3526 = vmatpush3.msra.mxu0 %v4722_v31  ;;  %v1819_v49 = vsub.f32 %v4732_v18, %v4740_v29  ;;  %v1813_v51 = vand.u32 4294901760, %v1812_v33 }
 0x121   :  { %3569 = vmatprep.subr.mxu1 %v1778_v60  ;;  %3607 = vmatprep.subr.mxu0 %v4516_v0 }
 0x122   :  { %3570 = vmatpush3.msra.mxu1 %v1778_v60  ;;  %v1820_v41 = vand.u32 4294901760, %v1819_v49 }
 0x123   :  { %3571 = vmatprep.subr.mxu1 %v1785_v3 }
 0x124   :  { %3572 = vmatpush3.msra.mxu1 %v1785_v3 }
 0x125   :  { %3573 = vmatprep.subr.mxu1 %v1792_v56 }
 0x126   :  { %3574 = vmatpush3.msra.mxu1 %v1792_v56 }
 0x127   :  { %3575 = vmatprep.subr.mxu1 %v1799_v5 }
 0x128   :  { %3576 = vmatpush3.msra.mxu1 %v1799_v5 }
 0x129   :  { %3577 = vmatprep.subr.mxu1 %v1806_v28 }
 0x12a   :  { %3578 = vmatpush3.msra.mxu1 %v1806_v28 }
 0x12b   :  { %3579 = vmatprep.subr.mxu1 %v1813_v51 }
 0x12c   :  { %3580 = vmatpush3.msra.mxu1 %v1813_v51 }
 0x12d   :  { %3581 = vmatprep.subr.mxu1 %v1820_v41 }
 0x12e   :  { %3582 = vmatpush3.msra.mxu1 %v1820_v41 }
 0x12f   :  { %3663 = vmatprep.subr.mxu1 %v4510_v58 }
 0x145   :  { %v4749_v45 = vpop.f32.mrf.mxu1 }
 0x147   :  { %v4753_v60 = vpop.f32.mrf.mxu1 }
 0x14d   :  { %v4751_v1 = vpop.f32.mrf.mxu0  ;;  %v4755_v34 = vpop.f32.mrf.mxu1 }
 0x14e   :  { %v511_v22 = vadd.f32 %v4749_v45, %v4751_v1 }
 0x14f   :  { %v4757_v3 = vpop.f32.mrf.mxu0  ;;  %v4761_v55 = vpop.f32.mrf.mxu1 }
 0x155   :  { %v4759_v38 = vpop.f32.mrf.mxu0  ;;  %v4763_v56 = vpop.f32.mrf.mxu1 }
 0x157   :  { %v4765_v30 = vpop.f32.mrf.mxu0  ;;  %v4769_v12 = vpop.f32.mrf.mxu1 }
 0x158   :  { %v517_v45 = vadd.f32 %v4761_v55, %v4765_v30 }
 0x15d   :  { %v4767_v5 = vpop.f32.mrf.mxu0  ;;  %v4771_v28 = vpop.f32.mrf.mxu1 }
 0x15f   :  { %v4773_v33 = vpop.f32.mrf.mxu0  ;;  %v4777_v51 = vpop.f32.mrf.mxu1 }
 0x165   :  { %v4775_v49 = vpop.f32.mrf.mxu0  ;;  %v3261_v41 = vpop.f32.mrf.mxu1 }
 0x167   :  { %v4779_v29 = vpop.f32.mrf.mxu0  ;;  %v4783_v17 = vpop.f32.mrf.mxu1 }
 0x16d   :  { %v3205_v19 = vpop.f32.mrf.mxu0  ;;  %v3264_v2 = vpop.f32.mrf.mxu1 }
 0x16e   :  { %v4781_v50 = vadd.f32 %v3261_v41, %v3205_v19 }
 0x16f   :  { %v4785_v52 = vpop.f32.mrf.mxu0  ;;  %v4787_v48 = vpop.f32.mrf.mxu1 }
 0x175   :  { %v3208_v23 = vpop.f32.mrf.mxu0  ;;  %v3267_v46 = vpop.f32.mrf.mxu1 }
 0x176   :  { %v4789_v6 = vadd.f32 %v3264_v2, %v3208_v23 }
 0x177   :  { %v4791_v36 = vpop.f32.mrf.mxu0  ;;  %v576_v16 = vpop.f32.mrf.mxu1 }
 0x17d   :  { %v3211_v53 = vpop.f32.mrf.mxu0  ;;  %v3270_v15 = vpop.f32.mrf.mxu1 }
 0x17e   :  { %v4793_v54 = vadd.f32 %v3267_v46, %v3211_v53 }
 0x17f   :  { %v323_v19 = vpop.f32.mrf.mxu0  ;;  %v588_v41 = vpop.f32.mrf.mxu1 }
 0x180   :  { %5654 = vst [vmem:[#allocation47_spill] sm:$0xff] %v4793_v54  ;;  %v4795_v24 = vadd.f32 %v576_v16, %v323_v19 }
 0x181   :  { %v3361_v18 = vpop.f32.mrf.mxu1 }
 0x183   :  { %v892_v43 = vpop.f32.mrf.mxu1 }
 0x185   :  { %v3214_v27 = vpop.f32.mrf.mxu0  ;;  %v3364_v13 = vpop.f32.mrf.mxu1 }
 0x186   :  { %v4797_v31 = vadd.f32 %v3270_v15, %v3214_v27 }
 0x187   :  { %v343_v23 = vpop.f32.mrf.mxu0  ;;  %v4799_v2 = vpop.f32.mrf.mxu1 }
 0x188   :  { %5655 = vst [vmem:[#allocation48_spill] sm:$0xff] %v4797_v31  ;;  %v4801_v62 = vadd.f32 %v588_v41, %v343_v23 }
 0x189   :  { %v3305_v8 = vpop.f32.mrf.mxu0 }
 0x18a   :  { %5656 = vst [vmem:[#allocation49_spill] sm:$0xff] %v4801_v62  ;;  %v4803_v35 = vpop.f32.mrf.mxu1 }
 0x18b   :  { %v698_v53 = vpop.f32.mrf.mxu0 }
 0x18c   :  { %v4805_v46 = vpop.f32.mrf.mxu1 }
 0x18f   :  { %v3308_v59 = vpop.f32.mrf.mxu0 }
 0x190   :  { %v4807_v16 = vpop.f32.mrf.mxu1 }
 0x191   :  { %v712_v19 = vpop.f32.mrf.mxu0 }
 0x192   :  { %v4809_v26 = vpop.f32.mrf.mxu1 }
 0x195   :  { %v3311_v9 = vpop.f32.mrf.mxu0 }
 0x196   :  { %v4811_v15 = vpop.f32.mrf.mxu1 }
 0x197   :  { %v726_v27 = vpop.f32.mrf.mxu0 }
 0x198   :  { %v4813_v10 = vpop.f32.mrf.mxu1 }
 0x19b   :  { %v3314_v41 = vpop.f32.mrf.mxu0 }
 0x19c   :  { %v4815_v23 = vpop.f32.mrf.mxu1 }
 0x19d   :  { %v740_v44 = vpop.f32.mrf.mxu0 }
 0x19e   :  { %v4817_v57 = vpop.f32.mrf.mxu1 }
 0x19f   :  { %5657 = vst [vmem:[#allocation50_spill] sm:$0xff] %v4817_v57 }
 0x1a1   :  { %v3317_v25 = vpop.f32.mrf.mxu0 }
 0x1a2   :  { %v4819_v40 = vpop.f32.mrf.mxu1 }
 0x1a3   :  { %5658 = vst [vmem:[#allocation51_spill] sm:$0xff] %v4819_v40  ;;  %v4821_v11 = vpop.f32.mrf.mxu0  ;;  %v505_v40 = vadd.f32 %v4753_v60, %v4757_v3  ;;  %v535_v3 = vadd.f32 %v4763_v56, %v4767_v5 }
 0x1a4   :  { %v4823_v20 = vpop.f32.mrf.mxu1 }
 0x1a5   :  { %5659 = vst [vmem:[#allocation52_spill] sm:$0xff] %v4823_v20  ;;  %v706_v20 = vadd.f32 %v3305_v8, %v511_v22  ;;  %v699_v54 = vadd.f32 %v698_v53, %v505_v40  ;;  %v529_v40 = vadd.f32 %v4769_v12, %v4773_v33 }
 0x1a7   :  { %v4825_v21 = vpop.f32.mrf.mxu0  ;;  %v901_v57 = vadd.f32 %v3361_v18, %v706_v20  ;;  %v893_v8 = vadd.f32 %v892_v43, %v699_v54  ;;  %v541_v20 = vadd.f32 %v4777_v51, %v4779_v29 }
 0x1a8   :  { %v4827_v14 = vpop.f32.mrf.mxu1 }
 0x1a9   :  { %5660 = vst [vmem:[#allocation53_spill] sm:$0xff] %v4827_v14  ;;  %v4829_v63 = vpop.f32.mrf.mxu0  ;;  %v523_v14 = vadd.f32 %v4755_v34, %v4759_v38  ;;  %v741_v30 = vadd.f32 %v740_v44, %v541_v20 }
 0x1aa   :  { %v4831_v31 = vpop.f32.mrf.mxu1 }
 0x1ab   :  { %5661 = vst [vmem:[#allocation54_spill] sm:$0xff] %v4831_v31  ;;  %v720_v1 = vadd.f32 %v3308_v59, %v523_v14  ;;  %v547_v14 = vadd.f32 %v4771_v28, %v4775_v49 }
 0x1ad   :  { %v4833_v42 = vpop.f32.mrf.mxu0 }
 0x1ae   :  { %5662 = vst [vmem:[#allocation55_spill] sm:$0xff] %v4833_v42  ;;  %v3473_v62 = vpop.f32.mrf.mxu1 }
 0x1af   :  { %v4837_v61 = vpop.f32.mrf.mxu0 }
 0x1b0   :  { %5663 = vst [vmem:[#allocation56_spill] sm:$0xff] %v4837_v61  ;;  %v1308_v37 = vpop.f32.mrf.mxu1  ;;  %v713_v61 = vadd.f32 %v712_v19, %v517_v45 }
 0x1b1   :  { %v4841_v32 = vpop.f32.mrf.mxu0 }
 0x1b2   :  { %5664 = vst [vmem:[#allocation57_spill] sm:$0xff] %v4841_v32  ;;  %v3476_v31 = vpop.f32.mrf.mxu1  ;;  %v909_v56 = vadd.f32 %v4799_v2, %v713_v61 }
 0x1b3   :  { %v4845_v0 = vpop.f32.mrf.mxu0 }
 0x1b4   :  { %5665 = vst [vmem:[#allocation58_spill] sm:$0xff] %v4845_v0  ;;  %v1320_v42 = vpop.f32.mrf.mxu1  ;;  %v917_v0 = vadd.f32 %v3364_v13, %v720_v1  ;;  %v762_v13 = vadd.f32 %v3317_v25, %v4781_v50 }
 0x1b5   :  { %v3417_v47 = vpop.f32.mrf.mxu0 }
 0x1b6   :  { %v1138_v60 = vadd.f32 %v3417_v47, %v901_v57  ;;  %v3479_v22 = vpop.f32.mrf.mxu1  ;;  %v734_v47 = vadd.f32 %v3311_v9, %v535_v3  ;;  %v727_v57 = vadd.f32 %v726_v27, %v529_v40 }
 0x1b7   :  { %v1131_v34 = vpop.f32.mrf.mxu0 }
 0x1b8   :  { %v1315_v38 = vadd.f32 %v3473_v62, %v1138_v60  ;;  %v1132_v53 = vadd.f32 %v1131_v34, %v893_v8  ;;  %v1332_v32 = vpop.f32.mrf.mxu1  ;;  %v748_v62 = vadd.f32 %v3314_v41, %v547_v14  ;;  %v933_v61 = vadd.f32 %v4803_v35, %v734_v47 }
 0x1b9   :  { %v3420_v54 = vpop.f32.mrf.mxu0  ;;  %v925_v25 = vadd.f32 %v4805_v46, %v727_v57  ;;  %v965_v41 = vadd.f32 %v4811_v15, %v762_v13 }
 0x1ba   :  { %v4857_v59 = vand.u32 4294901760, %v1315_v38  ;;  %v1309_v43 = vadd.f32 %v1308_v37, %v1132_v53  ;;  %v1150_v18 = vadd.f32 %v3420_v54, %v917_v0  ;;  %v3482_v55 = vpop.f32.mrf.mxu1  ;;  %v553_v37 = vadd.f32 %v4783_v17, %v4785_v52 }
 0x1bb   :  { %v1143_v5 = vpop.f32.mrf.mxu0  ;;  %v565_v0 = vadd.f32 %v4787_v48, %v4791_v36  ;;  %v949_v35 = vadd.f32 %v4807_v16, %v748_v62  ;;  %v941_v17 = vadd.f32 %v4809_v26, %v741_v30 }
 0x1bc   :  { %v4862_v12 = vsub.f32 %v1315_v38, %v4857_v59  ;;  %v4864_v28 = vand.u32 4294901760, %v1309_v43  ;;  %v1327_v9 = vadd.f32 %v3476_v31, %v1150_v18  ;;  %v1144_v29 = vadd.f32 %v1143_v5, %v909_v56  ;;  %v1344_v33 = vpop.f32.mrf.mxu1 }
 0x1bd   :  { %v3423_v44 = vpop.f32.mrf.mxu0  ;;  %v755_v52 = vadd.f32 %v4821_v11, %v553_v37  ;;  %v776_v11 = vadd.f32 %v4825_v21, %v4789_v6  ;;  %v769_v21 = vadd.f32 %v4829_v63, %v565_v0  ;;  %v5667_v0 = vld [vmem:[#allocation10_spill] sm:$0xff] }
 0x1be   :  { %v1562_v50 = vand.u32 4294901760, %v4862_v12  ;;  %v4874_v49 = vsub.f32 %v1309_v43, %v4864_v28  ;;  %v4876_v51 = vand.u32 4294901760, %v1327_v9  ;;  %v1321_v31 = vadd.f32 %v1320_v42, %v1144_v29  ;;  %v4878_v2 = vpop.f32.mrf.mxu1  ;;  %3583 = vmatprep.mubr.f32.mxu1 %v4864_v28 }
 0x1bf   :  { %v1162_v36 = vadd.f32 %v3423_v44, %v933_v61  ;;  %v1155_v48 = vpop.f32.mrf.mxu0  ;;  %3584 = vmatmul.mubr.f32.vlgmr.msra.gmra.mxu1 %v4857_v59  ;;  %v957_v57 = vadd.f32 %v4813_v10, %v755_v52  ;;  %v981_v13 = vadd.f32 %v4815_v23, %v776_v11  ;;  %v5668_v61 = vld [vmem:[#allocation50_spill] sm:$0xff]  ;;  %v5672_v11 = vld [vmem:[#allocation5_spill] sm:$0xff] }
 0x1c0   :  { %v4886_v46 = vsub.f32 %v1327_v9, %v4876_v51  ;;  %v4888_v19 = vand.u32 4294901760, %v1321_v31  ;;  %v1156_v42 = vadd.f32 %v1155_v48, %v925_v25  ;;  %v1356_v27 = vpop.f32.mrf.mxu1  ;;  %3664 = vmatpush3.msra.mxu1 %v4510_v58  ;;  %v1563_v16 = vsub.f32 %v4862_v12, %v1562_v50  ;;  %v5666_v9 = vld [vmem:[#allocation56_spill] sm:$0xff]  ;;  %v5669_v25 = vld [vmem:[#allocation3_spill] sm:$0xff] }
 0x1c1   :  { %v1339_v45 = vadd.f32 %v3479_v22, %v1162_v36  ;;  %v3426_v26 = vpop.f32.mrf.mxu0  ;;  %3665 = vmatprep.subr.mxu1 %v4518_v7  ;;  %v1552_v1 = vand.u32 4294901760, %v4874_v49  ;;  %v783_v29 = vadd.f32 %v5666_v9, %v4795_v24  ;;  %v973_v44 = vadd.f32 %v5668_v61, %v769_v21  ;;  %v5670_v48 = vld [vmem:[#allocation47_spill] sm:$0xff]  ;;  %v5679_v61 = vld [vmem:[#allocation9_spill] sm:$0xff] }
 0x1c2   :  { %v4900_v60 = vsub.f32 %v1321_v31, %v4888_v19  ;;  %v1333_v8 = vadd.f32 %v1332_v32, %v1156_v42  ;;  %v1174_v3 = vadd.f32 %v3426_v26, %v949_v35  ;;  %3586 = vmatprep.mubr.f32.mxu1 %v4888_v19  ;;  %3666 = vmatpush3.msra.mxu1 %v4518_v7  ;;  %v4907_v15 = vpop.f32.mrf.mxu1  ;;  %v1582_v40 = vand.u32 4294901760, %v4886_v46  ;;  %v5671_v35 = vld [vmem:[#allocation55_spill] sm:$0xff] }
 0x1c3   :  { %v4905_v6 = vand.u32 4294901760, %v1339_v45  ;;  %v1167_v22 = vpop.f32.mrf.mxu0  ;;  %3587 = vmatmul.mubr.f32.gmra.mxu1 %v4876_v51  ;;  %3667 = vmatprep.subr.mxu1 %v4531_v39  ;;  %v1553_v32 = vsub.f32 %v4874_v49, %v1552_v1  ;;  %v1564_v54 = vand.u32 4294901760, %v1563_v16 }
 0x1c4   :  { %v4915_v34 = vand.u32 4294901760, %v1333_v8  ;;  %v1351_v38 = vadd.f32 %v3482_v55, %v1174_v3  ;;  %v1168_v53 = vadd.f32 %v1167_v22, %v941_v17  ;;  %3668 = vmatpush3.msra.mxu1 %v4531_v39  ;;  %v1572_v63 = vand.u32 4294901760, %v4900_v60  ;;  %v1368_v62 = vpop.f32.mrf.mxu1 }
 0x1c5   :  { %v4920_v14 = vsub.f32 %v1339_v45, %v4905_v6  ;;  %v3429_v20 = vpop.f32.mrf.mxu0  ;;  %3669 = vmatprep.subr.mxu1 %v4546_v4  ;;  %v1554_v47 = vand.u32 4294901760, %v1553_v32  ;;  %v1583_v5 = vsub.f32 %v4886_v46, %v1582_v40  ;;  %v790_v17 = vadd.f32 %v5671_v35, %v5670_v48  ;;  %v5681_v48 = vld [vmem:[#allocation48_spill] sm:$0xff]  ;;  %v5682_v35 = vld [vmem:[#allocation57_spill] sm:$0xff] }
 0x1c6   :  { %v4925_v43 = vsub.f32 %v1333_v8, %v4915_v34  ;;  %v1345_v18 = vadd.f32 %v1344_v33, %v1168_v53  ;;  %v1186_v55 = vadd.f32 %v3429_v20, %v965_v41  ;;  %3589 = vmatprep.mubr.f32.mxu1 %v4915_v34  ;;  %3670 = vmatpush3.msra.mxu1 %v4546_v4  ;;  %v4929_v56 = vand.u32 4294901760, %v1351_v38  ;;  %v3491_v45 = vpop.f32.mrf.mxu1 }
 0x1c7   :  { %3527 = vmatprep.mubr.f32.mxu0 %v1554_v47  ;;  %v1179_v30 = vpop.f32.mrf.mxu0  ;;  %3590 = vmatmul.mubr.f32.gmra.mxu1 %v4905_v6  ;;  %v1573_v10 = vsub.f32 %v4900_v60, %v1572_v63  ;;  %v1602_v24 = vand.u32 4294901760, %v4920_v14  ;;  %v1584_v3 = vand.u32 4294901760, %v1583_v5 }
 0x1c8   :  { %v4941_v33 = vand.u32 4294901760, %v1345_v18  ;;  %v1180_v37 = vadd.f32 %v1179_v30, %v957_v57  ;;  %3528 = vmatmul.mubr.f32.vlgmr.msra.gmra.mxu0 %v1564_v54  ;;  %3671 = vmatprep.subr.mxu1 %v5667_v0  ;;  %v1363_v23 = vadd.f32 %v4878_v2, %v1186_v55  ;;  %v1592_v36 = vand.u32 4294901760, %v4925_v43  ;;  %v5673_v2 = vld [vmem:[#allocation12_spill] sm:$0xff]  ;;  %v5676_v55 = vld [vmem:[#allocation49_spill] sm:$0xff]  ;;  %v5677_v30 = vld [vmem:[#allocation58_spill] sm:$0xff]  ;;  %v1380_v9 = vpop.f32.mrf.mxu1 }
 0x1c9   :  { %3608 = vmatpush3.msra.mxu0 %v5669_v25  ;;  %3672 = vmatpush3.msra.mxu1 %v5667_v0  ;;  %v3432_v31 = vpop.f32.mrf.mxu0  ;;  %v1574_v52 = vand.u32 4294901760, %v1573_v10  ;;  %v4958_v16 = vsub.f32 %v1351_v38, %v4929_v56  ;;  %v5675_v38 = vld [vmem:[#allocation52_spill] sm:$0xff]  ;;  %v1603_v54 = vsub.f32 %v4920_v14, %v1602_v24 }
 0x1ca   :  { %v4953_v42 = vsub.f32 %v1345_v18, %v4941_v33  ;;  %v1357_v41 = vadd.f32 %v1356_v27, %v1180_v37  ;;  %3609 = vmatprep.subr.mxu0 %v5672_v11  ;;  %3673 = vmatprep.subr.mxu1 %v5673_v2  ;;  %v1198_v26 = vadd.f32 %v3432_v31, %v981_v13  ;;  %v5674_v27 = vld [vmem:[#allocation7_spill] sm:$0xff]  ;;  %v4969_v20 = vand.u32 4294901760, %v1363_v23 }
 0x1cb   :  { %3610 = vmatpush3.msra.mxu0 %v5672_v11  ;;  %3530 = vmatprep.mubr.f32.mxu0 %v1574_v52  ;;  %v1191_v8 = vpop.f32.mrf.mxu0  ;;  %v1593_v21 = vsub.f32 %v4925_v43, %v1592_v36  ;;  %v989_v53 = vadd.f32 %v5675_v38, %v783_v29  ;;  %v797_v13 = vadd.f32 %v5677_v30, %v5676_v55  ;;  %v5678_v37 = vld [vmem:[#allocation15_spill] sm:$0xff]  ;;  %v5685_v55 = vld [vmem:[#allocation54_spill] sm:$0xff] }
 0x1cc   :  { %v4964_v22 = vand.u32 4294901760, %v1357_v41  ;;  %3592 = vmatprep.mubr.f32.mxu1 %v4941_v33  ;;  %3611 = vmatprep.subr.mxu0 %v5674_v27  ;;  %v1192_v32 = vadd.f32 %v1191_v8, %v973_v44  ;;  %v1612_v18 = vand.u32 4294901760, %v4953_v42  ;;  %v1375_v29 = vadd.f32 %v4907_v15, %v1198_v26  ;;  %v5680_v44 = vld [vmem:[#allocation51_spill] sm:$0xff] }
 0x1cd   :  { %3674 = vmatpush3.msra.mxu1 %v5673_v2  ;;  %3531 = vmatmul.mubr.f32.gmra.mxu0 %v1584_v3  ;;  %v3435_v47 = vpop.f32.mrf.mxu0  ;;  %v1594_v57 = vand.u32 4294901760, %v1593_v21  ;;  %v997_v25 = vadd.f32 %v5680_v44, %v790_v17  ;;  %v4998_v26 = vsub.f32 %v1363_v23, %v4969_v20  ;;  %v5683_v8 = vld [vmem:[#allocation19_spill] sm:$0xff]  ;;  %v1604_v3 = vand.u32 4294901760, %v1603_v54  ;;  %v5686_v44 = vld [vmem:[#allocation22_spill] sm:$0xff] }
 0x1ce   :  { %v4979_v10 = vsub.f32 %v1357_v41, %v4964_v22  ;;  %v1369_v5 = vadd.f32 %v1368_v62, %v1192_v32  ;;  %3593 = vmatmul.mubr.f32.gmra.mxu1 %v4929_v56  ;;  %3612 = vmatpush3.msra.mxu0 %v5674_v27  ;;  %v1613_v52 = vsub.f32 %v4953_v42, %v1612_v18  ;;  %v5577_v62 = vand.u32 4294901760, %v4958_v16  ;;  %v5684_v32 = vld [vmem:[#allocation13_spill] sm:$0xff] }
 0x1cf   :  { %3675 = vmatprep.subr.mxu1 %v5678_v37  ;;  %3613 = vmatprep.subr.mxu0 %v5679_v61  ;;  %v1203_v31 = vpop.f32.mrf.mxu0  ;;  %v804_v41 = vadd.f32 %v5682_v35, %v5681_v48  ;;  %v1210_v17 = vadd.f32 %v3435_v47, %v997_v25  ;;  %v1005_v30 = vadd.f32 %v5685_v55, %v797_v13  ;;  %v5687_v25 = vld [vmem:[#allocation14_spill] sm:$0xff]  ;;  %v5572_v48 = vand.u32 4294901760, %v4998_v26 }
 0x1d0   :  { %v4993_v11 = vand.u32 4294901760, %v1369_v5  ;;  %3676 = vmatpush3.msra.mxu1 %v5678_v37  ;;  %3614 = vmatpush3.msra.mxu0 %v5679_v61  ;;  %v1204_v15 = vadd.f32 %v1203_v31, %v989_v53  ;;  %v5574_v27 = vand.u32 4294901760, %v4979_v10  ;;  %v5005_v61 = vand.u32 4294901760, %v1375_v29  ;;  %v3494_v53 = vpop.f32.mrf.mxu1  ;;  %v5690_v55 = vld [vmem:[#allocation18_spill] sm:$0xff] }
 0x1d1   :  { %3677 = vmatprep.subr.mxu1 %v5683_v8  ;;  %3533 = vmatprep.mubr.f32.mxu0 %v1594_v57  ;;  %v3438_v21 = vpop.f32.mrf.mxu0  ;;  %v1614_v47 = vand.u32 4294901760, %v1613_v52  ;;  %v1623_v54 = vsub.f32 %v4958_v16, %v5577_v62 }
 0x1d2   :  { %3595 = vmatprep.mubr.f32.mxu1 %v4964_v22  ;;  %3615 = vmatprep.subr.mxu0 %v5684_v32  ;;  %v1381_v38 = vadd.f32 %v1380_v9, %v1204_v15  ;;  %v5008_v23 = vsub.f32 %v1369_v5, %v4993_v11  ;;  %v1387_v9 = vadd.f32 %v3491_v45, %v1210_v17  ;;  %v5688_v5 = vld [vmem:[#allocation53_spill] sm:$0xff]  ;;  %v1392_v15 = vpop.f32.mrf.mxu1 }
 0x1d3   :  { %3678 = vmatpush3.msra.mxu1 %v5683_v8  ;;  %3534 = vmatmul.mubr.f32.gmra.mxu0 %v1604_v3  ;;  %v1215_v57 = vpop.f32.mrf.mxu0  ;;  %v1013_v31 = vadd.f32 %v5688_v5, %v804_v41  ;;  %v1633_v52 = vsub.f32 %v4979_v10, %v5574_v27  ;;  %v5028_v45 = vsub.f32 %v1375_v29, %v5005_v61  ;;  %v5689_v3 = vld [vmem:[#allocation25_spill] sm:$0xff]  ;;  %v1624_v41 = vand.u32 4294901760, %v1623_v54 }
 0x1d4   :  { %3596 = vmatmul.mubr.f32.gmra.mxu1 %v4969_v20  ;;  %3616 = vmatpush3.msra.mxu0 %v5684_v32  ;;  %v1216_v13 = vadd.f32 %v1215_v57, %v1005_v30  ;;  %v5023_v35 = vand.u32 4294901760, %v1381_v38  ;;  %v5571_v32 = vand.u32 4294901760, %v5008_v23  ;;  %v5034_v57 = vand.u32 4294901760, %v1387_v9 }
 0x1d5   :  { %3679 = vmatprep.subr.mxu1 %v5686_v44  ;;  %3617 = vmatprep.subr.mxu0 %v5687_v25  ;;  %v1222_v17 = vadd.f32 %v3438_v21, %v1013_v31  ;;  %v1634_v29 = vand.u32 4294901760, %v1633_v52  ;;  %v1643_v21 = vsub.f32 %v4998_v26, %v5572_v48  ;;  %v5573_v31 = vand.u32 4294901760, %v5028_v45 }
 0x1d6   :  { %3680 = vmatpush3.msra.mxu1 %v5686_v44  ;;  %3618 = vmatpush3.msra.mxu0 %v5687_v25  ;;  %v1393_v30 = vadd.f32 %v1392_v15, %v1216_v13  ;;  %v5691_v25 = vld [vmem:[#allocation27_spill] sm:$0xff]  ;;  %v5692_v13 = vld [vmem:[#allocation21_spill] sm:$0xff]  ;;  %v1653_v5 = vsub.f32 %v5008_v23, %v5571_v32 }
 0x1d7   :  { %3681 = vmatprep.subr.mxu1 %v5689_v3  ;;  %3536 = vmatprep.mubr.f32.mxu0 %v1614_v47  ;;  %v5041_v47 = vsub.f32 %v1381_v38, %v5023_v35  ;;  %v1399_v54 = vadd.f32 %v3494_v53, %v1222_v17  ;;  %v5056_v38 = vsub.f32 %v1387_v9, %v5034_v57  ;;  %v5693_v53 = vld [vmem:[#allocation30_spill] sm:$0xff]  ;;  %v1644_v15 = vand.u32 4294901760, %v1643_v21  ;;  %v5694_v17 = vld [vmem:[#allocation24_spill] sm:$0xff] }
 0x1d8   :  { %3598 = vmatprep.mubr.f32.mxu1 %v4993_v11  ;;  %3619 = vmatprep.subr.mxu0 %v5690_v55  ;;  %v5051_v52 = vand.u32 4294901760, %v1393_v30  ;;  %v1654_v32 = vand.u32 4294901760, %v1653_v5  ;;  %v1663_v9 = vsub.f32 %v5028_v45, %v5573_v31  ;;  %v5696_v21 = vld [vmem:[#allocation28_spill] sm:$0xff]  ;;  %v5698_v31 = vld [vmem:[#allocation29_spill] sm:$0xff] }
 0x1d9   :  { %3682 = vmatpush3.msra.mxu1 %v5689_v3  ;;  %3537 = vmatmul.mubr.f32.gmra.mxu0 %v1624_v41  ;;  %v5575_v41 = vand.u32 4294901760, %v5041_v47  ;;  %v5576_v48 = vand.u32 4294901760, %v5056_v38 }
 0x1da   :  { %3599 = vmatmul.mubr.f32.gmra.mxu1 %v5005_v61  ;;  %3620 = vmatpush3.msra.mxu0 %v5690_v55  ;;  %v5062_v55 = vand.u32 4294901760, %v1399_v54 }
 0x1db   :  { %3683 = vmatprep.subr.mxu1 %v5691_v25  ;;  %3621 = vmatprep.subr.mxu0 %v5692_v13  ;;  %v1673_v5 = vsub.f32 %v5041_v47, %v5575_v41 }
 0x1dc   :  { %3684 = vmatpush3.msra.mxu1 %v5691_v25  ;;  %3622 = vmatpush3.msra.mxu0 %v5692_v13  ;;  %v5069_v13 = vsub.f32 %v1393_v30, %v5051_v52  ;;  %v5082_v30 = vsub.f32 %v1399_v54, %v5062_v55 }
 0x1dd   :  { %3685 = vmatprep.subr.mxu1 %v5693_v53  ;;  %3539 = vmatprep.mubr.f32.mxu0 %v1634_v29  ;;  %v5695_v29 = vld [vmem:[#allocation34_spill] sm:$0xff]  ;;  %v1674_v54 = vand.u32 4294901760, %v1673_v5  ;;  %v5702_v5 = vld [vmem:[#allocation36_spill] sm:$0xff] }
 0x1de   :  { %3601 = vmatprep.mubr.f32.mxu1 %v5023_v35  ;;  %3623 = vmatprep.subr.mxu0 %v5694_v17  ;;  %v1692_v27 = vand.u32 4294901760, %v5069_v13  ;;  %v1702_v41 = vand.u32 4294901760, %v5082_v30 }
 0x1df   :  { %3686 = vmatpush3.msra.mxu1 %v5693_v53  ;;  %3540 = vmatmul.mubr.f32.gmra.mxu0 %v1644_v15  ;;  %v5697_v15 = vld [vmem:[#allocation37_spill] sm:$0xff] }
 0x1e0   :  { %3602 = vmatmul.mubr.f32.gmra.mxu1 %v5034_v57  ;;  %3624 = vmatpush3.msra.mxu0 %v5694_v17  ;;  %v1664_v17 = vand.u32 4294901760, %v1663_v9  ;;  %v5700_v9 = vld [vmem:[#allocation33_spill] sm:$0xff]  ;;  %v1703_v62 = vsub.f32 %v5082_v30, %v1702_v41 }
 0x1e1   :  { %3687 = vmatprep.subr.mxu1 %v5695_v29  ;;  %3625 = vmatprep.subr.mxu0 %v5696_v21 }
 0x1e2   :  { %3688 = vmatpush3.msra.mxu1 %v5695_v29  ;;  %3626 = vmatpush3.msra.mxu0 %v5696_v21  ;;  %v1683_v21 = vsub.f32 %v5056_v38, %v5576_v48  ;;  %v5701_v48 = vld [vmem:[#allocation42_spill] sm:$0xff] }
 0x1e3   :  { %3689 = vmatprep.subr.mxu1 %v5697_v15  ;;  %3542 = vmatprep.mubr.f32.mxu0 %v1654_v32  ;;  %v5699_v32 = vld [vmem:[#allocation40_spill] sm:$0xff] }
 0x1e4   :  { %3604 = vmatprep.mubr.f32.mxu1 %v5051_v52  ;;  %3627 = vmatprep.subr.mxu0 %v5698_v31 }
 0x1e5   :  { %3690 = vmatpush3.msra.mxu1 %v5697_v15  ;;  %3543 = vmatmul.mubr.f32.gmra.mxu0 %v1664_v17  ;;  %v1693_v17 = vsub.f32 %v5069_v13, %v1692_v27 }
 0x1e6   :  { %3605 = vmatmul.mubr.f32.gmra.mxu1 %v5062_v55  ;;  %3628 = vmatpush3.msra.mxu0 %v5698_v31  ;;  %v1684_v31 = vand.u32 4294901760, %v1683_v21  ;;  %v1704_v21 = vand.u32 4294901760, %v1703_v62  ;;  %v5727_v62 = vld [vmem:[#allocation45_spill] sm:$0xff] }
 0x1e7   :  { %3691 = vmatprep.subr.mxu1 %v5699_v32  ;;  %3629 = vmatprep.subr.mxu0 %v5700_v9 }
 0x1e8   :  { %3692 = vmatpush3.msra.mxu1 %v5699_v32  ;;  %3695 = vmatprep.mubr.f32.mxu1 %v1552_v1  ;;  %v1694_v1 = vand.u32 4294901760, %v1693_v17 }
 0x1e9   :  { %3630 = vmatpush3.msra.mxu0 %v5700_v9  ;;  %3693 = vmatprep.subr.mxu1 %v5701_v48  ;;  %v5703_v9 = vld [vmem:[#allocation39_spill] sm:$0xff] }
 0x1ea   :  { %3545 = vmatprep.mubr.f32.mxu0 %v1674_v54  ;;  %3631 = vmatprep.subr.mxu0 %v5702_v5  ;;  %v5704_v54 = vld [vmem:[#allocation43_spill] sm:$0xff] }
 0x1eb   :  { %3694 = vmatpush3.msra.mxu1 %v5701_v48  ;;  %3546 = vmatmul.mubr.f32.gmra.mxu0 %v1684_v31 }
 0x1ec   :  { %3632 = vmatpush3.msra.mxu0 %v5702_v5  ;;  %3696 = vmatmul.mubr.f32.vlgmr.msra.gmra.mxu1 %v1562_v50  ;;  %v5705_v50 = vld [vmem:[#allocation44_spill] sm:$0xff] }
 0x1ed   :  { %3775 = vmatprep.subr.mxu1 %v4510_v58  ;;  %3633 = vmatprep.subr.mxu0 %v5703_v9 }
 0x1ee   :  { %3698 = vmatprep.mubr.f32.mxu1 %v1572_v63  ;;  %3776 = vmatpush3.msra.mxu1 %v4510_v58  ;;  %v5706_v58 = vld [vmem:[#allocation4_spill] sm:$0xff]  ;;  %v5715_v63 = vld [vmem:[#allocation17_spill] sm:$0xff] }
 0x1ef   :  { %3634 = vmatpush3.msra.mxu0 %v5703_v9  ;;  %3777 = vmatprep.subr.mxu1 %v4518_v7 }
 0x1f0   :  { %3548 = vmatprep.mubr.f32.mxu0 %v1694_v1  ;;  %3635 = vmatprep.subr.mxu0 %v5704_v54 }
 0x1f1   :  { %3778 = vmatpush3.msra.mxu1 %v4518_v7  ;;  %3549 = vmatmul.mubr.f32.gmra.mxu0 %v1704_v21  ;;  %v5707_v7 = vld [vmem:[#allocation6_spill] sm:$0xff] }
 0x1f2   :  { %3636 = vmatpush3.msra.mxu0 %v5704_v54  ;;  %3699 = vmatmul.mubr.f32.gmra.mxu1 %v1582_v40  ;;  %v5714_v40 = vand.u32 4294901760, %v5008_v23 }
 0x1f3   :  { %3779 = vmatprep.subr.mxu1 %v4531_v39  ;;  %3637 = vmatprep.subr.mxu0 %v5705_v50 }
 0x1f4   :  { %3639 = vmatprep.mubr.f32.mxu0 %v4874_v49  ;;  %3701 = vmatprep.mubr.f32.mxu1 %v1592_v36  ;;  %v5711_v49 = vld [vmem:[#allocation11_spill] sm:$0xff] }
 0x1f5   :  { %3780 = vmatpush3.msra.mxu1 %v4531_v39  ;;  %3638 = vmatpush3.msra.mxu0 %v5705_v50  ;;  %v5708_v39 = vld [vmem:[#allocation8_spill] sm:$0xff]  ;;  %v5719_v36 = vld [vmem:[#allocation23_spill] sm:$0xff] }
 0x1f6   :  { %3781 = vmatprep.subr.mxu1 %v4546_v4  ;;  %3719 = vmatprep.subr.mxu0 %v5706_v58 }
 0x1f7   :  { %3782 = vmatpush3.msra.mxu1 %v4546_v4  ;;  %3640 = vmatmul.mubr.f32.vlgmr.msra.gmra.mxu0 %v4862_v12  ;;  %v5709_v4 = vand.u32 4294901760, %v4958_v16  ;;  %v5710_v12 = vand.u32 4294901760, %v4979_v10 }
 0x1f8   :  { %3702 = vmatmul.mubr.f32.gmra.mxu1 %v1602_v24  ;;  %3720 = vmatpush3.msra.mxu0 %v5706_v58  ;;  %v5720_v24 = vld [vmem:[#allocation26_spill] sm:$0xff] }
 0x1f9   :  { %3783 = vmatprep.subr.mxu1 %v5667_v0  ;;  %3642 = vmatprep.mubr.f32.mxu0 %v4900_v60  ;;  %v5713_v60 = vand.u32 4294901760, %v4998_v26 }
 0x1fa   :  { %3704 = vmatprep.mubr.f32.mxu1 %v1612_v18  ;;  %3721 = vmatprep.subr.mxu0 %v5707_v7  ;;  %v5724_v18 = vld [vmem:[#allocation35_spill] sm:$0xff] }
 0x1fb   :  { %3784 = vmatpush3.msra.mxu1 %v5667_v0  ;;  %3722 = vmatpush3.msra.mxu0 %v5707_v7  ;;  %v5718_v0 = vand.u32 4294901760, %v5041_v47 }
 0x1fc   :  { %3785 = vmatprep.subr.mxu1 %v5673_v2  ;;  %3723 = vmatprep.subr.mxu0 %v5708_v39 }
 0x1fd   :  { %3786 = vmatpush3.msra.mxu1 %v5673_v2  ;;  %3643 = vmatmul.mubr.f32.gmra.mxu0 %v4886_v46  ;;  %v5712_v46 = vld [vmem:[#allocation16_spill] sm:$0xff]  ;;  %v5722_v2 = vld [vmem:[#allocation31_spill] sm:$0xff] }
 0x1fe   :  { %3705 = vmatmul.mubr.f32.gmra.mxu1 %v5709_v4  ;;  %3724 = vmatpush3.msra.mxu0 %v5708_v39 }
 0x1ff   :  { %3787 = vmatprep.subr.mxu1 %v5678_v37  ;;  %3645 = vmatprep.mubr.f32.mxu0 %v4925_v43  ;;  %v5717_v43 = vand.u32 4294901760, %v5028_v45 }
 0x200   :  { %3707 = vmatprep.mubr.f32.mxu1 %v5710_v12  ;;  %3725 = vmatprep.subr.mxu0 %v5711_v49 }
 0x201   :  { %3788 = vmatpush3.msra.mxu1 %v5678_v37  ;;  %3726 = vmatpush3.msra.mxu0 %v5711_v49  ;;  %v5726_v37 = vld [vmem:[#allocation41_spill] sm:$0xff] }
 0x202   :  { %3789 = vmatprep.subr.mxu1 %v5683_v8  ;;  %3727 = vmatprep.subr.mxu0 %v5712_v46 }
 0x203   :  { %3790 = vmatpush3.msra.mxu1 %v5683_v8  ;;  %3646 = vmatmul.mubr.f32.gmra.mxu0 %v4920_v14  ;;  %v5716_v14 = vld [vmem:[#allocation20_spill] sm:$0xff] }
 0x204   :  { %3708 = vmatmul.mubr.f32.gmra.mxu1 %v5713_v60  ;;  %3728 = vmatpush3.msra.mxu0 %v5712_v46 }
 0x205   :  { %3791 = vmatprep.subr.mxu1 %v5686_v44  ;;  %3648 = vmatprep.mubr.f32.mxu0 %v4953_v42  ;;  %v5721_v42 = vand.u32 4294901760, %v5056_v38 }
 0x206   :  { %3710 = vmatprep.mubr.f32.mxu1 %v5714_v40  ;;  %3729 = vmatprep.subr.mxu0 %v5715_v63 }
 0x207   :  { %3792 = vmatpush3.msra.mxu1 %v5686_v44  ;;  %3730 = vmatpush3.msra.mxu0 %v5715_v63 }
 0x208   :  { %3793 = vmatprep.subr.mxu1 %v5689_v3  ;;  %3731 = vmatprep.subr.mxu0 %v5716_v14 }
 0x209   :  { %3794 = vmatpush3.msra.mxu1 %v5689_v3  ;;  %3649 = vmatmul.mubr.f32.gmra.mxu0 %v4958_v16  ;;  %v5723_v16 = vld [vmem:[#allocation32_spill] sm:$0xff] }
 0x20a   :  { %3711 = vmatmul.mubr.f32.gmra.mxu1 %v5717_v43  ;;  %3732 = vmatpush3.msra.mxu0 %v5716_v14 }
 0x20b   :  { %3795 = vmatprep.subr.mxu1 %v5691_v25  ;;  %3651 = vmatprep.mubr.f32.mxu0 %v4979_v10  ;;  %v5725_v10 = vld [vmem:[#allocation38_spill] sm:$0xff] }
 0x20c   :  { %3713 = vmatprep.mubr.f32.mxu1 %v5718_v0  ;;  %3733 = vmatprep.subr.mxu0 %v5719_v36 }
 0x20d   :  { %3796 = vmatpush3.msra.mxu1 %v5691_v25  ;;  %3734 = vmatpush3.msra.mxu0 %v5719_v36 }
 0x20e   :  { %3797 = vmatprep.subr.mxu1 %v5693_v53  ;;  %3735 = vmatprep.subr.mxu0 %v5720_v24 }
 0x20f   :  { %3798 = vmatpush3.msra.mxu1 %v5693_v53  ;;  %3652 = vmatmul.mubr.f32.gmra.mxu0 %v4998_v26  ;;  %v5728_v26 = vld [vmem:[#allocation46_spill] sm:$0xff] }
 0x210   :  { %3714 = vmatmul.mubr.f32.gmra.mxu1 %v5721_v42  ;;  %3736 = vmatpush3.msra.mxu0 %v5720_v24 }
 0x211   :  { %3799 = vmatprep.subr.mxu1 %v5695_v29  ;;  %3654 = vmatprep.mubr.f32.mxu0 %v5008_v23 }
 0x212   :  { %3716 = vmatprep.mubr.f32.mxu1 %v1692_v27  ;;  %3737 = vmatprep.subr.mxu0 %v5722_v2 }
 0x213   :  { %3800 = vmatpush3.msra.mxu1 %v5695_v29  ;;  %3738 = vmatpush3.msra.mxu0 %v5722_v2 }
 0x214   :  { %3801 = vmatprep.subr.mxu1 %v5697_v15  ;;  %3739 = vmatprep.subr.mxu0 %v5723_v16 }
 0x215   :  { %3802 = vmatpush3.msra.mxu1 %v5697_v15  ;;  %3655 = vmatmul.mubr.f32.gmra.mxu0 %v5028_v45 }
 0x216   :  { %3717 = vmatmul.mubr.f32.gmra.mxu1 %v1702_v41  ;;  %3740 = vmatpush3.msra.mxu0 %v5723_v16 }
 0x217   :  { %3803 = vmatprep.subr.mxu1 %v5699_v32  ;;  %3657 = vmatprep.mubr.f32.mxu0 %v5041_v47 }
 0x218   :  { %3741 = vmatprep.subr.mxu0 %v5724_v18  ;;  %3804 = vmatpush3.msra.mxu1 %v5699_v32 }
 0x219   :  { %3807 = vmatprep.mubr.f32.mxu1 %v4864_v28  ;;  %3742 = vmatpush3.msra.mxu0 %v5724_v18 }
 0x21a   :  { %3805 = vmatprep.subr.mxu1 %v5701_v48  ;;  %3743 = vmatprep.subr.mxu0 %v5725_v10 }
 0x21b   :  { %3806 = vmatpush3.msra.mxu1 %v5701_v48  ;;  %3658 = vmatmul.mubr.f32.gmra.mxu0 %v5056_v38 }
 0x21c   :  { %3744 = vmatpush3.msra.mxu0 %v5725_v10  ;;  %3808 = vmatmul.mubr.f32.vlgmr.msra.gmra.mxu1 %v4857_v59 }
 0x21d   :  { %3660 = vmatprep.mubr.f32.mxu0 %v5069_v13  ;;  %3745 = vmatprep.subr.mxu0 %v5726_v37 }
 0x21e   :  { %3810 = vmatprep.mubr.f32.mxu1 %v4888_v19  ;;  %3746 = vmatpush3.msra.mxu0 %v5726_v37 }
 0x21f   :  { %3747 = vmatprep.subr.mxu0 %v5727_v62  ;;  %3661 = vmatmul.mubr.f32.gmra.mxu0 %v5082_v30 }
 0x220   :  { %3748 = vmatpush3.msra.mxu0 %v5727_v62  ;;  %3811 = vmatmul.mubr.f32.gmra.mxu1 %v4876_v51 }
 0x221   :  { %3749 = vmatprep.subr.mxu0 %v5728_v26  ;;  %3751 = vmatprep.mubr.f32.mxu0 %v4864_v28 }
 0x222   :  { %3813 = vmatprep.mubr.f32.mxu1 %v4915_v34  ;;  %3750 = vmatpush3.msra.mxu0 %v5728_v26 }
 0x223   :  { %3752 = vmatmul.mubr.f32.vlgmr.msra.gmra.mxu0 %v4857_v59 }
 0x224   :  { %3814 = vmatmul.mubr.f32.gmra.mxu1 %v4905_v6  ;;  %3754 = vmatprep.mubr.f32.mxu0 %v4888_v19 }
 0x225   :  { %3816 = vmatprep.mubr.f32.mxu1 %v4941_v33 }
 0x227   :  { %3755 = vmatmul.mubr.f32.gmra.mxu0 %v4876_v51 }
 0x228   :  { %3817 = vmatmul.mubr.f32.gmra.mxu1 %v4929_v56  ;;  %3757 = vmatprep.mubr.f32.mxu0 %v4915_v34 }
 0x229   :  { %3819 = vmatprep.mubr.f32.mxu1 %v4964_v22 }
 0x22b   :  { %3758 = vmatmul.mubr.f32.gmra.mxu0 %v4905_v6 }
 0x22c   :  { %3820 = vmatmul.mubr.f32.gmra.mxu1 %v4969_v20  ;;  %3760 = vmatprep.mubr.f32.mxu0 %v4941_v33 }
 0x22d   :  { %3822 = vmatprep.mubr.f32.mxu1 %v4993_v11 }
 0x22f   :  { %3761 = vmatmul.mubr.f32.gmra.mxu0 %v4929_v56 }
 0x230   :  { %3823 = vmatmul.mubr.f32.gmra.mxu1 %v5005_v61  ;;  %3763 = vmatprep.mubr.f32.mxu0 %v4964_v22 }
 0x231   :  { %3825 = vmatprep.mubr.f32.mxu1 %v5023_v35 }
 0x233   :  { %3764 = vmatmul.mubr.f32.gmra.mxu0 %v4969_v20 }
 0x234   :  { %3826 = vmatmul.mubr.f32.gmra.mxu1 %v5034_v57  ;;  %3766 = vmatprep.mubr.f32.mxu0 %v4993_v11 }
 0x235   :  { %3828 = vmatprep.mubr.f32.mxu1 %v5051_v52 }
 0x237   :  { %3767 = vmatmul.mubr.f32.gmra.mxu0 %v5005_v61 }
 0x238   :  { %3829 = vmatmul.mubr.f32.gmra.mxu1 %v5062_v55  ;;  %3769 = vmatprep.mubr.f32.mxu0 %v5023_v35 }
 0x23b   :  { %3770 = vmatmul.mubr.f32.gmra.mxu0 %v5034_v57 }
 0x23c   :  { %3772 = vmatprep.mubr.f32.mxu0 %v5051_v52 }
 0x23f   :  { %3773 = vmatmul.mubr.f32.gmra.mxu0 %v5062_v55 }
 0x27f   :  { %v3585_v59 = vpop.f32.mrf.mxu1 }
 0x281   :  { %v5259_v28 = vpop.f32.mrf.mxu1 }
 0x283   :  { %v5261_v51 = vpop.f32.mrf.mxu1 }
 0x285   :  { %v5263_v19 = vpop.f32.mrf.mxu1 }
 0x287   :  { %v5265_v6 = vpop.f32.mrf.mxu1 }
 0x288   :  { %v3529_v34 = vpop.f32.mrf.mxu0 }
 0x289   :  { %v5267_v33 = vpop.f32.mrf.mxu1  ;;  %v1864_v37 = vadd.f32 %v3585_v59, %v3529_v34 }
 0x28a   :  { %v1556_v56 = vpop.f32.mrf.mxu0 }
 0x28d   :  { %v3532_v22 = vpop.f32.mrf.mxu0 }
 0x28e   :  { %v5269_v20 = vpop.f32.mrf.mxu1 }
 0x28f   :  { %v1576_v11 = vpop.f32.mrf.mxu0 }
 0x290   :  { %v5271_v8 = vpop.f32.mrf.mxu1 }
 0x293   :  { %v5273_v27 = vpop.f32.mrf.mxu0 }
 0x294   :  { %v5275_v61 = vpop.f32.mrf.mxu1 }
 0x295   :  { %v5277_v23 = vpop.f32.mrf.mxu0 }
 0x296   :  { %v5279_v44 = vpop.f32.mrf.mxu1 }
 0x299   :  { %v5281_v48 = vpop.f32.mrf.mxu0 }
 0x29a   :  { %v5283_v35 = vpop.f32.mrf.mxu1 }
 0x29b   :  { %v5285_v45 = vpop.f32.mrf.mxu0 }
 0x29c   :  { %v5287_v3 = vpop.f32.mrf.mxu1 }
 0x29f   :  { %v5289_v57 = vpop.f32.mrf.mxu0 }
 0x2a0   :  { %v5291_v47 = vpop.f32.mrf.mxu1 }
 0x2a1   :  { %v5293_v25 = vpop.f32.mrf.mxu0 }
 0x2a2   :  { %v5295_v52 = vpop.f32.mrf.mxu1 }
 0x2a5   :  { %v5297_v38 = vpop.f32.mrf.mxu0 }
 0x2a6   :  { %v5299_v53 = vpop.f32.mrf.mxu1 }
 0x2a7   :  { %5729 = vst [vmem:[#allocation56_spill] sm:$0xff] %v5299_v53  ;;  %v5301_v41 = vpop.f32.mrf.mxu0 }
 0x2a8   :  { %v5303_v55 = vpop.f32.mrf.mxu1 }
 0x2a9   :  { %5730 = vst [vmem:[#allocation10_spill] sm:$0xff] %v5303_v55 }
 0x2ab   :  { %v5305_v13 = vpop.f32.mrf.mxu0 }
 0x2ac   :  { %v3697_v29 = vpop.f32.mrf.mxu1 }
 0x2ad   :  { %v5307_v30 = vpop.f32.mrf.mxu0 }
 0x2ae   :  { %v2245_v15 = vpop.f32.mrf.mxu1 }
 0x2b1   :  { %v5309_v32 = vpop.f32.mrf.mxu0 }
 0x2b2   :  { %5731 = vst [vmem:[#allocation50_spill] sm:$0xff] %v5309_v32  ;;  %v3700_v17 = vpop.f32.mrf.mxu1 }
 0x2b3   :  { %v5311_v31 = vpop.f32.mrf.mxu0 }
 0x2b4   :  { %5732 = vst [vmem:[#allocation3_spill] sm:$0xff] %v5311_v31  ;;  %v2261_v5 = vpop.f32.mrf.mxu1 }
 0x2b7   :  { %v3641_v1 = vpop.f32.mrf.mxu0 }
 0x2b8   :  { %v5313_v9 = vpop.f32.mrf.mxu1  ;;  %v2059_v55 = vadd.f32 %v3641_v1, %v1864_v37 }
 0x2b9   :  { %v2051_v21 = vpop.f32.mrf.mxu0 }
 0x2ba   :  { %v5315_v54 = vpop.f32.mrf.mxu1  ;;  %v2254_v59 = vadd.f32 %v3697_v29, %v2059_v55 }
 0x2bd   :  { %v3644_v50 = vpop.f32.mrf.mxu0 }
 0x2be   :  { %v5317_v58 = vpop.f32.mrf.mxu1 }
 0x2bf   :  { %v2065_v7 = vpop.f32.mrf.mxu0 }
 0x2c0   :  { %v5319_v39 = vpop.f32.mrf.mxu1 }
 0x2c3   :  { %v3647_v4 = vpop.f32.mrf.mxu0 }
 0x2c4   :  { %v5321_v12 = vpop.f32.mrf.mxu1 }
 0x2c5   :  { %v2079_v49 = vpop.f32.mrf.mxu0 }
 0x2c6   :  { %v5323_v46 = vpop.f32.mrf.mxu1 }
 0x2c9   :  { %v3650_v60 = vpop.f32.mrf.mxu0 }
 0x2ca   :  { %v5325_v40 = vpop.f32.mrf.mxu1 }
 0x2cb   :  { %5733 = vst [vmem:[#allocation47_spill] sm:$0xff] %v5325_v40  ;;  %v2093_v63 = vpop.f32.mrf.mxu0 }
 0x2cc   :  { %v5327_v14 = vpop.f32.mrf.mxu1 }
 0x2cd   :  { %5734 = vst [vmem:[#allocation55_spill] sm:$0xff] %v5327_v14 }
 0x2cf   :  { %v5329_v43 = vpop.f32.mrf.mxu0 }
 0x2d0   :  { %v5331_v0 = vpop.f32.mrf.mxu1 }
 0x2d1   :  { %5735 = vst [vmem:[#allocation5_spill] sm:$0xff] %v5331_v0  ;;  %v5333_v36 = vpop.f32.mrf.mxu0  ;;  %v1858_v0 = vadd.f32 %v5259_v28, %v1556_v56 }
 0x2d2   :  { %v5335_v24 = vpop.f32.mrf.mxu1 }
 0x2d3   :  { %5736 = vst [vmem:[#allocation12_spill] sm:$0xff] %v5335_v24  ;;  %v1876_v24 = vadd.f32 %v5261_v51, %v3532_v22  ;;  %v2052_v53 = vadd.f32 %v2051_v21, %v1858_v0  ;;  %v1882_v51 = vadd.f32 %v5267_v33, %v5277_v23  ;;  %v1894_v33 = vadd.f32 %v5271_v8, %v5285_v45 }
 0x2d5   :  { %v5337_v42 = vpop.f32.mrf.mxu0  ;;  %v2073_v40 = vadd.f32 %v3644_v50, %v1876_v24  ;;  %v2246_v37 = vadd.f32 %v2245_v15, %v2052_v53  ;;  %v2080_v29 = vadd.f32 %v2079_v49, %v1882_v51  ;;  %v5745_v51 = vld [vmem:[#allocation50_spill] sm:$0xff] }
 0x2d6   :  { %v5339_v2 = vpop.f32.mrf.mxu1 }
 0x2d7   :  { %5737 = vst [vmem:[#allocation7_spill] sm:$0xff] %v5339_v2  ;;  %v5341_v16 = vpop.f32.mrf.mxu0  ;;  %v2278_v49 = vadd.f32 %v5315_v54, %v2080_v29 }
 0x2d8   :  { %v5343_v18 = vpop.f32.mrf.mxu1 }
 0x2d9   :  { %5738 = vst [vmem:[#allocation52_spill] sm:$0xff] %v5343_v18  ;;  %v1870_v18 = vadd.f32 %v5263_v19, %v1576_v11  ;;  %v2270_v19 = vadd.f32 %v3700_v17, %v2073_v40  ;;  %v1900_v11 = vadd.f32 %v5269_v20, %v5281_v48 }
 0x2db   :  { %v5345_v10 = vpop.f32.mrf.mxu0  ;;  %v2066_v28 = vadd.f32 %v2065_v7, %v1870_v18  ;;  %v2101_v50 = vadd.f32 %v3650_v60, %v1900_v11  ;;  %v1906_v60 = vadd.f32 %v5279_v44, %v5293_v25 }
 0x2dc   :  { %5739 = vst [vmem:[#allocation49_spill] sm:$0xff] %v5345_v10  ;;  %v3809_v62 = vpop.f32.mrf.mxu1 }
 0x2dd   :  { %v5347_v26 = vpop.f32.mrf.mxu0  ;;  %v2262_v15 = vadd.f32 %v2261_v5, %v2066_v28  ;;  %v2302_v24 = vadd.f32 %v5317_v58, %v2101_v50  ;;  %v2108_v54 = vadd.f32 %v5333_v36, %v1906_v60  ;;  %v1930_v28 = vadd.f32 %v5295_v52, %v5307_v30 }
 0x2de   :  { %5740 = vst [vmem:[#allocation58_spill] sm:$0xff] %v5347_v26  ;;  %v2661_v31 = vpop.f32.mrf.mxu1  ;;  %v1888_v26 = vadd.f32 %v5265_v6, %v5273_v27 }
 0x2df   :  { %v5350_v14 = vpop.f32.mrf.mxu0 }
 0x2e0   :  { %5741 = vst [vmem:[#allocation15_spill] sm:$0xff] %v5350_v14  ;;  %v3812_v2 = vpop.f32.mrf.mxu1  ;;  %v2087_v21 = vadd.f32 %v3647_v4, %v1888_v26  ;;  %v2094_v4 = vadd.f32 %v2093_v63, %v1894_v33 }
 0x2e1   :  { %v5353_v32 = vpop.f32.mrf.mxu0 }
 0x2e2   :  { %5742 = vst [vmem:[#allocation9_spill] sm:$0xff] %v5353_v32  ;;  %v2673_v10 = vpop.f32.mrf.mxu1  ;;  %v2286_v7 = vadd.f32 %v5313_v9, %v2087_v21 }
 0x2e3   :  { %v3753_v34 = vpop.f32.mrf.mxu0 }
 0x2e4   :  { %v2491_v56 = vadd.f32 %v3753_v34, %v2254_v59  ;;  %v3815_v1 = vpop.f32.mrf.mxu1 }
 0x2e5   :  { %v2484_v22 = vpop.f32.mrf.mxu0 }
 0x2e6   :  { %v2668_v0 = vadd.f32 %v3809_v62, %v2491_v56  ;;  %v2485_v32 = vadd.f32 %v2484_v22, %v2246_v37  ;;  %v2685_v14 = vpop.f32.mrf.mxu1  ;;  %v1918_v62 = vadd.f32 %v5287_v3, %v5301_v41  ;;  %v5746_v22 = vld [vmem:[#allocation56_spill] sm:$0xff] }
 0x2e7   :  { %v3756_v55 = vpop.f32.mrf.mxu0  ;;  %v1948_v21 = vadd.f32 %v5746_v22, %v5745_v51  ;;  %v5751_v33 = vld [vmem:[#allocation15_spill] sm:$0xff] }
 0x2e8   :  { %2756 = vst [vmem:[%s5451_s3 + $0x8] sm:$0xff] %v2668_v0  ;;  %v2662_v6 = vadd.f32 %v2661_v31, %v2485_v32  ;;  %v2503_v27 = vadd.f32 %v3756_v55, %v2270_v19  ;;  %v3818_v53 = vpop.f32.mrf.mxu1  ;;  %v1912_v32 = vadd.f32 %v5275_v61, %v5289_v57  ;;  %v5748_v55 = vld [vmem:[#allocation55_spill] sm:$0xff] }
 0x2e9   :  { %v2496_v23 = vpop.f32.mrf.mxu0 }
 0x2ea   :  { %2755 = vst [vmem:[%s5451_s3] sm:$0xff] %v2662_v6  ;;  %v2680_v20 = vadd.f32 %v3812_v2, %v2503_v27  ;;  %v2497_v48 = vadd.f32 %v2496_v23, %v2262_v15  ;;  %v2697_v17 = vpop.f32.mrf.mxu1  ;;  %v2115_v9 = vadd.f32 %v5329_v43, %v1912_v32  ;;  %v1924_v2 = vadd.f32 %v5283_v35, %v5297_v38  ;;  %v5749_v6 = vld [vmem:[#allocation3_spill] sm:$0xff]  ;;  %v5750_v27 = vld [vmem:[#allocation10_spill] sm:$0xff] }
 0x2eb   :  { %v3759_v31 = vpop.f32.mrf.mxu0  ;;  %v2157_v23 = vadd.f32 %v5751_v33, %v1948_v21 }
 0x2ec   :  { %2758 = vst [vmem:[%s5451_s3 + $0x18] sm:$0xff] %v2680_v20  ;;  %v2674_v8 = vadd.f32 %v2673_v10, %v2497_v48  ;;  %v2515_v45 = vadd.f32 %v3759_v31, %v2286_v7  ;;  %v3821_v5 = vpop.f32.mrf.mxu1  ;;  %v2294_v10 = vadd.f32 %v5319_v39, %v2094_v4  ;;  %v2129_v58 = vadd.f32 %v5337_v42, %v1924_v2  ;;  %v5752_v48 = vld [vmem:[#allocation5_spill] sm:$0xff] }
 0x2ed   :  { %v2508_v40 = vpop.f32.mrf.mxu0  ;;  %v2318_v36 = vadd.f32 %v5321_v12, %v2115_v9  ;;  %v2122_v39 = vadd.f32 %v5341_v16, %v1918_v62  ;;  %v2310_v42 = vadd.f32 %v5323_v46, %v2108_v54  ;;  %v5743_v12 = vld [vmem:[#allocation49_spill] sm:$0xff]  ;;  %v5744_v16 = vld [vmem:[#allocation47_spill] sm:$0xff]  ;;  %v5747_v46 = vld [vmem:[#allocation58_spill] sm:$0xff] }
 0x2ee   :  { %2757 = vst [vmem:[%s5451_s3 + $0x10] sm:$0xff] %v2674_v8  ;;  %v2692_v61 = vadd.f32 %v3815_v1, %v2515_v45  ;;  %v2509_v57 = vadd.f32 %v2508_v40, %v2278_v49  ;;  %v2709_v63 = vpop.f32.mrf.mxu1  ;;  %v2334_v37 = vadd.f32 %v5744_v16, %v2129_v58  ;;  %v2136_v11 = vadd.f32 %v5747_v46, %v1930_v28  ;;  %v5753_v31 = vld [vmem:[#allocation9_spill] sm:$0xff]  ;;  %v5756_v54 = vld [vmem:[#allocation52_spill] sm:$0xff] }
 0x2ef   :  { %v3762_v18 = vpop.f32.mrf.mxu0  ;;  %v2326_v29 = vadd.f32 %v5748_v55, %v2122_v39 }
 0x2f0   :  { %2760 = vst [vmem:[%s5451_s3 + $0x28] sm:$0xff] %v2692_v61  ;;  %v2686_v44 = vadd.f32 %v2685_v14, %v2509_v57  ;;  %v2527_v25 = vadd.f32 %v3762_v18, %v2302_v24  ;;  %v3824_v43 = vpop.f32.mrf.mxu1  ;;  %v1936_v14 = vadd.f32 %v5291_v47, %v5305_v13  ;;  %v5755_v61 = vld [vmem:[#allocation7_spill] sm:$0xff] }
 0x2f1   :  { %v2520_v26 = vpop.f32.mrf.mxu0  ;;  %v2366_v57 = vadd.f32 %v5755_v61, %v2157_v23 }
 0x2f2   :  { %2759 = vst [vmem:[%s5451_s3 + $0x20] sm:$0xff] %v2686_v44  ;;  %v2704_v35 = vadd.f32 %v3818_v53, %v2527_v25  ;;  %v2521_v38 = vadd.f32 %v2520_v26, %v2294_v10  ;;  %v2721_v59 = vpop.f32.mrf.mxu1  ;;  %v2143_v1 = vadd.f32 %v5743_v12, %v1936_v14  ;;  %v1942_v53 = vadd.f32 %v5750_v27, %v5749_v6 }
 0x2f3   :  { %v3765_v34 = vpop.f32.mrf.mxu0 }
 0x2f4   :  { %2762 = vst [vmem:[%s5451_s3 + $0x38] sm:$0xff] %v2704_v35  ;;  %v2698_v3 = vadd.f32 %v2697_v17, %v2521_v38  ;;  %v2539_v41 = vadd.f32 %v3765_v34, %v2318_v36  ;;  %v3827_v0 = vpop.f32.mrf.mxu1  ;;  %v2350_v17 = vadd.f32 %v5752_v48, %v2143_v1  ;;  %v2150_v4 = vadd.f32 %v5753_v31, %v1942_v53 }
 0x2f5   :  { %v2532_v56 = vpop.f32.mrf.mxu0 }
 0x2f6   :  { %2761 = vst [vmem:[%s5451_s3 + $0x30] sm:$0xff] %v2698_v3  ;;  %v2716_v47 = vadd.f32 %v3821_v5, %v2539_v41  ;;  %v2533_v13 = vadd.f32 %v2532_v56, %v2310_v42  ;;  %v2733_v7 = vpop.f32.mrf.mxu1  ;;  %v5754_v5 = vld [vmem:[#allocation12_spill] sm:$0xff]  ;;  %v2358_v44 = vadd.f32 %v5756_v54, %v2150_v4 }
 0x2f7   :  { %v3768_v19 = vpop.f32.mrf.mxu0  ;;  %v2342_v49 = vadd.f32 %v5754_v5, %v2136_v11 }
 0x2f8   :  { %2764 = vst [vmem:[%s5451_s3 + $0x48] sm:$0xff] %v2716_v47  ;;  %v2710_v52 = vadd.f32 %v2709_v63, %v2533_v13  ;;  %v2551_v30 = vadd.f32 %v3768_v19, %v2334_v37  ;;  %v3830_v63 = vpop.f32.mrf.mxu1 }
 0x2f9   :  { %v2544_v15 = vpop.f32.mrf.mxu0 }
 0x2fa   :  { %2763 = vst [vmem:[%s5451_s3 + $0x40] sm:$0xff] %v2710_v52  ;;  %v2728_v50 = vadd.f32 %v3824_v43, %v2551_v30  ;;  %v2545_v20 = vadd.f32 %v2544_v15, %v2326_v29  ;;  %v2745_v62 = vpop.f32.mrf.mxu1 }
 0x2fb   :  { %v3771_v32 = vpop.f32.mrf.mxu0 }
 0x2fc   :  { %2766 = vst [vmem:[%s5451_s3 + $0x58] sm:$0xff] %v2728_v50  ;;  %v2722_v8 = vadd.f32 %v2721_v59, %v2545_v20  ;;  %v2563_v45 = vadd.f32 %v3771_v32, %v2350_v17 }
 0x2fd   :  { %v2556_v60 = vpop.f32.mrf.mxu0 }
 0x2fe   :  { %2765 = vst [vmem:[%s5451_s3 + $0x50] sm:$0xff] %v2722_v8  ;;  %v2740_v40 = vadd.f32 %v3827_v0, %v2563_v45  ;;  %v2557_v9 = vadd.f32 %v2556_v60, %v2342_v49 }
 0x2ff   :  { %v3774_v24 = vpop.f32.mrf.mxu0 }
 0x300   :  { %2768 = vst [vmem:[%s5451_s3 + $0x68] sm:$0xff] %v2740_v40  ;;  %v2734_v2 = vadd.f32 %v2733_v7, %v2557_v9  ;;  %v2575_v18 = vadd.f32 %v3774_v24, %v2366_v57 }
 0x301   :  { %v2568_v25 = vpop.f32.mrf.mxu0 }
 0x302   :  { %2767 = vst [vmem:[%s5451_s3 + $0x60] sm:$0xff] %v2734_v2  ;;  %v2752_v43 = vadd.f32 %v3830_v63, %v2575_v18  ;;  %v2569_v10 = vadd.f32 %v2568_v25, %v2358_v44 }
 0x304   :  { %2770 = vst [vmem:[%s5451_s3 + $0x78] sm:$0xff] %v2752_v43  ;;  %v2746_v26 = vadd.f32 %v2745_v62, %v2569_v10 }
 0x306   :  { %2769 = vst [vmem:[%s5451_s3 + $0x70] sm:$0xff] %v2746_v26 }

</bundles_post_ra>
